<compile_context>
chip_gen: v6e
topology: v6e:2x2x1
jax: 0.10.0
libtpu: 0.0.40
codegen_flags: <defaults>
</compile_context>

<pallas_src>
import jax
import jax.numpy as jnp
from jax.experimental import pallas as pl
from jax.experimental.pallas import tpu as pltpu


# ---------------------------------------------------------------------------
# Fused Fire forward
# ---------------------------------------------------------------------------
def fire_forward(x, w_sq, b_sq, w_e1, b_e1, w_e3, b_e3):
    """Fire.forward. x is NCDHW; weights in PyTorch Conv3d layout (O,I,kD,kH,kW)."""
    N, Cin, D, H, W = x.shape
    Csq = w_sq.shape[0]
    Ce1 = w_e1.shape[0]
    Ce3 = w_e3.shape[0]
    Ctot = Ce1 + Ce3
    M = D * H * W
    PADF = H * W + W + 1                      # largest |flattened tap offset|
    PADL = ((PADF + 127) // 128) * 128        # lane-aligned pad on both sides

    # ---- glue: free reshapes / tiny weight reshuffles only -----------------
    x3 = x.reshape(N, Cin, M)                                    # (N, Cin, M)
    w_sq2 = w_sq.reshape(Csq, Cin)                               # (Csq, Cin)
    b_sq2 = b_sq.reshape(Csq, 1)
    # fused head: expand1x1 weights stacked with the centre tap of expand3x3
    w_head = jnp.concatenate(
        [w_e1.reshape(Ce1, Csq), w_e3[:, :, 1, 1, 1].reshape(Ce3, Csq)],
        axis=0)                                                  # (Ctot, Csq)
    b_head = jnp.concatenate([b_e1, b_e3], axis=0).reshape(Ctot, 1)
    # per-tap expand3x3 weights, tap order k = kd*9 + kh*3 + kw
    w_e3t = jnp.transpose(w_e3, (2, 3, 4, 0, 1)).reshape(27, Ce3, Csq)
    # spatial coordinates of every flattened position (for boundary masks)
    dd, hh, ww = jnp.meshgrid(jnp.arange(D, dtype=jnp.int32),
                              jnp.arange(H, dtype=jnp.int32),
                              jnp.arange(W, dtype=jnp.int32), indexing="ij")
    coords = jnp.stack([dd.reshape(M), hh.reshape(M), ww.reshape(M)], axis=0)

    def kernel(coords_ref, x_ref, wsq_ref, bsq_ref, whead_ref, bhead_ref,
               we3_ref, o_ref, spad_ref):
        # --- squeeze 1x1x1 conv + ReLU; result stays resident in VMEM -------
        s = jnp.dot(wsq_ref[...], x_ref[...],
                    preferred_element_type=jnp.float32) + bsq_ref[...]
        s = jnp.maximum(s, 0.0)                                   # (Csq, M)

        # --- fused head matmul: expand1x1 + centre tap of expand3x3 ---------
        y = jnp.dot(whead_ref[...], s,
                    preferred_element_type=jnp.float32) + bhead_ref[...]
        o_ref[0:Ce1, :] = jnp.maximum(y[0:Ce1, :], 0.0).astype(o_ref.dtype)
        acc = y[Ce1:Ctot, :]                      # (Ce3, M) f32, centre + bias

        # --- expand3x3 conv (padding=1): 26 remaining shifted matmuls -------
        # Zero-padded flat copy of s so every shifted window is a plain static
        # slice; out-of-volume taps are killed by the boundary masks below.
        # Only the pad regions need zeroing (interior fully rewritten below).
        spad_ref[:, 0:PADL] = jnp.zeros((Csq, PADL), jnp.float32)
        spad_ref[:, PADL + M:PADL + M + PADL] = jnp.zeros((Csq, PADL),
                                                          jnp.float32)
        spad_ref[:, PADL:PADL + M] = s            # lane-aligned big store

        d_i = coords_ref[0:1, :]                                  # (1, M)
        h_i = coords_ref[1:2, :]
        w_i = coords_ref[2:3, :]
        vd = {0: d_i >= 1, 2: d_i < D - 1}        # centre offset always valid
        vh = {0: h_i >= 1, 2: h_i < H - 1}
        vw = {0: w_i >= 1, 2: w_i < W - 1}

        for kd in range(3):
            for kh in range(3):
                for kw in range(3):
                    k = kd * 9 + kh * 3 + kw
                    if k == 13:
                        continue                  # centre tap already in head
                    off = (kd - 1) * H * W + (kh - 1) * W + (kw - 1)
                    tap = spad_ref[:, PADL + off:PADL + off + M]  # (Csq, M)
                    mask = None
                    for v, kk in ((vd, kd), (vh, kh), (vw, kw)):
                        if kk != 1:
                            mask = v[kk] if mask is None else (mask & v[kk])
                    tap = jnp.where(mask, tap, 0.0)
                    acc = acc + jnp.dot(we3_ref[k], tap,
                                        preferred_element_type=jnp.float32)
        o_ref[Ce1:Ctot, :] = jnp.maximum(acc, 0.0).astype(o_ref.dtype)

    out3 = pl.pallas_call(
        kernel,
        out_shape=jax.ShapeDtypeStruct((N, Ctot, M), x.dtype),
        grid_spec=pltpu.PrefetchScalarGridSpec(
            num_scalar_prefetch=0,
            grid=(N,),
            in_specs=[
                pl.BlockSpec((3, M), lambda n: (0, 0)),             # coords
                pl.BlockSpec((None, Cin, M), lambda n: (n, 0, 0)),  # x, 1 sample
                pl.BlockSpec((Csq, Cin), lambda n: (0, 0)),         # w_sq
                pl.BlockSpec((Csq, 1), lambda n: (0, 0)),           # b_sq
                pl.BlockSpec((Ctot, Csq), lambda n: (0, 0)),        # w_head
                pl.BlockSpec((Ctot, 1), lambda n: (0, 0)),          # b_head
                pl.BlockSpec((27, Ce3, Csq), lambda n: (0, 0, 0)),  # w_e3 taps
            ],
            out_specs=pl.BlockSpec((None, Ctot, M), lambda n: (n, 0, 0)),
            scratch_shapes=[pltpu.VMEM((Csq, M + 2 * PADL), jnp.float32)],
        ),
        compiler_params=pltpu.CompilerParams(
            dimension_semantics=("parallel",)),
    )(coords, x3, w_sq2, b_sq2, w_head, b_head, w_e3t)

    # (N, Ce1+Ce3, M) -> NCDHW; pure reshape, no transpose / concat passes.
    return out3.reshape(N, Ctot, D, H, W)


# ---------------------------------------------------------------------------
# Pure-JAX reference (independent, via lax.conv) for the correctness check
# ---------------------------------------------------------------------------
def _ref_fire(x, w_sq, b_sq, w_e1, b_e1, w_e3, b_e3):
    def conv(inp, w, pad):
        dn = jax.lax.conv_dimension_numbers(inp.shape, w.shape,
                                            ("NCDHW", "OIDHW", "NCDHW"))
        return jax.lax.conv_general_dilated(
            inp, w, window_strides=(1, 1, 1), padding=pad,
            dimension_numbers=dn,
            preferred_element_type=jnp.float32)
    s = jax.nn.relu(conv(x, w_sq, "VALID") + b_sq.reshape(1, -1, 1, 1, 1))
    e1 = jax.nn.relu(conv(s, w_e1, "VALID") + b_e1.reshape(1, -1, 1, 1, 1))
    e3 = jax.nn.relu(conv(s, w_e3, "SAME") + b_e3.reshape(1, -1, 1, 1, 1))
    return jnp.concatenate([e1, e3], axis=1)


if __name__ == "__main__":
    # Fire(inplanes=4, squeeze_planes=4, expand1x1_planes=8, expand3x3_planes=8)
    N, Cin, D, H, W = 2, 4, 8, 8, 8
    Csq, Ce1, Ce3 = 4, 8, 8

    key = jax.random.PRNGKey(0)
    ks = jax.random.split(key, 7)
    x = jax.random.normal(ks[0], (N, Cin, D, H, W), jnp.float32)
    w_sq = 0.1 * jax.random.normal(ks[1], (Csq, Cin, 1, 1, 1), jnp.float32)
    b_sq = 0.1 * jax.random.normal(ks[2], (Csq,), jnp.float32)
    w_e1 = 0.1 * jax.random.normal(ks[3], (Ce1, Csq, 1, 1, 1), jnp.float32)
    b_e1 = 0.1 * jax.random.normal(ks[4], (Ce1,), jnp.float32)
    w_e3 = 0.1 * jax.random.normal(ks[5], (Ce3, Csq, 3, 3, 3), jnp.float32)
    b_e3 = 0.1 * jax.random.normal(ks[6], (Ce3,), jnp.float32)

    out = jax.jit(fire_forward)(x, w_sq, b_sq, w_e1, b_e1, w_e3, b_e3)
    out = jax.block_until_ready(out)

    assert out.shape == (N, Ce1 + Ce3, D, H, W), out.shape

    ref = _ref_fire(x, w_sq, b_sq, w_e1, b_e1, w_e3, b_e3)
    max_err = float(jnp.max(jnp.abs(out - ref)))
    # tolerance reflects default-precision MXU f32 matmul vs. lax.conv reference
    assert max_err < 2e-2, f"mismatch vs reference: {max_err}"

    print("KERNEL_OK")
</pallas_src>

<mosaic_0001>
module attributes {stable_mosaic.version = 11 : i64} {
  func.func @kernel(%arg0: i32, %arg1: memref<3x512xi32, #tpu.memory_space<vmem>>, %arg2: memref<1x4x512xf32, #tpu.memory_space<vmem>>, %arg3: memref<4x4xf32, #tpu.memory_space<vmem>>, %arg4: memref<4x1xf32, #tpu.memory_space<vmem>>, %arg5: memref<16x4xf32, #tpu.memory_space<vmem>>, %arg6: memref<16x1xf32, #tpu.memory_space<vmem>>, %arg7: memref<27x8x4xf32, #tpu.memory_space<vmem>>, %arg8: memref<1x16x512xf32, #tpu.memory_space<vmem>>, %arg9: memref<4x768xf32, #tpu.memory_space<vmem>>) attributes {dimension_semantics = [#tpu.dimension_semantics<parallel>], iteration_bounds = array<i64: 2>, scalar_prefetch = 0 : i64, scratch_operands = 1 : i64, tpu.core_type = #tpu.core_type<tc>, window_params = [{pipeline_mode = #tpu.pipeline_mode<synchronous>, transform_indices = @transform_0, window_bounds = array<i64: 3, 512>}, {transform_indices = @transform_1, window_bounds = array<i64: 1, 4, 512>}, {pipeline_mode = #tpu.pipeline_mode<synchronous>, transform_indices = @transform_2, window_bounds = array<i64: 4, 4>}, {pipeline_mode = #tpu.pipeline_mode<synchronous>, transform_indices = @transform_3, window_bounds = array<i64: 4, 1>}, {pipeline_mode = #tpu.pipeline_mode<synchronous>, transform_indices = @transform_4, window_bounds = array<i64: 16, 4>}, {pipeline_mode = #tpu.pipeline_mode<synchronous>, transform_indices = @transform_5, window_bounds = array<i64: 16, 1>}, {pipeline_mode = #tpu.pipeline_mode<synchronous>, transform_indices = @transform_6, window_bounds = array<i64: 27, 8, 4>}, {transform_indices = @transform_7, window_bounds = array<i64: 1, 16, 512>}]} {
    %c0 = arith.constant 0 : index
    %c0_0 = arith.constant 0 : index
    %0 = vector.load %arg3[%c0, %c0_0] : memref<4x4xf32, #tpu.memory_space<vmem>>, vector<4x4xf32>
    %c0_1 = arith.constant 0 : index
    %c0_2 = arith.constant 0 : index
    %c0_3 = arith.constant 0 : index
    %1 = vector.load %arg2[%c0_1, %c0_2, %c0_3] : memref<1x4x512xf32, #tpu.memory_space<vmem>>, vector<1x4x512xf32>
    %2 = vector.shape_cast %1 : vector<1x4x512xf32> to vector<4x512xf32>
    %cst = arith.constant dense<0.000000e+00> : vector<4x512xf32>
    %3 = tpu.matmul %0, %2, %cst {dimension_numbers = #tpu.dot_dimension_numbers<[1], [0], [0], [1], [0, 0, 1, 1], [], []>} : vector<4x4xf32>, vector<4x512xf32>, vector<4x512xf32> -> vector<4x512xf32>
    %c0_4 = arith.constant 0 : index
    %c0_5 = arith.constant 0 : index
    %4 = vector.load %arg4[%c0_4, %c0_5] : memref<4x1xf32, #tpu.memory_space<vmem>>, vector<4x1xf32>
    %5 = vector.broadcast %4 : vector<4x1xf32> to vector<4x512xf32>
    %6 = arith.addf %3, %5 : vector<4x512xf32>
    %cst_6 = arith.constant 0.000000e+00 : f32
    %7 = vector.broadcast %cst_6 : f32 to vector<4x512xf32>
    %8 = arith.maximumf %6, %7 : vector<4x512xf32>
    %c0_7 = arith.constant 0 : index
    %c0_8 = arith.constant 0 : index
    %9 = vector.load %arg5[%c0_7, %c0_8] : memref<16x4xf32, #tpu.memory_space<vmem>>, vector<16x4xf32>
    %cst_9 = arith.constant dense<0.000000e+00> : vector<16x512xf32>
    %10 = tpu.matmul %9, %8, %cst_9 {dimension_numbers = #tpu.dot_dimension_numbers<[1], [0], [0], [1], [0, 0, 1, 1], [], []>} : vector<16x4xf32>, vector<4x512xf32>, vector<16x512xf32> -> vector<16x512xf32>
    %c0_10 = arith.constant 0 : index
    %c0_11 = arith.constant 0 : index
    %11 = vector.load %arg6[%c0_10, %c0_11] : memref<16x1xf32, #tpu.memory_space<vmem>>, vector<16x1xf32>
    %12 = vector.broadcast %11 : vector<16x1xf32> to vector<16x512xf32>
    %13 = arith.addf %10, %12 : vector<16x512xf32>
    %14 = vector.extract_strided_slice %13 {offsets = [0, 0], sizes = [8, 512], strides = [1, 1]} : vector<16x512xf32> to vector<8x512xf32>
    %cst_12 = arith.constant 0.000000e+00 : f32
    %15 = vector.broadcast %cst_12 : f32 to vector<8x512xf32>
    %16 = arith.maximumf %14, %15 : vector<8x512xf32>
    %c0_13 = arith.constant 0 : index
    %c0_14 = arith.constant 0 : index
    %c0_15 = arith.constant 0 : index
    %17 = vector.load %arg8[%c0_13, %c0_14, %c0_15] : memref<1x16x512xf32, #tpu.memory_space<vmem>>, vector<1x8x512xf32>
    %18 = vector.shape_cast %17 : vector<1x8x512xf32> to vector<8x512xf32>
    %19 = vector.shape_cast %16 : vector<8x512xf32> to vector<1x8x512xf32>
    tpu.vector_store %arg8[%c0_13, %c0_14, %c0_15], %19 {strides = array<i32>} : memref<1x16x512xf32, #tpu.memory_space<vmem>>, vector<1x8x512xf32>,
    %20 = vector.extract_strided_slice %13 {offsets = [8, 0], sizes = [8, 512], strides = [1, 1]} : vector<16x512xf32> to vector<8x512xf32>
    %cst_16 = arith.constant 0.000000e+00 : f32
    %21 = vector.broadcast %cst_16 : f32 to vector<4x128xf32>
    %c0_17 = arith.constant 0 : index
    %c0_18 = arith.constant 0 : index
    %22 = vector.load %arg9[%c0_17, %c0_18] : memref<4x768xf32, #tpu.memory_space<vmem>>, vector<4x128xf32>
    tpu.vector_store %arg9[%c0_17, %c0_18], %21 {strides = array<i32>} : memref<4x768xf32, #tpu.memory_space<vmem>>, vector<4x128xf32>,
    %cst_19 = arith.constant 0.000000e+00 : f32
    %23 = vector.broadcast %cst_19 : f32 to vector<4x128xf32>
    %c0_20 = arith.constant 0 : index
    %c640 = arith.constant 640 : index
    %24 = vector.load %arg9[%c0_20, %c640] : memref<4x768xf32, #tpu.memory_space<vmem>>, vector<4x128xf32>
    tpu.vector_store %arg9[%c0_20, %c640], %23 {strides = array<i32>} : memref<4x768xf32, #tpu.memory_space<vmem>>, vector<4x128xf32>,
    %c0_21 = arith.constant 0 : index
    %c128 = arith.constant 128 : index
    %25 = vector.load %arg9[%c0_21, %c128] : memref<4x768xf32, #tpu.memory_space<vmem>>, vector<4x512xf32>
    tpu.vector_store %arg9[%c0_21, %c128], %8 {strides = array<i32>} : memref<4x768xf32, #tpu.memory_space<vmem>>, vector<4x512xf32>,
    %c0_22 = arith.constant 0 : index
    %c0_23 = arith.constant 0 : index
    %26 = vector.load %arg1[%c0_22, %c0_23] : memref<3x512xi32, #tpu.memory_space<vmem>>, vector<1x512xi32>
    %c1 = arith.constant 1 : index
    %c0_24 = arith.constant 0 : index
    %27 = vector.load %arg1[%c1, %c0_24] : memref<3x512xi32, #tpu.memory_space<vmem>>, vector<1x512xi32>
    %c2 = arith.constant 2 : index
    %c0_25 = arith.constant 0 : index
    %28 = vector.load %arg1[%c2, %c0_25] : memref<3x512xi32, #tpu.memory_space<vmem>>, vector<1x512xi32>
    %c1_i32 = arith.constant 1 : i32
    %29 = vector.broadcast %c1_i32 : i32 to vector<1x512xi32>
    %30 = arith.cmpi sge, %26, %29 : vector<1x512xi32>
    %c7_i32 = arith.constant 7 : i32
    %31 = vector.broadcast %c7_i32 : i32 to vector<1x512xi32>
    %32 = arith.cmpi slt, %26, %31 : vector<1x512xi32>
    %c1_i32_26 = arith.constant 1 : i32
    %33 = vector.broadcast %c1_i32_26 : i32 to vector<1x512xi32>
    %34 = arith.cmpi sge, %27, %33 : vector<1x512xi32>
    %c7_i32_27 = arith.constant 7 : i32
    %35 = vector.broadcast %c7_i32_27 : i32 to vector<1x512xi32>
    %36 = arith.cmpi slt, %27, %35 : vector<1x512xi32>
    %c1_i32_28 = arith.constant 1 : i32
    %37 = vector.broadcast %c1_i32_28 : i32 to vector<1x512xi32>
    %38 = arith.cmpi sge, %28, %37 : vector<1x512xi32>
    %c7_i32_29 = arith.constant 7 : i32
    %39 = vector.broadcast %c7_i32_29 : i32 to vector<1x512xi32>
    %40 = arith.cmpi slt, %28, %39 : vector<1x512xi32>
    %c0_30 = arith.constant 0 : index
    %c55 = arith.constant 55 : index
    %41 = vector.load %arg9[%c0_30, %c55] : memref<4x768xf32, #tpu.memory_space<vmem>>, vector<4x512xf32>
    %42 = arith.andi %30, %34 : vector<1x512xi1>
    %43 = arith.andi %42, %38 : vector<1x512xi1>
    %cst_31 = arith.constant 0.000000e+00 : f32
    %44 = vector.shape_cast %43 : vector<1x512xi1> to vector<1x512xi1>
    %45 = vector.broadcast %44 : vector<1x512xi1> to vector<4x512xi1>
    %46 = vector.broadcast %cst_31 : f32 to vector<4x512xf32>
    %47 = arith.select %45, %41, %46 : vector<4x512xi1>, vector<4x512xf32>
    %c0_32 = arith.constant 0 : index
    %c0_33 = arith.constant 0 : index
    %c0_34 = arith.constant 0 : index
    %48 = vector.load %arg7[%c0_32, %c0_33, %c0_34] : memref<27x8x4xf32, #tpu.memory_space<vmem>>, vector<1x8x4xf32>
    %49 = vector.shape_cast %48 : vector<1x8x4xf32> to vector<8x4xf32>
    %cst_35 = arith.constant dense<0.000000e+00> : vector<8x512xf32>
    %50 = tpu.matmul %49, %47, %cst_35 {dimension_numbers = #tpu.dot_dimension_numbers<[1], [0], [0], [1], [0, 0, 1, 1], [], []>} : vector<8x4xf32>, vector<4x512xf32>, vector<8x512xf32> -> vector<8x512xf32>
    %51 = arith.addf %20, %50 : vector<8x512xf32>
    %c0_36 = arith.constant 0 : index
    %c56 = arith.constant 56 : index
    %52 = vector.load %arg9[%c0_36, %c56] : memref<4x768xf32, #tpu.memory_space<vmem>>, vector<4x512xf32>
    %53 = arith.andi %30, %34 : vector<1x512xi1>
    %cst_37 = arith.constant 0.000000e+00 : f32
    %54 = vector.shape_cast %53 : vector<1x512xi1> to vector<1x512xi1>
    %55 = vector.broadcast %54 : vector<1x512xi1> to vector<4x512xi1>
    %56 = vector.broadcast %cst_37 : f32 to vector<4x512xf32>
    %57 = arith.select %55, %52, %56 : vector<4x512xi1>, vector<4x512xf32>
    %c1_38 = arith.constant 1 : index
    %c0_39 = arith.constant 0 : index
    %c0_40 = arith.constant 0 : index
    %58 = vector.load %arg7[%c1_38, %c0_39, %c0_40] : memref<27x8x4xf32, #tpu.memory_space<vmem>>, vector<1x8x4xf32>
    %59 = vector.shape_cast %58 : vector<1x8x4xf32> to vector<8x4xf32>
    %cst_41 = arith.constant dense<0.000000e+00> : vector<8x512xf32>
    %60 = tpu.matmul %59, %57, %cst_41 {dimension_numbers = #tpu.dot_dimension_numbers<[1], [0], [0], [1], [0, 0, 1, 1], [], []>} : vector<8x4xf32>, vector<4x512xf32>, vector<8x512xf32> -> vector<8x512xf32>
    %61 = arith.addf %51, %60 : vector<8x512xf32>
    %c0_42 = arith.constant 0 : index
    %c57 = arith.constant 57 : index
    %62 = vector.load %arg9[%c0_42, %c57] : memref<4x768xf32, #tpu.memory_space<vmem>>, vector<4x512xf32>
    %63 = arith.andi %30, %34 : vector<1x512xi1>
    %64 = arith.andi %63, %40 : vector<1x512xi1>
    %cst_43 = arith.constant 0.000000e+00 : f32
    %65 = vector.shape_cast %64 : vector<1x512xi1> to vector<1x512xi1>
    %66 = vector.broadcast %65 : vector<1x512xi1> to vector<4x512xi1>
    %67 = vector.broadcast %cst_43 : f32 to vector<4x512xf32>
    %68 = arith.select %66, %62, %67 : vector<4x512xi1>, vector<4x512xf32>
    %c2_44 = arith.constant 2 : index
    %c0_45 = arith.constant 0 : index
    %c0_46 = arith.constant 0 : index
    %69 = vector.load %arg7[%c2_44, %c0_45, %c0_46] : memref<27x8x4xf32, #tpu.memory_space<vmem>>, vector<1x8x4xf32>
    %70 = vector.shape_cast %69 : vector<1x8x4xf32> to vector<8x4xf32>
    %cst_47 = arith.constant dense<0.000000e+00> : vector<8x512xf32>
    %71 = tpu.matmul %70, %68, %cst_47 {dimension_numbers = #tpu.dot_dimension_numbers<[1], [0], [0], [1], [0, 0, 1, 1], [], []>} : vector<8x4xf32>, vector<4x512xf32>, vector<8x512xf32> -> vector<8x512xf32>
    %72 = arith.addf %61, %71 : vector<8x512xf32>
    %c0_48 = arith.constant 0 : index
    %c63 = arith.constant 63 : index
    %73 = vector.load %arg9[%c0_48, %c63] : memref<4x768xf32, #tpu.memory_space<vmem>>, vector<4x512xf32>
    %74 = arith.andi %30, %38 : vector<1x512xi1>
    %cst_49 = arith.constant 0.000000e+00 : f32
    %75 = vector.shape_cast %74 : vector<1x512xi1> to vector<1x512xi1>
    %76 = vector.broadcast %75 : vector<1x512xi1> to vector<4x512xi1>
    %77 = vector.broadcast %cst_49 : f32 to vector<4x512xf32>
    %78 = arith.select %76, %73, %77 : vector<4x512xi1>, vector<4x512xf32>
    %c3 = arith.constant 3 : index
    %c0_50 = arith.constant 0 : index
    %c0_51 = arith.constant 0 : index
    %79 = vector.load %arg7[%c3, %c0_50, %c0_51] : memref<27x8x4xf32, #tpu.memory_space<vmem>>, vector<1x8x4xf32>
    %80 = vector.shape_cast %79 : vector<1x8x4xf32> to vector<8x4xf32>
    %cst_52 = arith.constant dense<0.000000e+00> : vector<8x512xf32>
    %81 = tpu.matmul %80, %78, %cst_52 {dimension_numbers = #tpu.dot_dimension_numbers<[1], [0], [0], [1], [0, 0, 1, 1], [], []>} : vector<8x4xf32>, vector<4x512xf32>, vector<8x512xf32> -> vector<8x512xf32>
    %82 = arith.addf %72, %81 : vector<8x512xf32>
    %c0_53 = arith.constant 0 : index
    %c64 = arith.constant 64 : index
    %83 = vector.load %arg9[%c0_53, %c64] : memref<4x768xf32, #tpu.memory_space<vmem>>, vector<4x512xf32>
    %cst_54 = arith.constant 0.000000e+00 : f32
    %84 = vector.shape_cast %30 : vector<1x512xi1> to vector<1x512xi1>
    %85 = vector.broadcast %84 : vector<1x512xi1> to vector<4x512xi1>
    %86 = vector.broadcast %cst_54 : f32 to vector<4x512xf32>
    %87 = arith.select %85, %83, %86 : vector<4x512xi1>, vector<4x512xf32>
    %c4 = arith.constant 4 : index
    %c0_55 = arith.constant 0 : index
    %c0_56 = arith.constant 0 : index
    %88 = vector.load %arg7[%c4, %c0_55, %c0_56] : memref<27x8x4xf32, #tpu.memory_space<vmem>>, vector<1x8x4xf32>
    %89 = vector.shape_cast %88 : vector<1x8x4xf32> to vector<8x4xf32>
    %cst_57 = arith.constant dense<0.000000e+00> : vector<8x512xf32>
    %90 = tpu.matmul %89, %87, %cst_57 {dimension_numbers = #tpu.dot_dimension_numbers<[1], [0], [0], [1], [0, 0, 1, 1], [], []>} : vector<8x4xf32>, vector<4x512xf32>, vector<8x512xf32> -> vector<8x512xf32>
    %91 = arith.addf %82, %90 : vector<8x512xf32>
    %c0_58 = arith.constant 0 : index
    %c65 = arith.constant 65 : index
    %92 = vector.load %arg9[%c0_58, %c65] : memref<4x768xf32, #tpu.memory_space<vmem>>, vector<4x512xf32>
    %93 = arith.andi %30, %40 : vector<1x512xi1>
    %cst_59 = arith.constant 0.000000e+00 : f32
    %94 = vector.shape_cast %93 : vector<1x512xi1> to vector<1x512xi1>
    %95 = vector.broadcast %94 : vector<1x512xi1> to vector<4x512xi1>
    %96 = vector.broadcast %cst_59 : f32 to vector<4x512xf32>
    %97 = arith.select %95, %92, %96 : vector<4x512xi1>, vector<4x512xf32>
    %c5 = arith.constant 5 : index
    %c0_60 = arith.constant 0 : index
    %c0_61 = arith.constant 0 : index
    %98 = vector.load %arg7[%c5, %c0_60, %c0_61] : memref<27x8x4xf32, #tpu.memory_space<vmem>>, vector<1x8x4xf32>
    %99 = vector.shape_cast %98 : vector<1x8x4xf32> to vector<8x4xf32>
    %cst_62 = arith.constant dense<0.000000e+00> : vector<8x512xf32>
    %100 = tpu.matmul %99, %97, %cst_62 {dimension_numbers = #tpu.dot_dimension_numbers<[1], [0], [0], [1], [0, 0, 1, 1], [], []>} : vector<8x4xf32>, vector<4x512xf32>, vector<8x512xf32> -> vector<8x512xf32>
    %101 = arith.addf %91, %100 : vector<8x512xf32>
    %c0_63 = arith.constant 0 : index
    %c71 = arith.constant 71 : index
    %102 = vector.load %arg9[%c0_63, %c71] : memref<4x768xf32, #tpu.memory_space<vmem>>, vector<4x512xf32>
    %103 = arith.andi %30, %36 : vector<1x512xi1>
    %104 = arith.andi %103, %38 : vector<1x512xi1>
    %cst_64 = arith.constant 0.000000e+00 : f32
    %105 = vector.shape_cast %104 : vector<1x512xi1> to vector<1x512xi1>
    %106 = vector.broadcast %105 : vector<1x512xi1> to vector<4x512xi1>
    %107 = vector.broadcast %cst_64 : f32 to vector<4x512xf32>
    %108 = arith.select %106, %102, %107 : vector<4x512xi1>, vector<4x512xf32>
    %c6 = arith.constant 6 : index
    %c0_65 = arith.constant 0 : index
    %c0_66 = arith.constant 0 : index
    %109 = vector.load %arg7[%c6, %c0_65, %c0_66] : memref<27x8x4xf32, #tpu.memory_space<vmem>>, vector<1x8x4xf32>
    %110 = vector.shape_cast %109 : vector<1x8x4xf32> to vector<8x4xf32>
    %cst_67 = arith.constant dense<0.000000e+00> : vector<8x512xf32>
    %111 = tpu.matmul %110, %108, %cst_67 {dimension_numbers = #tpu.dot_dimension_numbers<[1], [0], [0], [1], [0, 0, 1, 1], [], []>} : vector<8x4xf32>, vector<4x512xf32>, vector<8x512xf32> -> vector<8x512xf32>
    %112 = arith.addf %101, %111 : vector<8x512xf32>
    %c0_68 = arith.constant 0 : index
    %c72 = arith.constant 72 : index
    %113 = vector.load %arg9[%c0_68, %c72] : memref<4x768xf32, #tpu.memory_space<vmem>>, vector<4x512xf32>
    %114 = arith.andi %30, %36 : vector<1x512xi1>
    %cst_69 = arith.constant 0.000000e+00 : f32
    %115 = vector.shape_cast %114 : vector<1x512xi1> to vector<1x512xi1>
    %116 = vector.broadcast %115 : vector<1x512xi1> to vector<4x512xi1>
    %117 = vector.broadcast %cst_69 : f32 to vector<4x512xf32>
    %118 = arith.select %116, %113, %117 : vector<4x512xi1>, vector<4x512xf32>
    %c7 = arith.constant 7 : index
    %c0_70 = arith.constant 0 : index
    %c0_71 = arith.constant 0 : index
    %119 = vector.load %arg7[%c7, %c0_70, %c0_71] : memref<27x8x4xf32, #tpu.memory_space<vmem>>, vector<1x8x4xf32>
    %120 = vector.shape_cast %119 : vector<1x8x4xf32> to vector<8x4xf32>
    %cst_72 = arith.constant dense<0.000000e+00> : vector<8x512xf32>
    %121 = tpu.matmul %120, %118, %cst_72 {dimension_numbers = #tpu.dot_dimension_numbers<[1], [0], [0], [1], [0, 0, 1, 1], [], []>} : vector<8x4xf32>, vector<4x512xf32>, vector<8x512xf32> -> vector<8x512xf32>
    %122 = arith.addf %112, %121 : vector<8x512xf32>
    %c0_73 = arith.constant 0 : index
    %c73 = arith.constant 73 : index
    %123 = vector.load %arg9[%c0_73, %c73] : memref<4x768xf32, #tpu.memory_space<vmem>>, vector<4x512xf32>
    %124 = arith.andi %30, %36 : vector<1x512xi1>
    %125 = arith.andi %124, %40 : vector<1x512xi1>
    %cst_74 = arith.constant 0.000000e+00 : f32
    %126 = vector.shape_cast %125 : vector<1x512xi1> to vector<1x512xi1>
    %127 = vector.broadcast %126 : vector<1x512xi1> to vector<4x512xi1>
    %128 = vector.broadcast %cst_74 : f32 to vector<4x512xf32>
    %129 = arith.select %127, %123, %128 : vector<4x512xi1>, vector<4x512xf32>
    %c8 = arith.constant 8 : index
    %c0_75 = arith.constant 0 : index
    %c0_76 = arith.constant 0 : index
    %130 = vector.load %arg7[%c8, %c0_75, %c0_76] : memref<27x8x4xf32, #tpu.memory_space<vmem>>, vector<1x8x4xf32>
    %131 = vector.shape_cast %130 : vector<1x8x4xf32> to vector<8x4xf32>
    %cst_77 = arith.constant dense<0.000000e+00> : vector<8x512xf32>
    %132 = tpu.matmul %131, %129, %cst_77 {dimension_numbers = #tpu.dot_dimension_numbers<[1], [0], [0], [1], [0, 0, 1, 1], [], []>} : vector<8x4xf32>, vector<4x512xf32>, vector<8x512xf32> -> vector<8x512xf32>
    %133 = arith.addf %122, %132 : vector<8x512xf32>
    %c0_78 = arith.constant 0 : index
    %c119 = arith.constant 119 : index
    %134 = vector.load %arg9[%c0_78, %c119] : memref<4x768xf32, #tpu.memory_space<vmem>>, vector<4x512xf32>
    %135 = arith.andi %34, %38 : vector<1x512xi1>
    %cst_79 = arith.constant 0.000000e+00 : f32
    %136 = vector.shape_cast %135 : vector<1x512xi1> to vector<1x512xi1>
    %137 = vector.broadcast %136 : vector<1x512xi1> to vector<4x512xi1>
    %138 = vector.broadcast %cst_79 : f32 to vector<4x512xf32>
    %139 = arith.select %137, %134, %138 : vector<4x512xi1>, vector<4x512xf32>
    %c9 = arith.constant 9 : index
    %c0_80 = arith.constant 0 : index
    %c0_81 = arith.constant 0 : index
    %140 = vector.load %arg7[%c9, %c0_80, %c0_81] : memref<27x8x4xf32, #tpu.memory_space<vmem>>, vector<1x8x4xf32>
    %141 = vector.shape_cast %140 : vector<1x8x4xf32> to vector<8x4xf32>
    %cst_82 = arith.constant dense<0.000000e+00> : vector<8x512xf32>
    %142 = tpu.matmul %141, %139, %cst_82 {dimension_numbers = #tpu.dot_dimension_numbers<[1], [0], [0], [1], [0, 0, 1, 1], [], []>} : vector<8x4xf32>, vector<4x512xf32>, vector<8x512xf32> -> vector<8x512xf32>
    %143 = arith.addf %133, %142 : vector<8x512xf32>
    %c0_83 = arith.constant 0 : index
    %c120 = arith.constant 120 : index
    %144 = vector.load %arg9[%c0_83, %c120] : memref<4x768xf32, #tpu.memory_space<vmem>>, vector<4x512xf32>
    %cst_84 = arith.constant 0.000000e+00 : f32
    %145 = vector.shape_cast %34 : vector<1x512xi1> to vector<1x512xi1>
    %146 = vector.broadcast %145 : vector<1x512xi1> to vector<4x512xi1>
    %147 = vector.broadcast %cst_84 : f32 to vector<4x512xf32>
    %148 = arith.select %146, %144, %147 : vector<4x512xi1>, vector<4x512xf32>
    %c10 = arith.constant 10 : index
    %c0_85 = arith.constant 0 : index
    %c0_86 = arith.constant 0 : index
    %149 = vector.load %arg7[%c10, %c0_85, %c0_86] : memref<27x8x4xf32, #tpu.memory_space<vmem>>, vector<1x8x4xf32>
    %150 = vector.shape_cast %149 : vector<1x8x4xf32> to vector<8x4xf32>
    %cst_87 = arith.constant dense<0.000000e+00> : vector<8x512xf32>
    %151 = tpu.matmul %150, %148, %cst_87 {dimension_numbers = #tpu.dot_dimension_numbers<[1], [0], [0], [1], [0, 0, 1, 1], [], []>} : vector<8x4xf32>, vector<4x512xf32>, vector<8x512xf32> -> vector<8x512xf32>
    %152 = arith.addf %143, %151 : vector<8x512xf32>
    %c0_88 = arith.constant 0 : index
    %c121 = arith.constant 121 : index
    %153 = vector.load %arg9[%c0_88, %c121] : memref<4x768xf32, #tpu.memory_space<vmem>>, vector<4x512xf32>
    %154 = arith.andi %34, %40 : vector<1x512xi1>
    %cst_89 = arith.constant 0.000000e+00 : f32
    %155 = vector.shape_cast %154 : vector<1x512xi1> to vector<1x512xi1>
    %156 = vector.broadcast %155 : vector<1x512xi1> to vector<4x512xi1>
    %157 = vector.broadcast %cst_89 : f32 to vector<4x512xf32>
    %158 = arith.select %156, %153, %157 : vector<4x512xi1>, vector<4x512xf32>
    %c11 = arith.constant 11 : index
    %c0_90 = arith.constant 0 : index
    %c0_91 = arith.constant 0 : index
    %159 = vector.load %arg7[%c11, %c0_90, %c0_91] : memref<27x8x4xf32, #tpu.memory_space<vmem>>, vector<1x8x4xf32>
    %160 = vector.shape_cast %159 : vector<1x8x4xf32> to vector<8x4xf32>
    %cst_92 = arith.constant dense<0.000000e+00> : vector<8x512xf32>
    %161 = tpu.matmul %160, %158, %cst_92 {dimension_numbers = #tpu.dot_dimension_numbers<[1], [0], [0], [1], [0, 0, 1, 1], [], []>} : vector<8x4xf32>, vector<4x512xf32>, vector<8x512xf32> -> vector<8x512xf32>
    %162 = arith.addf %152, %161 : vector<8x512xf32>
    %c0_93 = arith.constant 0 : index
    %c127 = arith.constant 127 : index
    %163 = vector.load %arg9[%c0_93, %c127] : memref<4x768xf32, #tpu.memory_space<vmem>>, vector<4x512xf32>
    %cst_94 = arith.constant 0.000000e+00 : f32
    %164 = vector.shape_cast %38 : vector<1x512xi1> to vector<1x512xi1>
    %165 = vector.broadcast %164 : vector<1x512xi1> to vector<4x512xi1>
    %166 = vector.broadcast %cst_94 : f32 to vector<4x512xf32>
    %167 = arith.select %165, %163, %166 : vector<4x512xi1>, vector<4x512xf32>
    %c12 = arith.constant 12 : index
    %c0_95 = arith.constant 0 : index
    %c0_96 = arith.constant 0 : index
    %168 = vector.load %arg7[%c12, %c0_95, %c0_96] : memref<27x8x4xf32, #tpu.memory_space<vmem>>, vector<1x8x4xf32>
    %169 = vector.shape_cast %168 : vector<1x8x4xf32> to vector<8x4xf32>
    %cst_97 = arith.constant dense<0.000000e+00> : vector<8x512xf32>
    %170 = tpu.matmul %169, %167, %cst_97 {dimension_numbers = #tpu.dot_dimension_numbers<[1], [0], [0], [1], [0, 0, 1, 1], [], []>} : vector<8x4xf32>, vector<4x512xf32>, vector<8x512xf32> -> vector<8x512xf32>
    %171 = arith.addf %162, %170 : vector<8x512xf32>
    %c0_98 = arith.constant 0 : index
    %c129 = arith.constant 129 : index
    %172 = vector.load %arg9[%c0_98, %c129] : memref<4x768xf32, #tpu.memory_space<vmem>>, vector<4x512xf32>
    %cst_99 = arith.constant 0.000000e+00 : f32
    %173 = vector.shape_cast %40 : vector<1x512xi1> to vector<1x512xi1>
    %174 = vector.broadcast %173 : vector<1x512xi1> to vector<4x512xi1>
    %175 = vector.broadcast %cst_99 : f32 to vector<4x512xf32>
    %176 = arith.select %174, %172, %175 : vector<4x512xi1>, vector<4x512xf32>
    %c14 = arith.constant 14 : index
    %c0_100 = arith.constant 0 : index
    %c0_101 = arith.constant 0 : index
    %177 = vector.load %arg7[%c14, %c0_100, %c0_101] : memref<27x8x4xf32, #tpu.memory_space<vmem>>, vector<1x8x4xf32>
    %178 = vector.shape_cast %177 : vector<1x8x4xf32> to vector<8x4xf32>
    %cst_102 = arith.constant dense<0.000000e+00> : vector<8x512xf32>
    %179 = tpu.matmul %178, %176, %cst_102 {dimension_numbers = #tpu.dot_dimension_numbers<[1], [0], [0], [1], [0, 0, 1, 1], [], []>} : vector<8x4xf32>, vector<4x512xf32>, vector<8x512xf32> -> vector<8x512xf32>
    %180 = arith.addf %171, %179 : vector<8x512xf32>
    %c0_103 = arith.constant 0 : index
    %c135 = arith.constant 135 : index
    %181 = vector.load %arg9[%c0_103, %c135] : memref<4x768xf32, #tpu.memory_space<vmem>>, vector<4x512xf32>
    %182 = arith.andi %36, %38 : vector<1x512xi1>
    %cst_104 = arith.constant 0.000000e+00 : f32
    %183 = vector.shape_cast %182 : vector<1x512xi1> to vector<1x512xi1>
    %184 = vector.broadcast %183 : vector<1x512xi1> to vector<4x512xi1>
    %185 = vector.broadcast %cst_104 : f32 to vector<4x512xf32>
    %186 = arith.select %184, %181, %185 : vector<4x512xi1>, vector<4x512xf32>
    %c15 = arith.constant 15 : index
    %c0_105 = arith.constant 0 : index
    %c0_106 = arith.constant 0 : index
    %187 = vector.load %arg7[%c15, %c0_105, %c0_106] : memref<27x8x4xf32, #tpu.memory_space<vmem>>, vector<1x8x4xf32>
    %188 = vector.shape_cast %187 : vector<1x8x4xf32> to vector<8x4xf32>
    %cst_107 = arith.constant dense<0.000000e+00> : vector<8x512xf32>
    %189 = tpu.matmul %188, %186, %cst_107 {dimension_numbers = #tpu.dot_dimension_numbers<[1], [0], [0], [1], [0, 0, 1, 1], [], []>} : vector<8x4xf32>, vector<4x512xf32>, vector<8x512xf32> -> vector<8x512xf32>
    %190 = arith.addf %180, %189 : vector<8x512xf32>
    %c0_108 = arith.constant 0 : index
    %c136 = arith.constant 136 : index
    %191 = vector.load %arg9[%c0_108, %c136] : memref<4x768xf32, #tpu.memory_space<vmem>>, vector<4x512xf32>
    %cst_109 = arith.constant 0.000000e+00 : f32
    %192 = vector.shape_cast %36 : vector<1x512xi1> to vector<1x512xi1>
    %193 = vector.broadcast %192 : vector<1x512xi1> to vector<4x512xi1>
    %194 = vector.broadcast %cst_109 : f32 to vector<4x512xf32>
    %195 = arith.select %193, %191, %194 : vector<4x512xi1>, vector<4x512xf32>
    %c16 = arith.constant 16 : index
    %c0_110 = arith.constant 0 : index
    %c0_111 = arith.constant 0 : index
    %196 = vector.load %arg7[%c16, %c0_110, %c0_111] : memref<27x8x4xf32, #tpu.memory_space<vmem>>, vector<1x8x4xf32>
    %197 = vector.shape_cast %196 : vector<1x8x4xf32> to vector<8x4xf32>
    %cst_112 = arith.constant dense<0.000000e+00> : vector<8x512xf32>
    %198 = tpu.matmul %197, %195, %cst_112 {dimension_numbers = #tpu.dot_dimension_numbers<[1], [0], [0], [1], [0, 0, 1, 1], [], []>} : vector<8x4xf32>, vector<4x512xf32>, vector<8x512xf32> -> vector<8x512xf32>
    %199 = arith.addf %190, %198 : vector<8x512xf32>
    %c0_113 = arith.constant 0 : index
    %c137 = arith.constant 137 : index
    %200 = vector.load %arg9[%c0_113, %c137] : memref<4x768xf32, #tpu.memory_space<vmem>>, vector<4x512xf32>
    %201 = arith.andi %36, %40 : vector<1x512xi1>
    %cst_114 = arith.constant 0.000000e+00 : f32
    %202 = vector.shape_cast %201 : vector<1x512xi1> to vector<1x512xi1>
    %203 = vector.broadcast %202 : vector<1x512xi1> to vector<4x512xi1>
    %204 = vector.broadcast %cst_114 : f32 to vector<4x512xf32>
    %205 = arith.select %203, %200, %204 : vector<4x512xi1>, vector<4x512xf32>
    %c17 = arith.constant 17 : index
    %c0_115 = arith.constant 0 : index
    %c0_116 = arith.constant 0 : index
    %206 = vector.load %arg7[%c17, %c0_115, %c0_116] : memref<27x8x4xf32, #tpu.memory_space<vmem>>, vector<1x8x4xf32>
    %207 = vector.shape_cast %206 : vector<1x8x4xf32> to vector<8x4xf32>
    %cst_117 = arith.constant dense<0.000000e+00> : vector<8x512xf32>
    %208 = tpu.matmul %207, %205, %cst_117 {dimension_numbers = #tpu.dot_dimension_numbers<[1], [0], [0], [1], [0, 0, 1, 1], [], []>} : vector<8x4xf32>, vector<4x512xf32>, vector<8x512xf32> -> vector<8x512xf32>
    %209 = arith.addf %199, %208 : vector<8x512xf32>
    %c0_118 = arith.constant 0 : index
    %c183 = arith.constant 183 : index
    %210 = vector.load %arg9[%c0_118, %c183] : memref<4x768xf32, #tpu.memory_space<vmem>>, vector<4x512xf32>
    %211 = arith.andi %32, %34 : vector<1x512xi1>
    %212 = arith.andi %211, %38 : vector<1x512xi1>
    %cst_119 = arith.constant 0.000000e+00 : f32
    %213 = vector.shape_cast %212 : vector<1x512xi1> to vector<1x512xi1>
    %214 = vector.broadcast %213 : vector<1x512xi1> to vector<4x512xi1>
    %215 = vector.broadcast %cst_119 : f32 to vector<4x512xf32>
    %216 = arith.select %214, %210, %215 : vector<4x512xi1>, vector<4x512xf32>
    %c18 = arith.constant 18 : index
    %c0_120 = arith.constant 0 : index
    %c0_121 = arith.constant 0 : index
    %217 = vector.load %arg7[%c18, %c0_120, %c0_121] : memref<27x8x4xf32, #tpu.memory_space<vmem>>, vector<1x8x4xf32>
    %218 = vector.shape_cast %217 : vector<1x8x4xf32> to vector<8x4xf32>
    %cst_122 = arith.constant dense<0.000000e+00> : vector<8x512xf32>
    %219 = tpu.matmul %218, %216, %cst_122 {dimension_numbers = #tpu.dot_dimension_numbers<[1], [0], [0], [1], [0, 0, 1, 1], [], []>} : vector<8x4xf32>, vector<4x512xf32>, vector<8x512xf32> -> vector<8x512xf32>
    %220 = arith.addf %209, %219 : vector<8x512xf32>
    %c0_123 = arith.constant 0 : index
    %c184 = arith.constant 184 : index
    %221 = vector.load %arg9[%c0_123, %c184] : memref<4x768xf32, #tpu.memory_space<vmem>>, vector<4x512xf32>
    %222 = arith.andi %32, %34 : vector<1x512xi1>
    %cst_124 = arith.constant 0.000000e+00 : f32
    %223 = vector.shape_cast %222 : vector<1x512xi1> to vector<1x512xi1>
    %224 = vector.broadcast %223 : vector<1x512xi1> to vector<4x512xi1>
    %225 = vector.broadcast %cst_124 : f32 to vector<4x512xf32>
    %226 = arith.select %224, %221, %225 : vector<4x512xi1>, vector<4x512xf32>
    %c19 = arith.constant 19 : index
    %c0_125 = arith.constant 0 : index
    %c0_126 = arith.constant 0 : index
    %227 = vector.load %arg7[%c19, %c0_125, %c0_126] : memref<27x8x4xf32, #tpu.memory_space<vmem>>, vector<1x8x4xf32>
    %228 = vector.shape_cast %227 : vector<1x8x4xf32> to vector<8x4xf32>
    %cst_127 = arith.constant dense<0.000000e+00> : vector<8x512xf32>
    %229 = tpu.matmul %228, %226, %cst_127 {dimension_numbers = #tpu.dot_dimension_numbers<[1], [0], [0], [1], [0, 0, 1, 1], [], []>} : vector<8x4xf32>, vector<4x512xf32>, vector<8x512xf32> -> vector<8x512xf32>
    %230 = arith.addf %220, %229 : vector<8x512xf32>
    %c0_128 = arith.constant 0 : index
    %c185 = arith.constant 185 : index
    %231 = vector.load %arg9[%c0_128, %c185] : memref<4x768xf32, #tpu.memory_space<vmem>>, vector<4x512xf32>
    %232 = arith.andi %32, %34 : vector<1x512xi1>
    %233 = arith.andi %232, %40 : vector<1x512xi1>
    %cst_129 = arith.constant 0.000000e+00 : f32
    %234 = vector.shape_cast %233 : vector<1x512xi1> to vector<1x512xi1>
    %235 = vector.broadcast %234 : vector<1x512xi1> to vector<4x512xi1>
    %236 = vector.broadcast %cst_129 : f32 to vector<4x512xf32>
    %237 = arith.select %235, %231, %236 : vector<4x512xi1>, vector<4x512xf32>
    %c20 = arith.constant 20 : index
    %c0_130 = arith.constant 0 : index
    %c0_131 = arith.constant 0 : index
    %238 = vector.load %arg7[%c20, %c0_130, %c0_131] : memref<27x8x4xf32, #tpu.memory_space<vmem>>, vector<1x8x4xf32>
    %239 = vector.shape_cast %238 : vector<1x8x4xf32> to vector<8x4xf32>
    %cst_132 = arith.constant dense<0.000000e+00> : vector<8x512xf32>
    %240 = tpu.matmul %239, %237, %cst_132 {dimension_numbers = #tpu.dot_dimension_numbers<[1], [0], [0], [1], [0, 0, 1, 1], [], []>} : vector<8x4xf32>, vector<4x512xf32>, vector<8x512xf32> -> vector<8x512xf32>
    %241 = arith.addf %230, %240 : vector<8x512xf32>
    %c0_133 = arith.constant 0 : index
    %c191 = arith.constant 191 : index
    %242 = vector.load %arg9[%c0_133, %c191] : memref<4x768xf32, #tpu.memory_space<vmem>>, vector<4x512xf32>
    %243 = arith.andi %32, %38 : vector<1x512xi1>
    %cst_134 = arith.constant 0.000000e+00 : f32
    %244 = vector.shape_cast %243 : vector<1x512xi1> to vector<1x512xi1>
    %245 = vector.broadcast %244 : vector<1x512xi1> to vector<4x512xi1>
    %246 = vector.broadcast %cst_134 : f32 to vector<4x512xf32>
    %247 = arith.select %245, %242, %246 : vector<4x512xi1>, vector<4x512xf32>
    %c21 = arith.constant 21 : index
    %c0_135 = arith.constant 0 : index
    %c0_136 = arith.constant 0 : index
    %248 = vector.load %arg7[%c21, %c0_135, %c0_136] : memref<27x8x4xf32, #tpu.memory_space<vmem>>, vector<1x8x4xf32>
    %249 = vector.shape_cast %248 : vector<1x8x4xf32> to vector<8x4xf32>
    %cst_137 = arith.constant dense<0.000000e+00> : vector<8x512xf32>
    %250 = tpu.matmul %249, %247, %cst_137 {dimension_numbers = #tpu.dot_dimension_numbers<[1], [0], [0], [1], [0, 0, 1, 1], [], []>} : vector<8x4xf32>, vector<4x512xf32>, vector<8x512xf32> -> vector<8x512xf32>
    %251 = arith.addf %241, %250 : vector<8x512xf32>
    %c0_138 = arith.constant 0 : index
    %c192 = arith.constant 192 : index
    %252 = vector.load %arg9[%c0_138, %c192] : memref<4x768xf32, #tpu.memory_space<vmem>>, vector<4x512xf32>
    %cst_139 = arith.constant 0.000000e+00 : f32
    %253 = vector.shape_cast %32 : vector<1x512xi1> to vector<1x512xi1>
    %254 = vector.broadcast %253 : vector<1x512xi1> to vector<4x512xi1>
    %255 = vector.broadcast %cst_139 : f32 to vector<4x512xf32>
    %256 = arith.select %254, %252, %255 : vector<4x512xi1>, vector<4x512xf32>
    %c22 = arith.constant 22 : index
    %c0_140 = arith.constant 0 : index
    %c0_141 = arith.constant 0 : index
    %257 = vector.load %arg7[%c22, %c0_140, %c0_141] : memref<27x8x4xf32, #tpu.memory_space<vmem>>, vector<1x8x4xf32>
    %258 = vector.shape_cast %257 : vector<1x8x4xf32> to vector<8x4xf32>
    %cst_142 = arith.constant dense<0.000000e+00> : vector<8x512xf32>
    %259 = tpu.matmul %258, %256, %cst_142 {dimension_numbers = #tpu.dot_dimension_numbers<[1], [0], [0], [1], [0, 0, 1, 1], [], []>} : vector<8x4xf32>, vector<4x512xf32>, vector<8x512xf32> -> vector<8x512xf32>
    %260 = arith.addf %251, %259 : vector<8x512xf32>
    %c0_143 = arith.constant 0 : index
    %c193 = arith.constant 193 : index
    %261 = vector.load %arg9[%c0_143, %c193] : memref<4x768xf32, #tpu.memory_space<vmem>>, vector<4x512xf32>
    %262 = arith.andi %32, %40 : vector<1x512xi1>
    %cst_144 = arith.constant 0.000000e+00 : f32
    %263 = vector.shape_cast %262 : vector<1x512xi1> to vector<1x512xi1>
    %264 = vector.broadcast %263 : vector<1x512xi1> to vector<4x512xi1>
    %265 = vector.broadcast %cst_144 : f32 to vector<4x512xf32>
    %266 = arith.select %264, %261, %265 : vector<4x512xi1>, vector<4x512xf32>
    %c23 = arith.constant 23 : index
    %c0_145 = arith.constant 0 : index
    %c0_146 = arith.constant 0 : index
    %267 = vector.load %arg7[%c23, %c0_145, %c0_146] : memref<27x8x4xf32, #tpu.memory_space<vmem>>, vector<1x8x4xf32>
    %268 = vector.shape_cast %267 : vector<1x8x4xf32> to vector<8x4xf32>
    %cst_147 = arith.constant dense<0.000000e+00> : vector<8x512xf32>
    %269 = tpu.matmul %268, %266, %cst_147 {dimension_numbers = #tpu.dot_dimension_numbers<[1], [0], [0], [1], [0, 0, 1, 1], [], []>} : vector<8x4xf32>, vector<4x512xf32>, vector<8x512xf32> -> vector<8x512xf32>
    %270 = arith.addf %260, %269 : vector<8x512xf32>
    %c0_148 = arith.constant 0 : index
    %c199 = arith.constant 199 : index
    %271 = vector.load %arg9[%c0_148, %c199] : memref<4x768xf32, #tpu.memory_space<vmem>>, vector<4x512xf32>
    %272 = arith.andi %32, %36 : vector<1x512xi1>
    %273 = arith.andi %272, %38 : vector<1x512xi1>
    %cst_149 = arith.constant 0.000000e+00 : f32
    %274 = vector.shape_cast %273 : vector<1x512xi1> to vector<1x512xi1>
    %275 = vector.broadcast %274 : vector<1x512xi1> to vector<4x512xi1>
    %276 = vector.broadcast %cst_149 : f32 to vector<4x512xf32>
    %277 = arith.select %275, %271, %276 : vector<4x512xi1>, vector<4x512xf32>
    %c24 = arith.constant 24 : index
    %c0_150 = arith.constant 0 : index
    %c0_151 = arith.constant 0 : index
    %278 = vector.load %arg7[%c24, %c0_150, %c0_151] : memref<27x8x4xf32, #tpu.memory_space<vmem>>, vector<1x8x4xf32>
    %279 = vector.shape_cast %278 : vector<1x8x4xf32> to vector<8x4xf32>
    %cst_152 = arith.constant dense<0.000000e+00> : vector<8x512xf32>
    %280 = tpu.matmul %279, %277, %cst_152 {dimension_numbers = #tpu.dot_dimension_numbers<[1], [0], [0], [1], [0, 0, 1, 1], [], []>} : vector<8x4xf32>, vector<4x512xf32>, vector<8x512xf32> -> vector<8x512xf32>
    %281 = arith.addf %270, %280 : vector<8x512xf32>
    %c0_153 = arith.constant 0 : index
    %c200 = arith.constant 200 : index
    %282 = vector.load %arg9[%c0_153, %c200] : memref<4x768xf32, #tpu.memory_space<vmem>>, vector<4x512xf32>
    %283 = arith.andi %32, %36 : vector<1x512xi1>
    %cst_154 = arith.constant 0.000000e+00 : f32
    %284 = vector.shape_cast %283 : vector<1x512xi1> to vector<1x512xi1>
    %285 = vector.broadcast %284 : vector<1x512xi1> to vector<4x512xi1>
    %286 = vector.broadcast %cst_154 : f32 to vector<4x512xf32>
    %287 = arith.select %285, %282, %286 : vector<4x512xi1>, vector<4x512xf32>
    %c25 = arith.constant 25 : index
    %c0_155 = arith.constant 0 : index
    %c0_156 = arith.constant 0 : index
    %288 = vector.load %arg7[%c25, %c0_155, %c0_156] : memref<27x8x4xf32, #tpu.memory_space<vmem>>, vector<1x8x4xf32>
    %289 = vector.shape_cast %288 : vector<1x8x4xf32> to vector<8x4xf32>
    %cst_157 = arith.constant dense<0.000000e+00> : vector<8x512xf32>
    %290 = tpu.matmul %289, %287, %cst_157 {dimension_numbers = #tpu.dot_dimension_numbers<[1], [0], [0], [1], [0, 0, 1, 1], [], []>} : vector<8x4xf32>, vector<4x512xf32>, vector<8x512xf32> -> vector<8x512xf32>
    %291 = arith.addf %281, %290 : vector<8x512xf32>
    %c0_158 = arith.constant 0 : index
    %c201 = arith.constant 201 : index
    %292 = vector.load %arg9[%c0_158, %c201] : memref<4x768xf32, #tpu.memory_space<vmem>>, vector<4x512xf32>
    %293 = arith.andi %32, %36 : vector<1x512xi1>
    %294 = arith.andi %293, %40 : vector<1x512xi1>
    %cst_159 = arith.constant 0.000000e+00 : f32
    %295 = vector.shape_cast %294 : vector<1x512xi1> to vector<1x512xi1>
    %296 = vector.broadcast %295 : vector<1x512xi1> to vector<4x512xi1>
    %297 = vector.broadcast %cst_159 : f32 to vector<4x512xf32>
    %298 = arith.select %296, %292, %297 : vector<4x512xi1>, vector<4x512xf32>
    %c26 = arith.constant 26 : index
    %c0_160 = arith.constant 0 : index
    %c0_161 = arith.constant 0 : index
    %299 = vector.load %arg7[%c26, %c0_160, %c0_161] : memref<27x8x4xf32, #tpu.memory_space<vmem>>, vector<1x8x4xf32>
    %300 = vector.shape_cast %299 : vector<1x8x4xf32> to vector<8x4xf32>
    %cst_162 = arith.constant dense<0.000000e+00> : vector<8x512xf32>
    %301 = tpu.matmul %300, %298, %cst_162 {dimension_numbers = #tpu.dot_dimension_numbers<[1], [0], [0], [1], [0, 0, 1, 1], [], []>} : vector<8x4xf32>, vector<4x512xf32>, vector<8x512xf32> -> vector<8x512xf32>
    %302 = arith.addf %291, %301 : vector<8x512xf32>
    %cst_163 = arith.constant 0.000000e+00 : f32
    %303 = vector.broadcast %cst_163 : f32 to vector<8x512xf32>
    %304 = arith.maximumf %302, %303 : vector<8x512xf32>
    %c0_164 = arith.constant 0 : index
    %c8_165 = arith.constant 8 : index
    %c0_166 = arith.constant 0 : index
    %305 = vector.load %arg8[%c0_164, %c8_165, %c0_166] : memref<1x16x512xf32, #tpu.memory_space<vmem>>, vector<1x8x512xf32>
    %306 = vector.shape_cast %305 : vector<1x8x512xf32> to vector<8x512xf32>
    %307 = vector.shape_cast %304 : vector<8x512xf32> to vector<1x8x512xf32>
    tpu.vector_store %arg8[%c0_164, %c8_165, %c0_166], %307 {strides = array<i32>} : memref<1x16x512xf32, #tpu.memory_space<vmem>>, vector<1x8x512xf32>,
    return
  }
  func.func @transform_0(%arg0: i32) -> (i32, i32) {
    %c0_i32 = arith.constant 0 : i32
    %c0_i32_0 = arith.constant 0 : i32
    %c0_i32_1 = arith.constant 0 : i32
    return %c0_i32, %c0_i32_0 : i32, i32
  }
  func.func @transform_1(%arg0: i32) -> (i32, i32, i32) {
    %c0_i32 = arith.constant 0 : i32
    %c0_i32_0 = arith.constant 0 : i32
    %c0_i32_1 = arith.constant 0 : i32
    return %arg0, %c0_i32, %c0_i32_0 : i32, i32, i32
  }
  func.func @transform_2(%arg0: i32) -> (i32, i32) {
    %c0_i32 = arith.constant 0 : i32
    %c0_i32_0 = arith.constant 0 : i32
    %c0_i32_1 = arith.constant 0 : i32
    return %c0_i32, %c0_i32_0 : i32, i32
  }
  func.func @transform_3(%arg0: i32) -> (i32, i32) {
    %c0_i32 = arith.constant 0 : i32
    %c0_i32_0 = arith.constant 0 : i32
    %c0_i32_1 = arith.constant 0 : i32
    return %c0_i32, %c0_i32_0 : i32, i32
  }
  func.func @transform_4(%arg0: i32) -> (i32, i32) {
    %c0_i32 = arith.constant 0 : i32
    %c0_i32_0 = arith.constant 0 : i32
    %c0_i32_1 = arith.constant 0 : i32
    return %c0_i32, %c0_i32_0 : i32, i32
  }
  func.func @transform_5(%arg0: i32) -> (i32, i32) {
    %c0_i32 = arith.constant 0 : i32
    %c0_i32_0 = arith.constant 0 : i32
    %c0_i32_1 = arith.constant 0 : i32
    return %c0_i32, %c0_i32_0 : i32, i32
  }
  func.func @transform_6(%arg0: i32) -> (i32, i32, i32) {
    %c0_i32 = arith.constant 0 : i32
    %c0_i32_0 = arith.constant 0 : i32
    %c0_i32_1 = arith.constant 0 : i32
    %c0_i32_2 = arith.constant 0 : i32
    return %c0_i32, %c0_i32_0, %c0_i32_1 : i32, i32, i32
  }
  func.func @transform_7(%arg0: i32) -> (i32, i32, i32) {
    %c0_i32 = arith.constant 0 : i32
    %c0_i32_0 = arith.constant 0 : i32
    %c0_i32_1 = arith.constant 0 : i32
    return %arg0, %c0_i32, %c0_i32_0 : i32, i32, i32
  }
}

</mosaic_0001>

<bundles_post_ra>
// kernel: fire_forward.1
= control target key start
LH: loop header
LB: loop body
LE: loop exit
PB: predicated region body
PF: predicated region fallthrough
CT: control target
= control target key end

     0   :  { %s6639_s24 = smov 0   ;;  %s8783_s0 = inlined_call_operand.vmem [shape: s32[3,512], index: 0, kind: input, shape index: {}]   ;;  %s8784_s1 = inlined_call_operand.vmem [shape: f32[2,4,512], index: 1, kind: input, shape index: {}]   ;;  %s8785_s2 = inlined_call_operand.vmem [shape: f32[4,4], index: 2, kind: input, shape index: {}]   ;;  %s8786_s3 = inlined_call_operand.vmem [shape: f32[4,1], index: 3, kind: input, shape index: {}]   ;;  %s8787_s4 = inlined_call_operand.vmem [shape: f32[16,4], index: 4, kind: input, shape index: {}]   ;;  %s8788_s5 = inlined_call_operand.vmem [shape: f32[16,1], index: 5, kind: input, shape index: {}]   ;;  %s8789_s6 = inlined_call_operand.vmem [shape: f32[27,8,4], index: 6, kind: input, shape index: {}]   ;;  %s8790_s7 = inlined_call_operand.vmem [shape: f32[2,16,512], index: 7, kind: output, shape index: {}]  }
   0x1 LB: > { %s6327_s25 = sadd.s32 4294967295, %s6578_s24   ;;  %p6331_p0 = scmp.ge.s32.totalorder %s6578_s24, 1  ;;  %s6578_s24 = sphi %s6639_s24, %s17_s24  }
   0x2   : > { %p237_p1 = scmp.lt.s32.totalorder %s6578_s24, 3 }
   0x4   : > { %p238_p2 = pnand %p6331_p0, %p237_p1 }
   0x6   : > { %241 = sbr.rel (%p238_p2) target bundleno = 848 (0x350), region = 48 }
   0xb   : > { %p269_p3 = scmp.lt.s32.totalorder %s6327_s25, 1  ;;  %v8791_v0 = vmov 0.0   ;;  %v282_v1 = vld [vmem:[%s8786_s3] sm:$0xf]  ;;  %v8793_v2 = vmov 0   ;;  %vm8816_vm0 = vcmask 1043456  }
   0xc   : > { %369 = vmatprep.mubr.f32.mxu0 %v8791_v0  ;;  %645 = vst [vmem:[#allocation2] sm:$0xf] %v8791_v0  ;;  %646 = vst [vmem:[#allocation2 + $0x14] sm:$0xf] %v8791_v0  ;;  %440 = vmatprep.mubr.f32.mxu1 %v8791_v0  ;;  %v279_v7 = vld [vmem:[%s8785_s2] sm:$0xf] }
   0xd   : > { %s9388_s25 = smov (!%p269_p3, %s6327_s25), 1  ;;  %6564 = vset.pattern.permute.xlu0 %v8793_v2  ;;  %6565 = vset.pattern.permute.xlu1 %v8793_v2  ;;  %vm8809_vm1 = vcmask 31744   ;;  %s6582_s11 = smov 127   ;;  %v451_v41 = vld [vmem:[%s8787_s4] sm:$0xff]  ;;  %v452_v53 = vld [vmem:[%s8787_s4 + $0x8] sm:$0xff]  ;;  %vm8812_vm10 = vcmask 596992  }
   0xe   : > { %285 = vperm.xlu0 %6564, %v282_v1   ;;  %s6535_s28 = sshll.u32 %s9388_s25, 4  ;;  %s6583_s12 = smov 120  }
   0xf   : > { %s273_s8 = scalar_lea.vmem %s8784_s1, %s6535_s28  ;;  %s6584_s13 = smov 121  }
  0x10   : > { %v280_v3 = vld [vmem:[%s273_s8] sm:$0xff]  ;;  %v281_v4 = vld [vmem:[%s273_s8 + $0x8] sm:$0xff]  ;;  %s6585_s14 = smov 73   ;;  %s6586_s15 = smov 119  }
  0x11   : > { %v290_v5 = vcombine.high %v280_v3, %v280_v3  ;;  %v291_v6 = vcombine.high %v281_v4, %v281_v4  ;;  %s6587_s16 = smov 71   ;;  %s6588_s17 = smov 72  }
  0x12   : > { %s6589_s18 = smov 64   ;;  %s6590_s19 = smov 65  }
  0x13   : > { %6336 = vmatprep.subr.msk.mxu0 %vm8816_vm0, %v290_v5  ;;  %6339 = vmatprep.subr.msk.mxu1 %vm8816_vm0, %v291_v6  ;;  %v3470_v8 = vld [vmem:[#allocation2 + $0x14] sm:$0xf]  ;;  %s6591_s20 = smov 63   ;;  %s6592_s21 = smov 57  }
  0x14   : > { %6337 = vmatpush1.msk.msra.mxu0 %vm8816_vm0, %v280_v3  ;;  %6340 = vmatpush1.msk.msra.mxu1 %vm8816_vm0, %v281_v4  ;;  %v3901_v9 = vld [vmem:[#allocation2 + $0x14] sm:$0xf]  ;;  %s6593_s22 = smov 56   ;;  %s6594_s23 = smov 55  }
  0x15   : > { %6338 = vmatmul.mubr.msk.f32.vlgmr.msra.gmra.mxu0 %vm8809_vm1, %v279_v7  ;;  %6341 = vmatmul.mubr.msk.f32.vlgmr.msra.gmra.mxu1 %vm8809_vm1, %v279_v7  ;;  %v3685_v10 = vld [vmem:[#allocation2 + $0x14] sm:$0xf]  ;;  %s6595_s28 = smov 9   ;;  %s6596_s29 = smov 8  }
  0x16   : > { %3505 = vrot.lane.b32.xlu1 %v3470_v8, %s6582_s11  ;;  %547 = vmatprep.mubr.f32.mxu0 %v8791_v0  ;;  %v4332_v11 = vld [vmem:[#allocation2 + $0x14] sm:$0xf]  ;;  %s6597_s30 = smov 7   ;;  %s6598_s8 = smov 1  }
  0x17   : > { %624 = vmatprep.mubr.f32.mxu1 %v8791_v0  ;;  %3721 = vrot.lane.b32.xlu0 %v3685_v10, %s6584_s13  ;;  %v4116_v12 = vld [vmem:[#allocation2 + $0x14] sm:$0xf]  ;;  %s6536_s10 = sshll.u32 %s9388_s25, 6 }
  0x18   : > { %v4762_v13 = vld [vmem:[#allocation2 + $0x14] sm:$0xf] }
  0x19   : > { %v4548_v14 = vld [vmem:[#allocation2 + $0x14] sm:$0xf] }
  0x1a   : > { %3936 = vrot.lane.b32.xlu1 %v3901_v9, %s6583_s12  ;;  %v5192_v15 = vld [vmem:[#allocation2 + $0x14] sm:$0xf] }
  0x1b   : > { %4152 = vrot.lane.b32.xlu0 %v4116_v12, %s6586_s15  ;;  %v4977_v16 = vld [vmem:[#allocation2 + $0x14] sm:$0xf] }
  0x1e   : > { %4369 = vrot.lane.b32.xlu1 %v4332_v11, %s6585_s14 }
  0x1f   : > { %4583 = vrot.lane.b32.xlu0 %v4548_v14, %s6588_s17 }
  0x22   : > { %4798 = vrot.lane.b32.xlu1 %v4762_v13, %s6587_s16 }
  0x23   : > { %5013 = vrot.lane.b32.xlu0 %v4977_v16, %s6590_s19 }
  0x26   : > { %5227 = vrot.lane.b32.xlu1 %v5192_v15, %s6589_s18 }
  0x88   : > { %v6786_v48 = vpop.permute.xlu1 %3505 }
  0x89   : > { %v286_v17 = vpop.permute.xlu0 %285  ;;  %8818 = vst [vmem:[#allocation3_spill] sm:$0xff] %v6786_v48 }
  0x8c   : > { %v6792_v49 = vpop.permute.xlu1 %3936 }
  0x8d   : > { %8819 = vst [vmem:[#allocation4_spill] sm:$0xff] %v6792_v49  ;;  %v6794_v50 = vpop.permute.xlu0 %3721 }
  0x8e   : > { %8820 = vst [vmem:[#allocation5_spill] sm:$0xff] %v6794_v50 }
  0x90   : > { %v6804_v51 = vpop.permute.xlu1 %4369 }
  0x91   : > { %8821 = vst [vmem:[#allocation6_spill] sm:$0xff] %v6804_v51  ;;  %v6806_v52 = vpop.permute.xlu0 %4152 }
  0x92   : > { %8822 = vst [vmem:[#allocation7_spill] sm:$0xff] %v6806_v52 }
  0x94   : > { %v6817_v54 = vpop.permute.xlu1 %4798 }
  0x95   : > { %8823 = vst [vmem:[#allocation8_spill] sm:$0xff] %v6817_v54  ;;  %v6819_v55 = vpop.permute.xlu0 %4583 }
  0x96   : > { %8824 = vst [vmem:[#allocation9_spill] sm:$0xff] %v6819_v55 }
  0x98   : > { %v6831_v56 = vpop.permute.xlu1 %5227 }
  0x99   : > { %8825 = vst [vmem:[#allocation10_spill] sm:$0xff] %v6831_v56  ;;  %v6833_v57 = vpop.permute.xlu0 %5013  ;;  %v7026_v56 = vld [vmem:[%s8783_s0 + $0x2] ss:$4 sm:$0xf] }
  0x9a   : > { %8826 = vst [vmem:[#allocation11_spill] sm:$0xff] %v6833_v57  ;;  %v670_v57 = vlaneseq  ;;  %vm8808_vm4 = vcmp.ge.s32.totalorder %v7026_v56, 1  ;;  %vm8810_vm7 = vcmp.lt.s32.totalorder %v7026_v56, 7 }
  0xd5   : > { %v371_v18 = vpop.f32.mrf.mxu0  ;;  %v442_v19 = vpop.f32.mrf.mxu1 }
  0xd6   : > { %v372_v20 = vadd.f32 %v371_v18, %v286_v17  ;;  %v443_v21 = vadd.f32 %v442_v19, %v286_v17 }
  0xd7   : > { %v373_v22 = vpop.f32.mrf.mxu0  ;;  %v444_v23 = vpop.f32.mrf.mxu1 }
  0xd8   : > { %v447_v24 = vmax.f32 %v372_v20, 0.0  ;;  %v374_v25 = vadd.f32 %v373_v22, %v286_v17  ;;  %v445_v26 = vadd.f32 %v444_v23, %v286_v17  ;;  %v449_v27 = vmax.f32 %v443_v21, 0.0 }
  0xda   : > { %v6682_v28 = vmax.f32 %v374_v25, 0.0  ;;  %v6684_v29 = vmax.f32 %v445_v26, 0.0 }
  0xdc   : > { %v6687_v30 = vcombine.low %v447_v24, %v6682_v28  ;;  %v6690_v31 = vcombine.low %v449_v27, %v6684_v29  ;;  %6342 = vmatprep.subr.msk.mxu0 %vm8816_vm0, %v6682_v28  ;;  %6346 = vmatprep.subr.msk.mxu1 %vm8816_vm0, %v6684_v29  ;;  %v6916_v22 = vcombine.low %v6682_v28, %v6682_v28 }
  0xdd   : > { %6343 = vmatpush1.msk.msra.mxu0 %vm8816_vm0, %v447_v24  ;;  %6347 = vmatpush1.msk.msra.mxu1 %vm8816_vm0, %v449_v27  ;;  %v6927_v25 = vcombine.low %v6684_v29, %v6684_v29 }
  0xde   : > { %651 = vst [vmem:[#allocation2 + $0x4] sm:$0xff] %v6687_v30  ;;  %652 = vst [vmem:[#allocation2 + $0xc] sm:$0xff] %v6690_v31  ;;  %6344 = vmatmul.mubr.msk.f32.vlgmr.msra.gmra.mxu0 %vm8809_vm1, %v451_v41  ;;  %6348 = vmatmul.mubr.msk.f32.vlgmr.msra.gmra.mxu1 %vm8809_vm1, %v451_v41 }
  0xdf   : > { %553 = vmatprep.mubr.f32.mxu0 %v8791_v0  ;;  %630 = vmatprep.mubr.f32.mxu1 %v8791_v0 }
  0xe2   : > { %6345 = vmatmul.mubr.msk.f32.gmra.mxu0 %vm8809_vm1, %v452_v53  ;;  %6349 = vmatmul.mubr.msk.f32.gmra.mxu1 %vm8809_vm1, %v452_v53  ;;  %v7008_v53 = vld [vmem:[%s8783_s0] ss:$4 sm:$0xf] }
  0xe3   : > { %798 = vmatprep.mubr.f32.mxu0 %v8791_v0  ;;  %869 = vmatprep.mubr.f32.mxu1 %v8791_v0  ;;  %8846 = vst [vmem:[#allocation31_spill] sm:$0xff] %v7008_v53  ;;  %vm658_vm2 = vcmp.ge.s32.totalorder %v7008_v53, 1 }
  0xe4   : > { %vm1314_vm9 = vmand %vm658_vm2, %vm8808_vm4 }
  0xe5   : > { %v666_v32 = vld [vmem:[#allocation2 + $0x10] sm:$0xf]  ;;  %v6700_v33 = vld [vmem:[#allocation2 + $0x8] sm:$0xff]  ;;  %v6705_v34 = vld [vmem:[#allocation2] sm:$0xff] }
  0xe6   : > { %703 = vrot.lane.b32.xlu0 %v666_v32, %s6585_s14  ;;  %699 = vrot.lane.b32.xlu1 %v6700_v33, %s6585_s14  ;;  %v1097_v35 = vld [vmem:[#allocation2 + $0x10] sm:$0xf]  ;;  %v907_v58 = vcombine.high %v6705_v34, %v6705_v34  ;;  %v694_v59 = vcombine.high %v6700_v33, %v6700_v33 }
  0xe7   : > { %v882_v36 = vld [vmem:[#allocation2 + $0x10] sm:$0xf] }
  0xe8   : > { %v1529_v37 = vld [vmem:[#allocation2 + $0x10] sm:$0xf] }
  0xe9   : > { %v1313_v38 = vld [vmem:[#allocation2 + $0x10] sm:$0xf] }
  0xea   : > { %909 = vrot.lane.b32.xlu0 %v6705_v34, %s6588_s17  ;;  %695 = vrot.lane.b32.xlu1 %v6705_v34, %s6585_s14  ;;  %v1960_v39 = vld [vmem:[#allocation2 + $0x10] sm:$0xf] }
  0xeb   : > { %v1744_v40 = vld [vmem:[#allocation2 + $0x10] sm:$0xf] }
  0xec   : > { %v2392_v42 = vld [vmem:[#allocation2 + $0x10] sm:$0xf] }
  0xed   : > { %v2177_v43 = vld [vmem:[#allocation2 + $0x10] sm:$0xf] }
  0xee   : > { %1129 = vrot.lane.b32.xlu0 %v6700_v33, %s6587_s16  ;;  %913 = vrot.lane.b32.xlu1 %v6700_v33, %s6588_s17  ;;  %v2824_v44 = vld [vmem:[#allocation2 + $0x10] sm:$0xf] }
  0xef   : > { %v2608_v45 = vld [vmem:[#allocation2 + $0x10] sm:$0xf] }
  0xf0   : > { %v3255_v46 = vld [vmem:[#allocation2 + $0x10] sm:$0xf] }
  0xf1   : > { %v3039_v47 = vld [vmem:[#allocation2 + $0x10] sm:$0xf] }
  0xf2   : > { %1133 = vrot.lane.b32.xlu0 %v1097_v35, %s6587_s16  ;;  %917 = vrot.lane.b32.xlu1 %v882_v36, %s6588_s17 }
  0xf6   : > { %1341 = vrot.lane.b32.xlu0 %v6705_v34, %s6590_s19  ;;  %1125 = vrot.lane.b32.xlu1 %v6705_v34, %s6587_s16 }
  0xfa   : > { %1560 = vrot.lane.b32.xlu0 %v6700_v33, %s6589_s18  ;;  %1345 = vrot.lane.b32.xlu1 %v6700_v33, %s6590_s19 }
  0xfe   : > { %1564 = vrot.lane.b32.xlu0 %v1529_v37, %s6589_s18  ;;  %1349 = vrot.lane.b32.xlu1 %v1313_v38, %s6590_s19 }
 0x102   : > { %1772 = vrot.lane.b32.xlu0 %v6705_v34, %s6591_s20  ;;  %1556 = vrot.lane.b32.xlu1 %v6705_v34, %s6589_s18 }
 0x106   : > { %1993 = vrot.lane.b32.xlu0 %v6700_v33, %s6592_s21  ;;  %1776 = vrot.lane.b32.xlu1 %v6700_v33, %s6591_s20 }
 0x10a   : > { %1997 = vrot.lane.b32.xlu0 %v1960_v39, %s6592_s21  ;;  %1780 = vrot.lane.b32.xlu1 %v1744_v40, %s6591_s20 }
 0x10e   : > { %2204 = vrot.lane.b32.xlu0 %v6705_v34, %s6593_s22  ;;  %1989 = vrot.lane.b32.xlu1 %v6705_v34, %s6592_s21 }
 0x112   : > { %2424 = vrot.lane.b32.xlu0 %v6700_v33, %s6594_s23  ;;  %2208 = vrot.lane.b32.xlu1 %v6700_v33, %s6593_s22 }
 0x116   : > { %2428 = vrot.lane.b32.xlu0 %v2392_v42, %s6594_s23  ;;  %2212 = vrot.lane.b32.xlu1 %v2177_v43, %s6593_s22 }
 0x11a   : > { %2636 = vrot.lane.b32.xlu0 %v6705_v34, %s6595_s28  ;;  %2420 = vrot.lane.b32.xlu1 %v6705_v34, %s6594_s23 }
 0x11e   : > { %2855 = vrot.lane.b32.xlu0 %v6700_v33, %s6596_s29  ;;  %2640 = vrot.lane.b32.xlu1 %v6700_v33, %s6595_s28 }
 0x122   : > { %2859 = vrot.lane.b32.xlu0 %v2824_v44, %s6596_s29  ;;  %2644 = vrot.lane.b32.xlu1 %v2608_v45, %s6595_s28 }
 0x126   : > { %3067 = vrot.lane.b32.xlu0 %v6705_v34, %s6597_s30  ;;  %2851 = vrot.lane.b32.xlu1 %v6705_v34, %s6596_s29 }
 0x12a   : > { %3286 = vrot.lane.b32.xlu0 %v6700_v33, %s6598_s8  ;;  %3071 = vrot.lane.b32.xlu1 %v6700_v33, %s6597_s30 }
 0x12e   : > { %3290 = vrot.lane.b32.xlu0 %v3255_v46, %s6598_s8  ;;  %3075 = vrot.lane.b32.xlu1 %v3039_v47, %s6597_s30 }
 0x132   : > { %3497 = vrot.lane.b32.xlu0 %v6687_v30, %s6582_s11  ;;  %3282 = vrot.lane.b32.xlu1 %v6705_v34, %s6598_s8 }
 0x136   : > { %3717 = vrot.lane.b32.xlu0 %v6690_v31, %s6584_s13  ;;  %3501 = vrot.lane.b32.xlu1 %v6690_v31, %s6582_s11 }
 0x13a   : > { %3928 = vrot.lane.b32.xlu0 %v6687_v30, %s6583_s12  ;;  %3713 = vrot.lane.b32.xlu1 %v6687_v30, %s6584_s13 }
 0x13e   : > { %4148 = vrot.lane.b32.xlu0 %v6690_v31, %s6586_s15  ;;  %3932 = vrot.lane.b32.xlu1 %v6690_v31, %s6583_s12 }
 0x142   : > { %4361 = vrot.lane.b32.xlu0 %v6687_v30, %s6585_s14  ;;  %4144 = vrot.lane.b32.xlu1 %v6687_v30, %s6586_s15 }
 0x146   : > { %4579 = vrot.lane.b32.xlu0 %v6690_v31, %s6588_s17  ;;  %4365 = vrot.lane.b32.xlu1 %v6690_v31, %s6585_s14 }
 0x14a   : > { %4790 = vrot.lane.b32.xlu0 %v6687_v30, %s6587_s16  ;;  %4575 = vrot.lane.b32.xlu1 %v6687_v30, %s6588_s17 }
 0x14e   : > { %5009 = vrot.lane.b32.xlu0 %v6690_v31, %s6590_s19  ;;  %4794 = vrot.lane.b32.xlu1 %v6690_v31, %s6587_s16 }
 0x152   : > { %5219 = vrot.lane.b32.xlu0 %v6687_v30, %s6589_s18  ;;  %5005 = vrot.lane.b32.xlu1 %v6687_v30, %s6590_s19 }
 0x156   : > { %5223 = vrot.lane.b32.xlu1 %v6690_v31, %s6589_s18  ;;  %697 = vrot.lane.b32.xlu0 %v907_v58, %s6585_s14 }
 0x158   : > { %v6842_v60 = vpop.permute.xlu0 %703  ;;  %v6844_v61 = vpop.permute.xlu1 %699 }
 0x15a   : > { %701 = vrot.lane.b32.xlu1 %v694_v59, %s6585_s14  ;;  %911 = vrot.lane.b32.xlu0 %v907_v58, %s6588_s17 }
 0x15c   : > { %v6848_v62 = vpop.permute.xlu0 %909  ;;  %v6850_v63 = vpop.permute.xlu1 %695 }
 0x15e   : > { %1127 = vrot.lane.b32.xlu1 %v907_v58, %s6587_s16  ;;  %915 = vrot.lane.b32.xlu0 %v694_v59, %s6588_s17 }
 0x160   : > { %v6854_v1 = vpop.permute.xlu0 %1129  ;;  %v6856_v3 = vpop.permute.xlu1 %913 }
 0x162   : > { %1131 = vrot.lane.b32.xlu1 %v694_v59, %s6587_s16  ;;  %1343 = vrot.lane.b32.xlu0 %v907_v58, %s6590_s19 }
 0x164   : > { %v6860_v4 = vpop.permute.xlu0 %1133  ;;  %v6862_v5 = vpop.permute.xlu1 %917 }
 0x166   : > { %1558 = vrot.lane.b32.xlu1 %v907_v58, %s6589_s18  ;;  %1347 = vrot.lane.b32.xlu0 %v694_v59, %s6590_s19 }
 0x168   : > { %v6866_v6 = vpop.permute.xlu0 %1341  ;;  %v6868_v7 = vpop.permute.xlu1 %1125 }
 0x16a   : > { %1562 = vrot.lane.b32.xlu1 %v694_v59, %s6589_s18  ;;  %1774 = vrot.lane.b32.xlu0 %v907_v58, %s6591_s20 }
 0x16c   : > { %v6872_v8 = vpop.permute.xlu0 %1560  ;;  %v6874_v9 = vpop.permute.xlu1 %1345 }
 0x16e   : > { %1991 = vrot.lane.b32.xlu1 %v907_v58, %s6592_s21  ;;  %1778 = vrot.lane.b32.xlu0 %v694_v59, %s6591_s20 }
 0x170   : > { %v6878_v10 = vpop.permute.xlu0 %1564  ;;  %v6880_v11 = vpop.permute.xlu1 %1349 }
 0x172   : > { %1995 = vrot.lane.b32.xlu1 %v694_v59, %s6592_s21  ;;  %2206 = vrot.lane.b32.xlu0 %v907_v58, %s6593_s22 }
 0x174   : > { %v6884_v12 = vpop.permute.xlu0 %1772  ;;  %v6886_v13 = vpop.permute.xlu1 %1556 }
 0x176   : > { %2422 = vrot.lane.b32.xlu1 %v907_v58, %s6594_s23  ;;  %2210 = vrot.lane.b32.xlu0 %v694_v59, %s6593_s22 }
 0x178   : > { %v6890_v14 = vpop.permute.xlu0 %1993  ;;  %v6892_v15 = vpop.permute.xlu1 %1776 }
 0x17a   : > { %2426 = vrot.lane.b32.xlu1 %v694_v59, %s6594_s23  ;;  %2638 = vrot.lane.b32.xlu0 %v907_v58, %s6595_s28 }
 0x17c   : > { %v6896_v16 = vpop.permute.xlu0 %1997  ;;  %v6898_v17 = vpop.permute.xlu1 %1780 }
 0x17e   : > { %2853 = vrot.lane.b32.xlu1 %v907_v58, %s6596_s29  ;;  %2642 = vrot.lane.b32.xlu0 %v694_v59, %s6595_s28 }
 0x180   : > { %v6902_v18 = vpop.permute.xlu0 %2204  ;;  %v6904_v19 = vpop.permute.xlu1 %1989 }
 0x182   : > { %2857 = vrot.lane.b32.xlu1 %v694_v59, %s6596_s29  ;;  %3069 = vrot.lane.b32.xlu0 %v907_v58, %s6597_s30 }
 0x184   : > { %v6908_v20 = vpop.permute.xlu0 %2424  ;;  %v6910_v21 = vpop.permute.xlu1 %2208 }
 0x186   : > { %3284 = vrot.lane.b32.xlu1 %v907_v58, %s6598_s8  ;;  %3073 = vrot.lane.b32.xlu0 %v694_v59, %s6597_s30  ;;  %v7013_v58 = vld [vmem:[%s8783_s0 + $0x1] ss:$4 sm:$0xf] }
 0x187   : > { %vm8805_vm3 = vcmp.ge.s32.totalorder %v7013_v58, 1 }
 0x188   : > { %v6918_v23 = vpop.permute.xlu0 %2428  ;;  %v6920_v24 = vpop.permute.xlu1 %2212  ;;  %vm7038_vm5 = vmand %vm658_vm2, %vm8805_vm3 }
 0x189   : > { %vm668_vm6 = vmand %vm7038_vm5, %vm8808_vm4 }
 0x18a   : > { %3288 = vrot.lane.b32.xlu1 %v694_v59, %s6598_s8  ;;  %3499 = vrot.lane.b32.xlu0 %v6916_v22, %s6582_s11  ;;  %v5406_v59 = vld [vmem:[#allocation2 + $0x14] sm:$0xf]  ;;  %vm1098_vm8 = vmand %vm7038_vm5, %vm8810_vm7 }
 0x18b   : > { %vm7166_vm4 = vmand %vm658_vm2, %vm8810_vm7 }
 0x18c   : > { %v6929_v26 = vpop.permute.xlu0 %2636  ;;  %v6931_v27 = vpop.permute.xlu1 %2420 }
 0x18d   : > { %8827 = vst [vmem:[#allocation12_spill] sm:$0xff] %v6929_v26 }
 0x18e   : > { %3715 = vrot.lane.b32.xlu1 %v6916_v22, %s6584_s13  ;;  %3503 = vrot.lane.b32.xlu0 %v6927_v25, %s6582_s11 }
 0x190   : > { %v6937_v28 = vpop.permute.xlu0 %2855  ;;  %v6939_v32 = vpop.permute.xlu1 %2640 }
 0x191   : > { %8828 = vst [vmem:[#allocation13_spill] sm:$0xff] %v6937_v28  ;;  %8829 = vst [vmem:[#allocation14_spill] sm:$0xff] %v6939_v32 }
 0x192   : > { %3719 = vrot.lane.b32.xlu1 %v6927_v25, %s6584_s13  ;;  %3930 = vrot.lane.b32.xlu0 %v6916_v22, %s6583_s12  ;;  %s8566_s13 = scalar_lea.vmem %s8790_s7, %s6536_s10 }
 0x194   : > { %v6945_v29 = vpop.permute.xlu0 %2859  ;;  %v6947_v33 = vpop.permute.xlu1 %2644 }
 0x195   : > { %8830 = vst [vmem:[#allocation15_spill] sm:$0xff] %v6945_v29  ;;  %8831 = vst [vmem:[#allocation16_spill] sm:$0xff] %v6947_v33 }
 0x196   : > { %4146 = vrot.lane.b32.xlu1 %v6916_v22, %s6586_s15  ;;  %3934 = vrot.lane.b32.xlu0 %v6927_v25, %s6583_s12 }
 0x198   : > { %v6953_v34 = vpop.permute.xlu0 %3067  ;;  %v6955_v35 = vpop.permute.xlu1 %2851 }
 0x199   : > { %8832 = vst [vmem:[#allocation17_spill] sm:$0xff] %v6953_v34  ;;  %8833 = vst [vmem:[#allocation18_spill] sm:$0xff] %v6955_v35 }
 0x19a   : > { %4150 = vrot.lane.b32.xlu1 %v6927_v25, %s6586_s15  ;;  %4363 = vrot.lane.b32.xlu0 %v6916_v22, %s6585_s14 }
 0x19c   : > { %v6961_v36 = vpop.permute.xlu0 %3286  ;;  %v6963_v37 = vpop.permute.xlu1 %3071 }
 0x19d   : > { %8834 = vst [vmem:[#allocation19_spill] sm:$0xff] %v6961_v36  ;;  %8835 = vst [vmem:[#allocation20_spill] sm:$0xff] %v6963_v37 }
 0x19e   : > { %4577 = vrot.lane.b32.xlu1 %v6916_v22, %s6588_s17  ;;  %4367 = vrot.lane.b32.xlu0 %v6927_v25, %s6585_s14 }
 0x1a0   : > { %v6969_v38 = vpop.permute.xlu0 %3290  ;;  %v6971_v39 = vpop.permute.xlu1 %3075 }
 0x1a1   : > { %8836 = vst [vmem:[#allocation21_spill] sm:$0xff] %v6969_v38  ;;  %8837 = vst [vmem:[#allocation22_spill] sm:$0xff] %v6971_v39  ;;  %v5837_v39 = vld [vmem:[#allocation2 + $0x14] sm:$0xf] }
 0x1a2   : > { %4581 = vrot.lane.b32.xlu1 %v6927_v25, %s6588_s17  ;;  %4792 = vrot.lane.b32.xlu0 %v6916_v22, %s6587_s16 }
 0x1a4   : > { %v6977_v40 = vpop.permute.xlu0 %3497  ;;  %v6979_v41 = vpop.permute.xlu1 %3282 }
 0x1a5   : > { %8838 = vst [vmem:[#allocation23_spill] sm:$0xff] %v6977_v40  ;;  %8839 = vst [vmem:[#allocation24_spill] sm:$0xff] %v6979_v41  ;;  %v6358_v40 = vld [vmem:[%s8789_s6 + $0x8] sm:$0xff] }
 0x1a6   : > { %5007 = vrot.lane.b32.xlu1 %v6916_v22, %s6590_s19  ;;  %4796 = vrot.lane.b32.xlu0 %v6927_v25, %s6587_s16 }
 0x1a8   : > { %v6985_v42 = vpop.permute.xlu0 %3717  ;;  %v6987_v43 = vpop.permute.xlu1 %3501 }
 0x1a9   : > { %8840 = vst [vmem:[#allocation25_spill] sm:$0xff] %v6985_v42  ;;  %8841 = vst [vmem:[#allocation26_spill] sm:$0xff] %v6987_v43 }
 0x1aa   : > { %5011 = vrot.lane.b32.xlu1 %v6927_v25, %s6590_s19  ;;  %5221 = vrot.lane.b32.xlu0 %v6916_v22, %s6589_s18 }
 0x1ac   : > { %v6993_v44 = vpop.permute.xlu0 %3928  ;;  %v6995_v45 = vpop.permute.xlu1 %3713 }
 0x1ad   : > { %8842 = vst [vmem:[#allocation27_spill] sm:$0xff] %v6993_v44  ;;  %8843 = vst [vmem:[#allocation28_spill] sm:$0xff] %v6995_v45 }
 0x1ae   : > { %5436 = vrot.lane.b32.xlu1 %v6916_v22, %s6591_s20  ;;  %5225 = vrot.lane.b32.xlu0 %v6927_v25, %s6589_s18 }
 0x1b0   : > { %v7001_v46 = vpop.permute.xlu0 %4148  ;;  %v7003_v47 = vpop.permute.xlu1 %3932 }
 0x1b1   : > { %8844 = vst [vmem:[#allocation29_spill] sm:$0xff] %v7001_v46  ;;  %8845 = vst [vmem:[#allocation30_spill] sm:$0xff] %v7003_v47 }
 0x1b2   : > { %5440 = vrot.lane.b32.xlu1 %v6927_v25, %s6591_s20  ;;  %5438 = vrot.lane.b32.xlu0 %v6690_v31, %s6591_s20 }
 0x1b4   : > { %v7019_v0 = vpop.permute.xlu0 %4361  ;;  %v7021_v2 = vpop.permute.xlu1 %4144 }
 0x1b5   : > { %8847 = vst [vmem:[#allocation32_spill] sm:$0xff] %v7019_v0  ;;  %8848 = vst [vmem:[#allocation33_spill] sm:$0xff] %v7021_v2  ;;  %v671_v0 = vshrl.u32 %v670_v57, 7  ;;  %v8855_v57 = vmov 0  }
 0x1b6   : > { %5434 = vrot.lane.b32.xlu1 %v6687_v30, %s6591_s20  ;;  %5442 = vrot.lane.b32.xlu0 %v5406_v59, %s6591_s20  ;;  %v5621_v59 = vld [vmem:[#allocation2 + $0x14] sm:$0xf]  ;;  %v669_v46 = vsel %vm668_vm6, 1, %v8855_v57  ;;  %v883_v48 = vsel %vm7038_vm5, 1, %v8855_v57  ;;  %v1099_v54 = vsel %vm1098_vm8, 1, %v8855_v57  ;;  %vm8813_vm8 = vcmp.lt.s32.totalorder %v7013_v58, 7 }
 0x1b7   : > { %v7063_v2 = vsub.s32 2, %v671_v0  ;;  %v7069_v47 = vsub.s32 3, %v671_v0  ;;  %v7148_v33 = vsel %vm658_vm2, 1, %v8855_v57  ;;  %v7223_v53 = vsel %vm7166_vm4, 1, %v8855_v57 }
 0x1b8   : > { %v7042_v55 = vpop.permute.xlu0 %4579  ;;  %v7044_v51 = vpop.permute.xlu1 %4365 }
 0x1b9   : > { %8851 = vst [vmem:[#allocation34_spill] sm:$0xff] %v7042_v55  ;;  %8852 = vst [vmem:[#allocation35_spill] sm:$0xff] %v7044_v51  ;;  %v7058_v55 = vsub.s32 0, %v671_v0  ;;  %v7060_v51 = vsub.s32 1, %v671_v0  ;;  %v681_v0 = vrot.slane %v669_v46, %v7063_v2  ;;  %v895_v38 = vrot.slane %v883_v48, %v7063_v2 }
 0x1ba   : > { %5654 = vrot.lane.b32.xlu1 %v6690_v31, %s6592_s21  ;;  %5652 = vrot.lane.b32.xlu0 %v6916_v22, %s6592_s21  ;;  %v1111_v36 = vrot.slane %v1099_v54, %v7063_v2  ;;  %v1115_v41 = vrot.slane %v1099_v54, %v7069_v47 }
 0x1bb   : > { %v673_v44 = vrot.slane %v669_v46, %v7058_v55  ;;  %v677_v50 = vrot.slane %v669_v46, %v7060_v51  ;;  %v891_v43 = vrot.slane %v883_v48, %v7060_v51  ;;  %vm7109_vm14 = vcmp.eq.s32.totalorder %v681_v0, 1 }
 0x1bc   : > { %v7054_v52 = vpop.permute.xlu0 %4790  ;;  %v7056_v49 = vpop.permute.xlu1 %4575  ;;  %v1103_v0 = vrot.slane %v1099_v54, %v7058_v55  ;;  %vm7154_vm3 = vcmp.eq.s32.totalorder %v895_v38, 1  ;;  %vm7201_vm13 = vcmp.eq.s32.totalorder %v1115_v41, 1  ;;  %v1534_v41 = vrot.slane %v7148_v33, %v7058_v55  ;;  %v6365_v38 = vld [vmem:[%s8789_s6 + $0x10] sm:$0xff] }
 0x1bd   : > { %8853 = vst [vmem:[#allocation36_spill] sm:$0xff] %v7054_v52  ;;  %8854 = vst [vmem:[#allocation37_spill] sm:$0xff] %v7056_v49  ;;  %vm7100_vm11 = vcmp.eq.s32.totalorder %v673_v44, 1  ;;  %vm7104_vm12 = vcmp.eq.s32.totalorder %v677_v50, 1  ;;  %v7116_v44 = vsel %vm1314_vm9, 1, %v8855_v57  ;;  %vm7137_vm9 = vcmp.eq.s32.totalorder %v891_v43, 1 }
 0x1be   : > { %5658 = vrot.lane.b32.xlu1 %v5621_v59, %s6592_s21  ;;  %5656 = vrot.lane.b32.xlu0 %v6927_v25, %s6592_s21  ;;  %v685_v59 = vrot.slane %v669_v46, %v7069_v47  ;;  %v1319_v29 = vrot.slane %v7116_v44, %v7058_v55  ;;  %vm7180_vm1 = vcmp.eq.s32.totalorder %v1103_v0, 1  ;;  %v8887_v46 = vmov 0 }
 0x1bf   : > { %v8888_v46 = vsel %vm7201_vm13, 4294967295, %v8887_v46  ;;  %vm8897_vm13 = vcmask 31744  }
 0x1c0   : > { %v7071_v52 = vpop.permute.xlu0 %5009  ;;  %v7073_v49 = vpop.permute.xlu1 %4794  ;;  %vm7122_vm15 = vcmp.eq.s32.totalorder %v685_v59, 1 }
 0x1c1   : > { %8856 = vst [vmem:[#allocation38_spill] sm:$0xff] %v7071_v52  ;;  %8857 = vst [vmem:[#allocation39_spill] sm:$0xff] %v7073_v49  ;;  %v887_v52 = vrot.slane %v883_v48, %v7058_v55 }
 0x1c2   : > { %5866 = vrot.lane.b32.xlu1 %v6916_v22, %s6593_s22  ;;  %5650 = vrot.lane.b32.xlu0 %v6687_v30, %s6592_s21 }
 0x1c3   : > { %vm7128_vm6 = vcmp.eq.s32.totalorder %v887_v52, 1  ;;  %v1323_v52 = vrot.slane %v7116_v44, %v7060_v51 }
 0x1c4   : > { %v7096_v49 = vpop.permute.xlu0 %5219  ;;  %v7098_v42 = vpop.permute.xlu1 %5005 }
 0x1c5   : > { %8858 = vst [vmem:[#allocation40_spill] sm:$0xff] %v7096_v49  ;;  %8859 = vst [vmem:[#allocation41_spill] sm:$0xff] %v7098_v42  ;;  %v899_v49 = vrot.slane %v883_v48, %v7069_v47  ;;  %v1107_v42 = vrot.slane %v1099_v54, %v7060_v51  ;;  %v6051_v48 = vld [vmem:[#allocation2 + $0x14] sm:$0xf] }
 0x1c6   : > { %5870 = vrot.lane.b32.xlu1 %v6927_v25, %s6593_s22  ;;  %5868 = vrot.lane.b32.xlu0 %v6690_v31, %s6593_s22 }
 0x1c7   : > { %vm7158_vm5 = vcmp.eq.s32.totalorder %v899_v49, 1  ;;  %v718_v49 = vld [vmem:[%s8789_s6] sm:$0xff]  ;;  %vm7184_vm7 = vcmp.eq.s32.totalorder %v1107_v42, 1  ;;  %v1538_v42 = vrot.slane %v7148_v33, %v7060_v51 }
 0x1c8   : > { %v7135_v59 = vpop.permute.xlu1 %5223  ;;  %v698_v37 = vpop.permute.xlu0 %697 }
 0x1c9   : > { %8870 = vst [vmem:[#allocation42_spill] sm:$0xff] %v7135_v59  ;;  %v706_v54 = vsel %vm8812_vm10, %v6850_v63, %v698_v37  ;;  %v707_v43 = vsel %vm8812_vm10, %v698_v37, %v6844_v61  ;;  %vm8893_vm10 = vcmask 596992  }
 0x1ca   : > { %v714_v63 = vsel %vm7100_vm11, %v706_v54, 0.0  ;;  %v715_v37 = vsel %vm7104_vm12, %v707_v43, 0.0  ;;  %5864 = vrot.lane.b32.xlu1 %v6687_v30, %s6593_s22  ;;  %5872 = vrot.lane.b32.xlu0 %v5837_v39, %s6593_s22  ;;  %vm7192_vm11 = vmand %vm658_vm2, %vm8813_vm8  ;;  %vm7197_vm12 = vcmp.eq.s32.totalorder %v1111_v36, 1  ;;  %v8885_v39 = vmov 0 }
 0x1cb   : > { %6352 = vmatprep.subr.msk.mxu0 %vm8816_vm0, %v715_v37  ;;  %v8886_v39 = vsel %vm7197_vm12, 4294967295, %v8885_v39  ;;  %vm7208_vm2 = vcmp.eq.s32.totalorder %v1319_v29, 1  ;;  %v8889_v43 = vmov 0  ;;  %vm7212_vm8 = vcmp.eq.s32.totalorder %v1323_v52, 1 }
 0x1cc   : > { %v702_v0 = vpop.permute.xlu1 %701  ;;  %v912_v54 = vpop.permute.xlu0 %911  ;;  %6353 = vmatpush1.msk.msra.mxu0 %vm8816_vm0, %v714_v63  ;;  %v8890_v43 = vsel %vm7208_vm2, 4294967295, %v8889_v43  ;;  %v8891_v36 = vmov 0  ;;  %v1327_v37 = vrot.slane %v7116_v44, %v7063_v2  ;;  %vm8894_vm0 = vmmov %vm8893_vm10  ;;  %vm8895_vm2 = vcmask 588800  }
 0x1cd   : > { %v8892_v36 = vsel %vm7212_vm8, 4294967295, %v8891_v36  ;;  %v708_v29 = vsel %vm8893_vm10, %v6844_v61, %v702_v0  ;;  %v709_v52 = vsel %vm8894_vm0, %v702_v0, %v6842_v60  ;;  %v920_v63 = vsel %vm8895_vm2, %v6848_v62, %v912_v54  ;;  %vm8896_vm8 = vmmov %vm8895_vm2  ;;  %6354 = vmatmul.mubr.msk.f32.vlgmr.msra.gmra.mxu0 %vm8897_vm13, %v718_v49 }
 0x1ce   : > { %v921_v26 = vsel %vm8896_vm8, %v912_v54, %v6856_v3  ;;  %vm8898_vm12 = vcmp.ge.s32.totalorder %v7026_v56, 1  ;;  %v716_v61 = vsel %vm7109_vm14, %v708_v29, 0.0  ;;  %v717_v60 = vsel %vm7122_vm15, %v709_v52, 0.0  ;;  %6083 = vrot.lane.b32.xlu1 %v6690_v31, %s6594_s23  ;;  %6081 = vrot.lane.b32.xlu0 %v6916_v22, %s6594_s23 }
 0x1cf   : > { %vm7238_vm4 = vmand %vm7192_vm11, %vm8898_vm12  ;;  %v928_v62 = vsel %vm7128_vm6, %v920_v63, 0.0  ;;  %v929_v0 = vsel %vm7137_vm9, %v921_v26, 0.0  ;;  %vm8901_vm0 = vcmask 1043456   ;;  %vm7259_vm13 = vcmp.eq.s32.totalorder %v1538_v42, 1 }
 0x1d0   : > { %6355 = vmatprep.subr.msk.mxu1 %vm8901_vm0, %v717_v60  ;;  %vm8902_vm10 = vmmov %vm8901_vm0  ;;  %v1331_v26 = vrot.slane %v7116_v44, %v7069_v47  ;;  %v1546_v31 = vrot.slane %v7148_v33, %v7069_v47  ;;  %v1128_v22 = vpop.permute.xlu1 %1127  ;;  %v916_v34 = vpop.permute.xlu0 %915  ;;  %v1542_v42 = vrot.slane %v7148_v33, %v7063_v2  ;;  %v1750_v54 = vrot.slane %v7223_v53, %v7058_v55 }
 0x1d1   : > { %6359 = vmatprep.subr.msk.mxu0 %vm8902_vm10, %v929_v0  ;;  %vm8905_vm15 = vmmov %vm8901_vm0  ;;  %v1754_v29 = vrot.slane %v7223_v53, %v7060_v51  ;;  %v7278_v44 = vsel %vm7238_vm4, 1, %v8855_v57  ;;  %vm8907_vm8 = vcmask 580608   ;;  %v8910_v60 = vmov 0.0  }
 0x1d2   : > { %6356 = vmatpush1.msk.msra.mxu1 %vm8905_vm15, %v716_v61  ;;  %vm8906_vm6 = vmmov %vm8901_vm0  ;;  %v1136_v52 = vsel %vm8907_vm8, %v6868_v7, %v1128_v22  ;;  %v923_v61 = vsel %vm8895_vm2, %v916_v34, %v6862_v5  ;;  %1013 = vmatprep.mubr.f32.mxu0 %v8910_v60  ;;  %vm7289_vm0 = vcmp.eq.s32.totalorder %v1534_v41, 1  ;;  %vm8913_vm4 = vcmask 31744  }
 0x1d3   : > { %6360 = vmatpush1.msk.msra.mxu0 %vm8906_vm6, %v928_v62  ;;  %vm8908_vm9 = vmmov %vm8907_vm8  ;;  %v931_v0 = vsel %vm7158_vm5, %v923_v61, 0.0  ;;  %6357 = vmatmul.mubr.msk.f32.vlgmr.msra.gmra.mxu1 %vm8913_vm4, %v718_v49  ;;  %vm7301_vm15 = vcmp.eq.s32.totalorder %v1327_v37, 1  ;;  %v1144_v5 = vsel %vm7180_vm1, %v1136_v52, 0.0  ;;  %vm7323_vm1 = vcmp.eq.s32.totalorder %v1542_v42, 1 }
 0x1d4   : > { %v1137_v63 = vsel %vm8908_vm9, %v1128_v22, %v6854_v1  ;;  %vm8909_vm12 = vmmov %vm8895_vm2  ;;  %6087 = vrot.lane.b32.xlu1 %v6051_v48, %s6594_s23  ;;  %6085 = vrot.lane.b32.xlu0 %v6927_v25, %s6594_s23  ;;  %v1132_v59 = vpop.permute.xlu1 %1131  ;;  %v1344_v49 = vpop.permute.xlu0 %1343  ;;  %vm7327_vm9 = vcmp.eq.s32.totalorder %v1754_v29, 1  ;;  %v1967_v37 = vrot.slane %v7278_v44, %v7058_v55  ;;  %v1979_v52 = vrot.slane %v7278_v44, %v7069_v47 }
 0x1d5   : > { %v922_v33 = vsel %vm8909_vm12, %v6856_v3, %v916_v34  ;;  %v1145_v35 = vsel %vm7184_vm7, %v1137_v63, 0.0  ;;  %vm8914_vm10 = vmmov %vm8913_vm4  ;;  %vm7314_vm7 = vcmp.eq.s32.totalorder %v1546_v31, 1  ;;  %6362 = vmatprep.subr.msk.mxu1 %vm8906_vm6, %v931_v0  ;;  %v1762_v31 = vrot.slane %v7223_v53, %v7069_v47  ;;  %1084 = vmatprep.mubr.f32.mxu1 %v8910_v60  ;;  %v453_v0 = vld [vmem:[%s8788_s5] sm:$0xff] }
 0x1d6   : > { %v930_v7 = vsel %vm7154_vm3, %v922_v33, 0.0  ;;  %6361 = vmatmul.mubr.msk.f32.vlgmr.msra.gmra.mxu0 %vm8914_vm10, %v6358_v40  ;;  %vm7310_vm3 = vcmp.eq.s32.totalorder %v1331_v26, 1  ;;  %vm8921_vm8 = vmmov %vm8906_vm6  ;;  %v1758_v26 = vrot.slane %v7223_v53, %v7063_v2  ;;  %vm8926_vm12 = vcmask 580608  }
 0x1d7   : > { %6366 = vmatprep.subr.msk.mxu0 %vm8921_vm8, %v1145_v35  ;;  %v1138_v22 = vsel %vm8926_vm12, %v6854_v1, %v1132_v59  ;;  %vm8927_vm2 = vmmov %vm8926_vm12  ;;  %vm8929_vm10 = vcmask 531456   ;;  %v7352_v53 = vsel %vm7192_vm11, 1, %v8855_v57  ;;  %vm8932_vm8 = vnez %v8886_v39  ;;  %1229 = vmatprep.mubr.f32.mxu0 %v8910_v60 }
 0x1d8   : > { %v1139_v34 = vsel %vm8927_vm2, %v1132_v59, %v6860_v4  ;;  %vm8928_vm4 = vmmov %vm8906_vm6  ;;  %v1352_v48 = vsel %vm8929_vm10, %v6866_v6, %v1344_v49  ;;  %vm7345_vm6 = vcmp.eq.s32.totalorder %v1750_v54, 1  ;;  %v1146_v1 = vsel %vm8932_vm8, %v1138_v22, 0.0  ;;  %6079 = vrot.lane.b32.xlu0 %v6687_v30, %s6594_s23  ;;  %v1559_v45 = vpop.permute.xlu1 %1558  ;;  %v1348_v63 = vpop.permute.xlu0 %1347 }
 0x1d9   : > { %6363 = vmatpush1.msk.msra.mxu1 %vm8928_vm4, %v930_v7  ;;  %vm8933_vm12 = vnez %v8888_v46  ;;  %vm8934_vm2 = vmmov %vm8929_vm10  ;;  %6367 = vmatpush1.msk.msra.mxu0 %vm8928_vm4, %v1144_v5  ;;  %v1971_v6 = vrot.slane %v7278_v44, %v7060_v51  ;;  %vm8935_vm10 = vcmp.lt.s32.totalorder %v7026_v56, 7  ;;  %vm8938_vm8 = vnez %v8890_v43 }
 0x1da   : > { %v1147_v4 = vsel %vm8933_vm12, %v1139_v34, 0.0  ;;  %v1353_v29 = vsel %vm8934_vm2, %v1344_v49, %v6874_v9  ;;  %vm7368_vm5 = vmand %vm7192_vm11, %vm8935_vm10  ;;  %v1360_v46 = vsel %vm8938_vm8, %v1352_v48, 0.0  ;;  %vm8939_vm12 = vnez %v8892_v36 }
 0x1db   : > { %v1361_v54 = vsel %vm8939_vm12, %v1353_v29, 0.0  ;;  %vm8940_vm2 = vcmask 31744   ;;  %vm8942_vm11 = vcmask 1043456   ;;  %vm7383_vm10 = vcmp.eq.s32.totalorder %v1758_v26, 1 }
 0x1dc   : > { %6364 = vmatmul.mubr.msk.f32.vlgmr.msra.gmra.mxu1 %vm8940_vm2, %v6358_v40  ;;  %vm8941_vm4 = vmmov %vm8940_vm2  ;;  %6369 = vmatprep.subr.msk.mxu1 %vm8942_vm11, %v1147_v4  ;;  %vm7387_vm8 = vcmp.eq.s32.totalorder %v1762_v31, 1  ;;  %v1975_v40 = vrot.slane %v7278_v44, %v7063_v2  ;;  %v2182_v33 = vrot.slane %v7352_v53, %v7058_v55  ;;  %v2186_v30 = vrot.slane %v7352_v53, %v7060_v51  ;;  %v6372_v44 = vld [vmem:[%s8789_s6 + $0x18] sm:$0xff]  ;;  %v1563_v3 = vpop.permute.xlu1 %1562  ;;  %v1775_v22 = vpop.permute.xlu0 %1774 }
 0x1dd   : > { %6368 = vmatmul.mubr.msk.f32.vlgmr.msra.gmra.mxu0 %vm8941_vm4, %v6365_v38  ;;  %vm8947_vm12 = vmmov %vm8942_vm11  ;;  %vm8948_vm2 = vcmask 523264   ;;  %6370 = vmatpush1.msk.msra.mxu1 %vm8942_vm11, %v1146_v1  ;;  %vm8950_vm14 = vcmask 531456   ;;  %v8952_v59 = vmov 0  ;;  %v8966_v34 = vmov 0 }
 0x1de   : > { %6373 = vmatprep.subr.msk.mxu0 %vm8947_vm12, %v1361_v54  ;;  %v1567_v61 = vsel %vm8948_vm2, %v6886_v13, %v1559_v45  ;;  %vm8949_vm4 = vmmov %vm8948_vm2  ;;  %v1354_v7 = vsel %vm8950_vm14, %v6874_v9, %v1348_v63  ;;  %v7414_v13 = vsel %vm7368_vm5, 1, %v8855_v57  ;;  %1300 = vmatprep.mubr.f32.mxu1 %v8910_v60  ;;  %v1355_v9 = vsel %vm8950_vm14, %v1348_v63, %v6880_v11 }
 0x1df   : > { %v1568_v35 = vsel %vm8949_vm4, %v1559_v45, %v6872_v8  ;;  %vm8951_vm12 = vmmov %vm8942_vm11  ;;  %vm7422_vm2 = vcmp.eq.s32.totalorder %v1967_v37, 1  ;;  %vm7426_vm4 = vcmp.eq.s32.totalorder %v1971_v6, 1  ;;  %vm8956_vm5 = vcmp.ge.s32.totalorder %v7026_v56, 1  ;;  %1445 = vmatprep.mubr.f32.mxu0 %v8910_v60  ;;  %457 = vperm.xlu0 %6564, %v453_v0   ;;  %v6379_v6 = vld [vmem:[%s8789_s6 + $0x20] sm:$0xff] }
 0x1e0   : > { %v1576_v5 = vsel %vm7259_vm13, %v1568_v35, 0.0  ;;  %6374 = vmatpush1.msk.msra.mxu0 %vm8951_vm12, %v1360_v46  ;;  %v8953_v59 = vsel %vm7422_vm2, 4294967295, %v8952_v59  ;;  %vm8957_vm11 = vcmp.ge.s32.totalorder %v7013_v58, 1  ;;  %v1362_v11 = vsel %vm7301_vm15, %v1354_v7, 0.0  ;;  %v1992_v25 = vpop.permute.xlu1 %1991  ;;  %v1779_v41 = vpop.permute.xlu0 %1778 }
 0x1e1   : > { %vm7434_vm13 = vmand %vm8957_vm11, %vm8956_vm5  ;;  %v1363_v37 = vsel %vm7310_vm3, %v1355_v9, 0.0  ;;  %vm8960_vm14 = vcmask 31744   ;;  %vm7444_vm12 = vcmp.eq.s32.totalorder %v1979_v52, 1  ;;  %v1575_v31 = vsel %vm7289_vm0, %v1567_v61, 0.0 }
 0x1e2   : > { %6371 = vmatmul.mubr.msk.f32.vlgmr.msra.gmra.mxu1 %vm8960_vm14, %v6365_v38  ;;  %vm8963_vm5 = vmmov %vm8960_vm14  ;;  %vm7451_vm15 = vcmp.eq.s32.totalorder %v1975_v40, 1  ;;  %vm7455_vm3 = vcmp.eq.s32.totalorder %v2186_v30, 1  ;;  %v2398_v38 = vrot.slane %v7414_v13, %v7058_v55  ;;  %v2190_v62 = vrot.slane %v7352_v53, %v7063_v2 }
 0x1e3   : > { %6375 = vmatmul.mubr.msk.f32.vlgmr.msra.gmra.mxu0 %vm8963_vm5, %v6372_v44  ;;  %v8967_v34 = vsel %vm7455_vm3, 4294967295, %v8966_v34  ;;  %v2194_v48 = vrot.slane %v7352_v53, %v7069_v47  ;;  %vm8968_vm0 = vcmask 1043456   ;;  %vm8970_vm14 = vcmask 523264   ;;  %1516 = vmatprep.mubr.f32.mxu1 %v8910_v60 }
 0x1e4   : > { %6376 = vmatprep.subr.msk.mxu1 %vm8968_vm0, %v1363_v37  ;;  %vm8969_vm11 = vmmov %vm8968_vm0  ;;  %v1569_v1 = vsel %vm8970_vm14, %v6872_v8, %v1563_v3  ;;  %vm8972_vm2 = vcmask 515072   ;;  %vm7476_vm3 = vcmp.eq.s32.totalorder %v2182_v33, 1  ;;  %v7483_v53 = vsel %vm7434_vm13, 1, %v8855_v57  ;;  %1660 = vmatprep.mubr.f32.mxu0 %v8910_v60  ;;  %v1996_v43 = vpop.permute.xlu1 %1995  ;;  %v2207_v36 = vpop.permute.xlu0 %2206 }
 0x1e5   : > { %6380 = vmatprep.subr.msk.mxu0 %vm8969_vm11, %v1576_v5  ;;  %vm8971_vm5 = vmmov %vm8970_vm14  ;;  %v1783_v29 = vsel %vm8972_vm2, %v6884_v12, %v1775_v22  ;;  %6377 = vmatpush1.msk.msra.mxu1 %vm8968_vm0, %v1362_v11  ;;  %v2402_v12 = vrot.slane %v7414_v13, %v7060_v51  ;;  %v1577_v46 = vsel %vm7323_vm1, %v1569_v1, 0.0  ;;  %v2406_v28 = vrot.slane %v7414_v13, %v7063_v2 }
 0x1e6   : > { %v1570_v4 = vsel %vm8971_vm5, %v1563_v3, %v6878_v10  ;;  %v1784_v10 = vsel %vm8972_vm2, %v1775_v22, %v6892_v15  ;;  %vm8975_vm13 = vmmov %vm8968_vm0  ;;  %v2410_v52 = vrot.slane %v7414_v13, %v7069_v47  ;;  %v1791_v45 = vsel %vm7345_vm6, %v1783_v29, 0.0 }
 0x1e7   : > { %v1578_v8 = vsel %vm7314_vm7, %v1570_v4, 0.0  ;;  %v1792_v54 = vsel %vm7327_vm9, %v1784_v10, 0.0  ;;  %6381 = vmatpush1.msk.msra.mxu0 %vm8975_vm13, %v1575_v31  ;;  %vm8976_vm7 = vcmask 31744   ;;  %vm7507_vm1 = vcmp.eq.s32.totalorder %v2190_v62, 1  ;;  %vm8983_vm5 = vmmov %vm8968_vm0 }
 0x1e8   : > { %6378 = vmatmul.mubr.msk.f32.vlgmr.msra.gmra.mxu1 %vm8976_vm7, %v6372_v44  ;;  %vm8977_vm14 = vmmov %vm8976_vm7  ;;  %vm7511_vm9 = vcmp.eq.s32.totalorder %v2194_v48, 1  ;;  %v2614_v33 = vrot.slane %v7483_v53, %v7058_v55  ;;  %v2618_v42 = vrot.slane %v7483_v53, %v7060_v51  ;;  %vm8982_vm6 = vcmp.ge.s32.totalorder %v7013_v58, 1  ;;  %6383 = vmatprep.subr.msk.mxu1 %vm8983_vm5, %v1578_v8  ;;  %v6386_v44 = vld [vmem:[%s8789_s6 + $0x28] sm:$0xff]  ;;  %v6393_v48 = vld [vmem:[%s8789_s6 + $0x30] sm:$0xff]  ;;  %v2423_v32 = vpop.permute.xlu1 %2422 }
 0x1e9   : > { %6382 = vmatmul.mubr.msk.f32.vlgmr.msra.gmra.mxu0 %vm8977_vm14, %v6379_v6  ;;  %v7522_v30 = vsel %vm8982_vm6, 1, %v8855_v57  ;;  %6387 = vmatprep.subr.msk.mxu0 %vm8968_vm0, %v1792_v54  ;;  %vm8984_vm2 = vcmask 465920   ;;  %vm8986_vm7 = vcmask 515072   ;;  %vm7535_vm14 = vcmp.eq.s32.totalorder %v2398_v38, 1  ;;  %vm8989_vm6 = vmmov %vm8968_vm0 }
 0x1ea   : > { %v2000_v61 = vsel %vm8984_vm2, %v6904_v19, %v1992_v25  ;;  %vm8985_vm13 = vmmov %vm8984_vm2  ;;  %v1785_v7 = vsel %vm8986_vm7, %v6892_v15, %v1779_v41  ;;  %6384 = vmatpush1.msk.msra.mxu1 %vm8989_vm6, %v1577_v46  ;;  %1731 = vmatprep.mubr.f32.mxu1 %v8910_v60  ;;  %vm7545_vm0 = vcmp.eq.s32.totalorder %v2402_v12, 1  ;;  %v2833_v50 = vrot.slane %v7522_v30, %v7060_v51  ;;  %v9044_v15 = vld [vmem:[#allocation12_spill] sm:$0xff] }
 0x1eb   : > { %v2001_v35 = vsel %vm8985_vm13, %v1992_v25, %v6890_v14  ;;  %vm8990_vm5 = vmmov %vm8986_vm7  ;;  %vm8993_vm13 = vcmp.lt.s32.totalorder %v7026_v56, 7  ;;  %vm8994_vm7 = vcmp.ge.s32.totalorder %v7013_v58, 1  ;;  %v1793_v9 = vsel %vm7383_vm10, %v1785_v7, 0.0  ;;  %1876 = vmatprep.mubr.f32.mxu0 %v8910_v60 }
 0x1ec   : > { %v2009_v13 = vsel %vm7426_vm4, %v2001_v35, 0.0  ;;  %v1786_v19 = vsel %vm8990_vm5, %v1779_v41, %v6898_v17  ;;  %vm7553_vm11 = vmand %vm8994_vm7, %vm8993_vm13  ;;  %vm9000_vm5 = vnez %v8953_v59  ;;  %vm9001_vm13 = vcmask 31744   ;;  %v2427_v63 = vpop.permute.xlu1 %2426  ;;  %v9087_v41 = vld [vmem:[#allocation15_spill] sm:$0xff] }
 0x1ed   : > { %v1794_v49 = vsel %vm7387_vm8, %v1786_v19, 0.0  ;;  %vm8997_vm4 = vmmov %vm8989_vm6  ;;  %vm7563_vm6 = vcmp.eq.s32.totalorder %v2410_v52, 1  ;;  %v2008_v11 = vsel %vm9000_vm5, %v2000_v61, 0.0  ;;  %6385 = vmatmul.mubr.msk.f32.vlgmr.msra.gmra.mxu1 %vm9001_vm13, %v6379_v6  ;;  %vm7573_vm8 = vcmp.eq.s32.totalorder %v2406_v28, 1  ;;  %v6400_v52 = vld [vmem:[%s8789_s6 + $0x38] sm:$0xff] }
 0x1ee   : > { %6388 = vmatpush1.msk.msra.mxu0 %vm8997_vm4, %v1791_v45  ;;  %vm9002_vm10 = vmmov %vm9001_vm13  ;;  %vm7577_vm7 = vcmp.eq.s32.totalorder %v2618_v42, 1  ;;  %v9005_v31 = vmov 0  ;;  %v2829_v3 = vrot.slane %v7522_v30, %v7058_v55  ;;  %v2622_v59 = vrot.slane %v7483_v53, %v7063_v2  ;;  %6390 = vmatprep.subr.msk.mxu1 %vm8997_vm4, %v1794_v49  ;;  %v9104_v49 = vld [vmem:[#allocation24_spill] sm:$0xff] }
 0x1ef   : > { %6389 = vmatmul.mubr.msk.f32.vlgmr.msra.gmra.mxu0 %vm9002_vm10, %v6386_v44  ;;  %v9006_v31 = vsel %vm7577_vm7, 4294967295, %v9005_v31  ;;  %vm9007_vm5 = vmmov %vm8997_vm4  ;;  %vm7596_vm7 = vcmp.eq.s32.totalorder %v2614_v33, 1  ;;  %v7603_v4 = vsel %vm7553_vm11, 1, %v8855_v57  ;;  %6391 = vmatpush1.msk.msra.mxu1 %vm8997_vm4, %v1793_v9  ;;  %vm9013_vm11 = vnez %v8967_v34  ;;  %v2211_v34 = vpop.permute.xlu0 %2210  ;;  %v6407_v9 = vld [vmem:[%s8789_s6 + $0x40] sm:$0xff] }
 0x1f0   : > { %6394 = vmatprep.subr.msk.mxu0 %vm9007_vm5, %v2009_v13  ;;  %vm9008_vm13 = vmmov %vm8984_vm2  ;;  %1947 = vmatprep.mubr.f32.mxu1 %v8910_v60  ;;  %v2841_v8 = vrot.slane %v7522_v30, %v7069_v47  ;;  %v2837_v12 = vrot.slane %v7522_v30, %v7063_v2  ;;  %v3045_v46 = vrot.slane %v7603_v4, %v7058_v55  ;;  %v2854_v37 = vpop.permute.xlu1 %2853 }
 0x1f1   : > { %v2002_v22 = vsel %vm9008_vm13, %v6890_v14, %v1996_v43  ;;  %vm9009_vm10 = vmmov %vm8984_vm2  ;;  %vm9010_vm2 = vcmask 457728   ;;  %2093 = vmatprep.mubr.f32.mxu0 %v8910_v60  ;;  %v3049_v33 = vrot.slane %v7603_v4, %v7060_v51  ;;  %v3053_v0 = vrot.slane %v7603_v4, %v7063_v2 }
 0x1f2   : > { %v2003_v38 = vsel %vm9009_vm10, %v1996_v43, %v6896_v16  ;;  %v2215_v62 = vsel %vm9010_vm2, %v6902_v18, %v2207_v36  ;;  %v2216_v16 = vsel %vm9010_vm2, %v2207_v36, %v6910_v21  ;;  %v2626_v18 = vrot.slane %v7483_v53, %v7069_v47  ;;  %vm9014_vm13 = vmmov %vm8997_vm4 }
 0x1f3   : > { %v2011_v14 = vsel %vm7444_vm12, %v2003_v38, 0.0  ;;  %v2010_v29 = vsel %vm7451_vm15, %v2002_v22, 0.0  ;;  %v2224_v6 = vsel %vm9013_vm11, %v2216_v16, 0.0  ;;  %6395 = vmatpush1.msk.msra.mxu0 %vm9014_vm13, %v2008_v11  ;;  %vm7619_vm12 = vcmp.eq.s32.totalorder %v2833_v50, 1  ;;  %vm9021_vm2 = vmmov %vm9007_vm5  ;;  %v2639_v35 = vpop.permute.xlu0 %2638 }
 0x1f4   : > { %v2223_v53 = vsel %vm7476_vm3, %v2215_v62, 0.0  ;;  %vm9017_vm10 = vcmask 31744   ;;  %vm7629_vm4 = vcmp.eq.s32.totalorder %v2622_v59, 1  ;;  %6397 = vmatprep.subr.msk.mxu1 %vm9021_vm2, %v2011_v14  ;;  %vm9022_vm11 = vmmov %vm9021_vm2  ;;  %vm9023_vm3 = vcmask 449536   ;;  %v2858_v10 = vpop.permute.xlu1 %2857 }
 0x1f5   : > { %6392 = vmatmul.mubr.msk.f32.vlgmr.msra.gmra.mxu1 %vm9017_vm10, %v6386_v44  ;;  %vm9018_vm15 = vmmov %vm9017_vm10  ;;  %6401 = vmatprep.subr.msk.mxu0 %vm9022_vm11, %v2224_v6  ;;  %v2431_v39 = vsel %vm9023_vm3, %v6931_v27, %v2423_v32  ;;  %vm9025_vm10 = vcmask 457728   ;;  %vm9028_vm2 = vcmp.ge.s32.totalorder %v7026_v56, 1  ;;  %v3057_v17 = vrot.slane %v7603_v4, %v7069_v47  ;;  %v9063_v4 = vld [vmem:[#allocation13_spill] sm:$0xff] }
 0x1f6   : > { %6396 = vmatmul.mubr.msk.f32.vlgmr.msra.gmra.mxu0 %vm9018_vm15, %v6393_v48  ;;  %vm9024_vm13 = vmmov %vm9023_vm3  ;;  %v2217_v28 = vsel %vm9025_vm10, %v6910_v21, %v2211_v34  ;;  %vm7648_vm15 = vcmp.eq.s32.totalorder %v2829_v3, 1  ;;  %v7655_v25 = vsel %vm9028_vm2, 1, %v8855_v57  ;;  %2164 = vmatprep.mubr.f32.mxu1 %v8910_v60  ;;  %vm7704_vm2 = vcmp.eq.s32.totalorder %v3045_v46, 1 }
 0x1f7   : > { %v2432_v54 = vsel %vm9024_vm13, %v2423_v32, %v6908_v20  ;;  %vm9029_vm11 = vmmov %vm9007_vm5  ;;  %vm7663_vm13 = vcmp.eq.s32.totalorder %v2626_v18, 1  ;;  %v2225_v42 = vsel %vm7507_vm1, %v2217_v28, 0.0  ;;  %2308 = vmatprep.mubr.f32.mxu0 %v8910_v60  ;;  %vm7683_vm1 = vcmp.eq.s32.totalorder %v2837_v12, 1  ;;  %v6414_v18 = vld [vmem:[%s8789_s6 + $0x48] sm:$0xff] }
 0x1f8   : > { %v2440_v27 = vsel %vm7545_vm0, %v2432_v54, 0.0  ;;  %6398 = vmatpush1.msk.msra.mxu1 %vm9029_vm11, %v2010_v29  ;;  %vm9030_vm3 = vmmov %vm9025_vm10  ;;  %vm7675_vm10 = vcmp.eq.s32.totalorder %v2841_v8, 1  ;;  %vm9036_vm11 = vcmask 31744   ;;  %v3260_v7 = vrot.slane %v7655_v25, %v7058_v55  ;;  %v3285_v40 = vpop.permute.xlu1 %3284  ;;  %v6435_v54 = vld [vmem:[%s8789_s6 + $0x60] sm:$0xff] }
 0x1f9   : > { %v2218_v21 = vsel %vm9030_vm3, %v2211_v34, %v6920_v24  ;;  %vm9033_vm0 = vmmov %vm9007_vm5  ;;  %v2439_v24 = vsel %vm7535_vm14, %v2431_v39, 0.0  ;;  %6399 = vmatmul.mubr.msk.f32.vlgmr.msra.gmra.mxu1 %vm9036_vm11, %v6393_v48  ;;  %v3264_v44 = vrot.slane %v7655_v25, %v7060_v51  ;;  %v3268_v38 = vrot.slane %v7655_v25, %v7063_v2  ;;  %v9061_v48 = vld [vmem:[#allocation18_spill] sm:$0xff] }
 0x1fa   : > { %v2226_v30 = vsel %vm7511_vm9, %v2218_v21, 0.0  ;;  %6402 = vmatpush1.msk.msra.mxu0 %vm9033_vm0, %v2223_v53  ;;  %vm9037_vm3 = vmmov %vm9036_vm11  ;;  %2379 = vmatprep.mubr.f32.mxu1 %v8910_v60  ;;  %v3272_v62 = vrot.slane %v7655_v25, %v7069_v47  ;;  %v9070_v53 = vld [vmem:[#allocation16_spill] sm:$0xff] }
 0x1fb   : > { %6403 = vmatmul.mubr.msk.f32.vlgmr.msra.gmra.mxu0 %vm9037_vm3, %v6400_v52  ;;  %vm9040_vm9 = vmmov %vm9033_vm0  ;;  %vm9045_vm3 = vcmask 72704  }
 0x1fc   : > { %6404 = vmatprep.subr.msk.mxu1 %vm9040_vm9, %v2226_v30  ;;  %vm9041_vm14 = vmmov %vm9033_vm0  ;;  %vm9042_vm0 = vcmask 449536   ;;  %v2647_v5 = vsel %vm9045_vm3, %v9044_v15, %v2639_v35  ;;  %2524 = vmatprep.mubr.f32.mxu0 %v8910_v60 }
 0x1fd   : > { %6408 = vmatprep.subr.msk.mxu0 %vm9041_vm14, %v2440_v27  ;;  %v2433_v13 = vsel %vm9042_vm0, %v6908_v20, %v2427_v63  ;;  %vm9043_vm11 = vmmov %vm9042_vm0  ;;  %v9049_v20 = vld [vmem:[#allocation14_spill] sm:$0xff]  ;;  %vm7714_vm0 = vcmp.eq.s32.totalorder %v3049_v33, 1  ;;  %v2655_v59 = vsel %vm7596_vm7, %v2647_v5, 0.0  ;;  %vm9062_vm7 = vcmask 64512   ;;  %v9190_v27 = vld [vmem:[#allocation29_spill] sm:$0xff] }
 0x1fe   : > { %v2434_v19 = vsel %vm9043_vm11, %v2427_v63, %v6918_v23  ;;  %vm9048_vm9 = vmmov %vm9007_vm5  ;;  %v2441_v43 = vsel %vm7573_vm8, %v2433_v13, 0.0  ;;  %6409 = vmatpush1.msk.msra.mxu0 %vm9007_vm5, %v2439_v24  ;;  %vm7735_vm5 = vcmp.eq.s32.totalorder %v3264_v44, 1  ;;  %v2862_v1 = vsel %vm9062_vm7, %v9061_v48, %v2854_v37  ;;  %v6421_v24 = vld [vmem:[%s8789_s6 + $0x50] sm:$0xff]  ;;  %v9112_v48 = vld [vmem:[#allocation31_spill] sm:$0xff] }
 0x1ff   : > { %v2442_v50 = vsel %vm7563_vm6, %v2434_v19, 0.0  ;;  %6405 = vmatpush1.msk.msra.mxu1 %vm9048_vm9, %v2225_v42  ;;  %vm9050_vm14 = vmmov %vm9045_vm3  ;;  %vm9053_vm3 = vnez %v9006_v31  ;;  %vm9054_vm6 = vcmp.lt.s32.totalorder %v7026_v56, 7  ;;  %vm9055_vm9 = vcmask 31744   ;;  %v2643_v31 = vpop.permute.xlu0 %2642  ;;  %v9089_v42 = vld [vmem:[#allocation17_spill] sm:$0xff]  ;;  %v9153_v13 = vld [vmem:[#allocation28_spill] sm:$0xff] }
 0x200   : > { %v2648_v23 = vsel %vm9050_vm14, %v2639_v35, %v9049_v20  ;;  %v7729_v3 = vsel %vm9054_vm6, 1, %v8855_v57  ;;  %6406 = vmatmul.mubr.msk.f32.vlgmr.msra.gmra.mxu1 %vm9055_vm9, %v6400_v52  ;;  %vm9056_vm8 = vmmov %vm9055_vm9  ;;  %vm9059_vm14 = vcmask 1043456   ;;  %vm9065_vm9 = vcmask 72704  }
 0x201   : > { %v2656_v36 = vsel %vm9053_vm3, %v2648_v23, 0.0  ;;  %6410 = vmatmul.mubr.msk.f32.vlgmr.msra.gmra.mxu0 %vm9056_vm8, %v6407_v9  ;;  %6411 = vmatprep.subr.msk.mxu1 %vm9059_vm14, %v2442_v50  ;;  %vm9060_vm3 = vmmov %vm9059_vm14  ;;  %v2649_v16 = vsel %vm9065_vm9, %v9049_v20, %v2643_v31  ;;  %vm7754_vm8 = vcmp.eq.s32.totalorder %v3260_v7, 1  ;;  %vm7758_vm14 = vcmp.eq.s32.totalorder %v3053_v0, 1  ;;  %v9091_v7 = vld [vmem:[#allocation20_spill] sm:$0xff] }
 0x202   : > { %6415 = vmatprep.subr.msk.mxu0 %vm9060_vm3, %v2656_v36  ;;  %vm9064_vm6 = vmmov %vm9062_vm7  ;;  %6412 = vmatpush1.msk.msra.mxu1 %vm9060_vm3, %v2441_v43  ;;  %v3475_v34 = vrot.slane %v7729_v3, %v7058_v55  ;;  %v3479_v12 = vrot.slane %v7729_v3, %v7060_v51  ;;  %v2657_v46 = vsel %vm7629_vm4, %v2649_v16, 0.0  ;;  %v2870_v28 = vsel %vm7648_vm15, %v2862_v1, 0.0  ;;  %v9106_v43 = vld [vmem:[#allocation19_spill] sm:$0xff] }
 0x203   : > { %v2863_v14 = vsel %vm9064_vm6, %v2854_v37, %v9063_v4  ;;  %2595 = vmatprep.mubr.f32.mxu1 %v8910_v60  ;;  %vm9071_vm7 = vmmov %vm9065_vm9  ;;  %vm9072_vm6 = vcmp.ge.s32.totalorder %v7026_v56, 1  ;;  %vm9073_vm9 = vcmp.lt.s32.totalorder %v7013_v58, 7  ;;  %2740 = vmatprep.mubr.f32.mxu0 %v8910_v60  ;;  %v3070_v52 = vpop.permute.xlu0 %3069  ;;  %vm7794_vm4 = vcmp.eq.s32.totalorder %v3268_v38, 1 }
 0x204   : > { %v2871_v8 = vsel %vm7619_vm12, %v2863_v14, 0.0  ;;  %v2650_v32 = vsel %vm9071_vm7, %v2643_v31, %v9070_v53  ;;  %vm7776_vm11 = vmand %vm9073_vm9, %vm9072_vm6  ;;  %vm9079_vm6 = vcmask 31744   ;;  %v3483_v21 = vrot.slane %v7729_v3, %v7063_v2  ;;  %v9110_v31 = vld [vmem:[#allocation22_spill] sm:$0xff] }
 0x205   : > { %v2658_v39 = vsel %vm7663_vm13, %v2650_v32, 0.0  ;;  %vm9076_vm12 = vmmov %vm9060_vm3  ;;  %vm7786_vm3 = vcmp.eq.s32.totalorder %v3057_v17, 1  ;;  %6413 = vmatmul.mubr.msk.f32.vlgmr.msra.gmra.mxu1 %vm9079_vm6, %v6407_v9  ;;  %vm7798_vm13 = vcmp.eq.s32.totalorder %v3272_v62, 1  ;;  %vm9090_vm7 = vcmask 56320  }
 0x206   : > { %6416 = vmatpush1.msk.msra.mxu0 %vm9076_vm12, %v2655_v59  ;;  %vm9080_vm9 = vmmov %vm9079_vm6  ;;  %6418 = vmatprep.subr.msk.mxu1 %vm9076_vm12, %v2658_v39  ;;  %vm9086_vm6 = vcmask 64512   ;;  %v3078_v30 = vsel %vm9090_vm7, %v9089_v42, %v3070_v52  ;;  %v7818_v63 = vsel %vm7776_vm11, 1, %v8855_v57  ;;  %v3487_v15 = vrot.slane %v7729_v3, %v7069_v47  ;;  %v6428_v3 = vld [vmem:[%s8789_s6 + $0x58] sm:$0xff] }
 0x207   : > { %6417 = vmatmul.mubr.msk.f32.vlgmr.msra.gmra.mxu0 %vm9080_vm9, %v6414_v18  ;;  %vm9085_vm15 = vmmov %vm9076_vm12  ;;  %v2864_v45 = vsel %vm9086_vm6, %v9063_v4, %v2858_v10  ;;  %6419 = vmatpush1.msk.msra.mxu1 %vm9076_vm12, %v2657_v46  ;;  %v3086_v5 = vsel %vm7704_vm2, %v3078_v30, 0.0  ;;  %v3074_v9 = vpop.permute.xlu0 %3073  ;;  %v3691_v50 = vrot.slane %v7818_v63, %v7058_v55  ;;  %v3695_v20 = vrot.slane %v7818_v63, %v7060_v51  ;;  %v9128_v46 = vld [vmem:[#allocation23_spill] sm:$0xff] }
 0x208   : > { %6422 = vmatprep.subr.msk.mxu0 %vm9085_vm15, %v2871_v8  ;;  %vm9088_vm9 = vmmov %vm9086_vm6  ;;  %2811 = vmatprep.mubr.f32.mxu1 %v8910_v60  ;;  %vm7830_vm6 = vcmp.eq.s32.totalorder %v3479_v12, 1  ;;  %v2872_v19 = vsel %vm7683_vm1, %v2864_v45, 0.0  ;;  %vm7850_vm1 = vcmp.eq.s32.totalorder %v3483_v21, 1  ;;  %vm9105_vm2 = vcmask 7168   ;;  %v9126_v12 = vld [vmem:[#allocation21_spill] sm:$0xff]  ;;  %v9136_v21 = vld [vmem:[#allocation26_spill] sm:$0xff] }
 0x209   : > { %v2865_v33 = vsel %vm9088_vm9, %v2858_v10, %v9087_v41  ;;  %vm9092_vm15 = vmmov %vm9090_vm7  ;;  %vm7826_vm7 = vcmp.eq.s32.totalorder %v3475_v34, 1  ;;  %2955 = vmatprep.mubr.f32.mxu0 %v8910_v60  ;;  %vm9098_vm9 = vcmask 31744   ;;  %v3293_v11 = vsel %vm9105_vm2, %v9104_v49, %v3285_v40 }
 0x20a   : > { %v2873_v35 = vsel %vm7675_vm10, %v2865_v33, 0.0  ;;  %v3079_v44 = vsel %vm9092_vm15, %v3070_v52, %v9091_v7  ;;  %vm9097_vm10 = vmmov %vm9076_vm12  ;;  %6420 = vmatmul.mubr.msk.f32.vlgmr.msra.gmra.mxu1 %vm9098_vm9, %v6414_v18  ;;  %v3699_v62 = vrot.slane %v7818_v63, %v7063_v2  ;;  %v3703_v14 = vrot.slane %v7818_v63, %v7069_v47  ;;  %v3289_v18 = vpop.permute.xlu1 %3288 }
 0x20b   : > { %v3087_v61 = vsel %vm7714_vm0, %v3079_v44, 0.0  ;;  %6423 = vmatpush1.msk.msra.mxu0 %vm9097_vm10, %v2870_v28  ;;  %vm9099_vm12 = vmmov %vm9098_vm9  ;;  %vm9108_vm9 = vcmask 56320   ;;  %3026 = vmatprep.mubr.f32.mxu1 %v8910_v60  ;;  %v3301_v16 = vsel %vm7754_vm8, %v3293_v11, 0.0  ;;  %v3500_v6 = vpop.permute.xlu0 %3499  ;;  %vm9121_vm8 = vcmp.lt.s32.totalorder %v7013_v58, 7 }
 0x20c   : > { %6424 = vmatmul.mubr.msk.f32.vlgmr.msra.gmra.mxu0 %vm9099_vm12, %v6421_v24  ;;  %vm9102_vm0 = vmmov %vm9097_vm10  ;;  %v3080_v17 = vsel %vm9108_vm9, %v9091_v7, %v3074_v9  ;;  %vm9109_vm12 = vcmp.lt.s32.totalorder %v7013_v58, 7  ;;  %vm9129_vm11 = vcmask 1039360  }
 0x20d   : > { %6425 = vmatprep.subr.msk.mxu1 %vm9102_vm0, %v2873_v35  ;;  %vm9103_vm15 = vmmov %vm9102_vm0  ;;  %v7868_v59 = vsel %vm9109_vm12, 1, %v8855_v57  ;;  %v3088_v1 = vsel %vm7758_vm14, %v3080_v17, 0.0  ;;  %3171 = vmatprep.mubr.f32.mxu0 %v8910_v60  ;;  %vm9120_vm12 = vcmp.lt.s32.totalorder %v7026_v56, 7  ;;  %v3508_v39 = vsel %vm9129_vm11, %v9128_v46, %v3500_v6 }
 0x20e   : > { %6429 = vmatprep.subr.msk.mxu0 %vm9103_vm15, %v3087_v61  ;;  %vm9107_vm10 = vmmov %vm9105_vm2  ;;  %6426 = vmatpush1.msk.msra.mxu1 %vm9102_vm0, %v2872_v19  ;;  %vm8817_vm2 = vcmp.lt.s32.totalorder %v9112_v48, 7  ;;  %v3906_v53 = vrot.slane %v7868_v59, %v7058_v55  ;;  %v3910_v32 = vrot.slane %v7868_v59, %v7060_v51  ;;  %v3516_v25 = vsel %vm7826_vm7, %v3508_v39, 0.0  ;;  %v9155_v61 = vld [vmem:[#allocation25_spill] sm:$0xff] }
 0x20f   : > { %v3294_v36 = vsel %vm9107_vm10, %v3285_v40, %v9106_v43  ;;  %vm9111_vm15 = vmmov %vm9108_vm9  ;;  %vm9116_vm9 = vcmask 31744   ;;  %v3504_v63 = vpop.permute.xlu0 %3503  ;;  %v3914_v44 = vrot.slane %v7868_v59, %v7063_v2  ;;  %v6442_v40 = vld [vmem:[%s8789_s6 + $0x70] sm:$0xff]  ;;  %v3918_v11 = vrot.slane %v7868_v59, %v7069_v47 }
 0x210   : > { %v3302_v37 = vsel %vm7735_vm5, %v3294_v36, 0.0  ;;  %v3081_v38 = vsel %vm9111_vm15, %v3074_v9, %v9110_v31  ;;  %vm9113_vm10 = vmmov %vm9102_vm0  ;;  %vm7885_vm5 = vcmp.eq.s32.totalorder %v3487_v15, 1  ;;  %6427 = vmatmul.mubr.msk.f32.vlgmr.msra.gmra.mxu1 %vm9116_vm9, %v6421_v24  ;;  %v3716_v24 = vpop.permute.xlu1 %3715 }
 0x211   : > { %v3089_v4 = vsel %vm7786_vm3, %v3081_v38, 0.0  ;;  %6430 = vmatpush1.msk.msra.mxu0 %vm9113_vm10, %v3086_v5  ;;  %vm9117_vm14 = vmmov %vm9116_vm9  ;;  %vm7895_vm3 = vcmp.eq.s32.totalorder %v3691_v50, 1  ;;  %vm9125_vm9 = vcmask 7168   ;;  %3242 = vmatprep.mubr.f32.mxu1 %v8910_v60  ;;  %v9159_v50 = vld [vmem:[#allocation3_spill] sm:$0xff] }
 0x212   : > { %6431 = vmatmul.mubr.msk.f32.vlgmr.msra.gmra.mxu0 %vm9117_vm14, %v6428_v3  ;;  %vm7907_vm0 = vmand %vm9121_vm8, %vm9120_vm12  ;;  %6436 = vmatprep.subr.msk.mxu0 %vm9113_vm10, %v3302_v37  ;;  %v3295_v34 = vsel %vm9125_vm9, %v9106_v43, %v3289_v18  ;;  %vm7922_vm12 = vcmp.eq.s32.totalorder %v3695_v20, 1  ;;  %vm9132_vm8 = vcmp.ge.s32.totalorder %v7013_v58, 1 }
 0x213   : > { %vm9124_vm15 = vmmov %vm9113_vm10  ;;  %v3303_v33 = vsel %vm7794_vm4, %v3295_v34, 0.0  ;;  %3386 = vmatprep.mubr.f32.mxu0 %v8910_v60  ;;  %v7957_v30 = vsel %vm7907_vm0, 1, %v8855_v57  ;;  %vm9143_vm4 = vcmask 31744   ;;  %vm9149_vm0 = vcmp.ge.s32.totalorder %v7026_v56, 1  ;;  %v3931_v37 = vpop.permute.xlu0 %3930 }
 0x214   : > { %6432 = vmatprep.subr.msk.mxu1 %vm9124_vm15, %v3089_v4  ;;  %vm9127_vm14 = vmmov %vm9125_vm9  ;;  %vm7940_vm9 = vcmp.eq.s32.totalorder %v3699_v62, 1  ;;  %v4122_v49 = vrot.slane %v7957_v30, %v7058_v55  ;;  %v4126_v17 = vrot.slane %v7957_v30, %v7060_v51  ;;  %v3720_v23 = vpop.permute.xlu1 %3719  ;;  %v4130_v38 = vrot.slane %v7957_v30, %v7063_v2  ;;  %v9169_v4 = vld [vmem:[#allocation5_spill] sm:$0xff] }
 0x215   : > { %v3296_v26 = vsel %vm9127_vm14, %v3289_v18, %v9126_v12  ;;  %vm7930_vm15 = vmand %vm8817_vm2, %vm9132_vm8  ;;  %vm9157_vm14 = vcmask 1039360   ;;  %v4134_v62 = vrot.slane %v7957_v30, %v7069_v47  ;;  %v6449_v18 = vld [vmem:[%s8789_s6 + $0x78] sm:$0xff] }
 0x216   : > { %v3304_v52 = vsel %vm7798_vm13, %v3296_v26, 0.0  ;;  %vm9135_vm11 = vmmov %vm9113_vm10  ;;  %vm9137_vm10 = vcmask 1039360   ;;  %vm7950_vm13 = vcmp.eq.s32.totalorder %v3703_v14, 1  ;;  %v3510_v5 = vsel %vm9157_vm14, %v9136_v21, %v3504_v63  ;;  %v9171_v14 = vld [vmem:[#allocation27_spill] sm:$0xff] }
 0x217   : > { %6433 = vmatpush1.msk.msra.mxu1 %vm9135_vm11, %v3088_v1  ;;  %v3509_v45 = vsel %vm9137_vm10, %v3500_v6, %v9136_v21  ;;  %vm9140_vm8 = vmmov %vm9135_vm11  ;;  %vm7967_vm10 = vcmp.eq.s32.totalorder %v3910_v32, 1  ;;  %v3518_v43 = vsel %vm7850_vm1, %v3510_v5, 0.0  ;;  %v8041_v6 = vsel %vm7930_vm15, 1, %v8855_v57  ;;  %v3935_v21 = vpop.permute.xlu0 %3934 }
 0x218   : > { %v3517_v42 = vsel %vm7830_vm6, %v3509_v45, 0.0  ;;  %6437 = vmatpush1.msk.msra.mxu0 %vm9140_vm8, %v3301_v16  ;;  %6434 = vmatmul.mubr.msk.f32.vlgmr.msra.gmra.mxu1 %vm9143_vm4, %v6428_v3  ;;  %vm9144_vm11 = vmmov %vm9143_vm4  ;;  %vm7963_vm6 = vcmp.eq.s32.totalorder %v3906_v53, 1  ;;  %v9174_v53 = vld [vmem:[#allocation30_spill] sm:$0xff]  ;;  %v4553_v41 = vrot.slane %v8041_v6, %v7058_v55  ;;  %v4557_v10 = vrot.slane %v8041_v6, %v7060_v51 }
 0x219   : > { %6438 = vmatmul.mubr.msk.f32.vlgmr.msra.gmra.mxu0 %vm9144_vm11, %v6435_v54  ;;  %vm7977_vm7 = vmand %vm7930_vm15, %vm9149_vm0  ;;  %6439 = vmatprep.subr.msk.mxu1 %vm9140_vm8, %v3304_v52  ;;  %vm9154_vm11 = vcmask 990208   ;;  %vm4154_vm0 = vcmask 973824   ;;  %v4147_v52 = vpop.permute.xlu1 %4146 }
 0x21a   : > { %vm9152_vm4 = vmmov %vm9140_vm8  ;;  %v3724_v19 = vsel %vm9154_vm11, %v9153_v13, %v3716_v24  ;;  %3457 = vmatprep.mubr.f32.mxu1 %v8910_v60  ;;  %3601 = vmatprep.mubr.f32.mxu0 %v8910_v60  ;;  %v8013_v3 = vsel %vm7977_vm7, 1, %v8855_v57  ;;  %v4156_v30 = vsel %vm4154_vm0, %v4147_v52, %v9190_v27 }
 0x21b   : > { %6443 = vmatprep.subr.msk.mxu0 %vm9152_vm4, %v3517_v42  ;;  %vm9156_vm2 = vmmov %vm9154_vm11  ;;  %v3732_v59 = vsel %vm7895_vm3, %v3724_v19, 0.0  ;;  %v4339_v34 = vrot.slane %v8013_v3, %v7058_v55  ;;  %v4343_v39 = vrot.slane %v8013_v3, %v7060_v51  ;;  %v4347_v5 = vrot.slane %v8013_v3, %v7063_v2 }
 0x21c   : > { %v3725_v15 = vsel %vm9156_vm2, %v3716_v24, %v9155_v61  ;;  %vm9158_vm8 = vmmov %vm9152_vm4  ;;  %v6456_v24 = vld [vmem:[%s8789_s6 + $0x80] sm:$0xff] }
 0x21d   : > { %v3733_v9 = vsel %vm7922_vm12, %v3725_v15, 0.0  ;;  %6440 = vmatpush1.msk.msra.mxu1 %vm9158_vm8, %v3303_v33  ;;  %vm9160_vm4 = vmmov %vm9157_vm14  ;;  %vm9162_vm12 = vcmask 31744   ;;  %v9189_v33 = vld [vmem:[#allocation33_spill] sm:$0xff] }
 0x21e   : > { %v3511_v20 = vsel %vm9160_vm4, %v3504_v63, %v9159_v50  ;;  %vm9161_vm2 = vmmov %vm9158_vm8  ;;  %6441 = vmatmul.mubr.msk.f32.vlgmr.msra.gmra.mxu1 %vm9162_vm12, %v6435_v54  ;;  %vm9172_vm8 = vcmask 982016   ;;  %v4155_v42 = vsel %vm4154_vm0, %v9189_v33, %v4147_v52  ;;  %v4364_v50 = vpop.permute.xlu0 %4363  ;;  %v6470_v52 = vld [vmem:[%s8789_s6 + $0x90] sm:$0xff] }
 0x21f   : > { %v3519_v36 = vsel %vm7885_vm5, %v3511_v20, 0.0  ;;  %6444 = vmatpush1.msk.msra.mxu0 %vm9161_vm2, %v3516_v25  ;;  %vm9163_vm1 = vmmov %vm9162_vm12  ;;  %vm8019_vm5 = vcmp.eq.s32.totalorder %v3914_v44, 1  ;;  %v3939_v16 = vsel %vm9172_vm8, %v9171_v14, %v3931_v37  ;;  %3672 = vmatprep.mubr.f32.mxu1 %v8910_v60  ;;  %vm8049_vm12 = vcmp.eq.s32.totalorder %v3918_v11, 1  ;;  %v9198_v44 = vld [vmem:[#allocation4_spill] sm:$0xff] }
 0x220   : > { %6445 = vmatmul.mubr.msk.f32.vlgmr.msra.gmra.mxu0 %vm9163_vm1, %v6442_v40  ;;  %vm9166_vm14 = vmmov %vm9161_vm2  ;;  %vm8061_vm1 = vcmp.eq.s32.totalorder %v4126_v17, 1  ;;  %v3947_v54 = vsel %vm7963_vm6, %v3939_v16, 0.0  ;;  %v4351_v20 = vrot.slane %v8013_v3, %v7069_v47 }
 0x221   : > { %6446 = vmatprep.subr.msk.mxu1 %vm9166_vm14, %v3519_v36  ;;  %vm9167_vm7 = vmmov %vm9161_vm2  ;;  %3817 = vmatprep.mubr.f32.mxu0 %v8910_v60  ;;  %vm9181_vm14 = vcmask 31744   ;;  %v4164_v7 = vsel %vm8061_vm1, %v4156_v30, 0.0  ;;  %vm8122_vm1 = vcmp.eq.s32.totalorder %v4343_v39, 1  ;;  %v9209_v36 = vld [vmem:[#allocation7_spill] sm:$0xff]  ;;  %v9233_v39 = vld [vmem:[#allocation34_spill] sm:$0xff] }
 0x222   : > { %6450 = vmatprep.subr.msk.mxu0 %vm9167_vm7, %v3733_v9  ;;  %vm9168_vm3 = vmmov %vm9154_vm11  ;;  %vm8071_vm7 = vcmp.eq.s32.totalorder %v4122_v49, 1  ;;  %v4151_v9 = vpop.permute.xlu1 %4150  ;;  %v4561_v49 = vrot.slane %v8041_v6, %v7063_v2  ;;  %v4368_v29 = vpop.permute.xlu0 %4367 }
 0x223   : > { %v3726_v1 = vsel %vm9168_vm3, %v9155_v61, %v3720_v23  ;;  %vm9170_vm11 = vmmov %vm9168_vm3  ;;  %v4158_v17 = vsel %vm4154_vm0, %v4151_v9, %v9209_v36 }
 0x224   : > { %v3727_v22 = vsel %vm9170_vm11, %v3720_v23, %v9169_v4  ;;  %vm9173_vm4 = vmmov %vm9161_vm2  ;;  %v3734_v12 = vsel %vm7940_vm9, %v3726_v1, 0.0  ;;  %v6463_v23 = vld [vmem:[%s8789_s6 + $0x88] sm:$0xff] }
 0x225   : > { %v3735_v8 = vsel %vm7950_vm13, %v3727_v22, 0.0  ;;  %6447 = vmatpush1.msk.msra.mxu1 %vm9173_vm4, %v3518_v43  ;;  %vm9175_vm2 = vmmov %vm9172_vm8  ;;  %vm8092_vm8 = vcmp.eq.s32.totalorder %v4134_v62, 1  ;;  %v4157_v43 = vsel %vm4154_vm0, %v9190_v27, %v4151_v9  ;;  %v9219_v62 = vld [vmem:[#allocation35_spill] sm:$0xff]  ;;  %v4565_v22 = vrot.slane %v8041_v6, %v7069_v47 }
 0x226   : > { %v3940_v32 = vsel %vm9175_vm2, %v3931_v37, %v9174_v53  ;;  %vm9178_vm13 = vmmov %vm9173_vm4  ;;  %6448 = vmatmul.mubr.msk.f32.vlgmr.msra.gmra.mxu1 %vm9181_vm14, %v6442_v40  ;;  %v4163_v40 = vsel %vm8071_vm7, %v4155_v42, 0.0  ;;  %v6477_v9 = vld [vmem:[%s8789_s6 + $0x98] sm:$0xff] }
 0x227   : > { %v3948_v26 = vsel %vm7967_vm10, %v3940_v32, 0.0  ;;  %6451 = vmatpush1.msk.msra.mxu0 %vm9178_vm13, %v3732_v59  ;;  %vm9182_vm9 = vmmov %vm9181_vm14  ;;  %vm8075_vm10 = vcmp.eq.s32.totalorder %v4130_v38, 1  ;;  %3888 = vmatprep.mubr.f32.mxu1 %v8910_v60  ;;  %v9210_v59 = vld [vmem:[#allocation32_spill] sm:$0xff]  ;;  %v4166_v38 = vsel %vm8092_vm8, %v4158_v17, 0.0 }
 0x228   : > { %6452 = vmatmul.mubr.msk.f32.vlgmr.msra.gmra.mxu0 %vm9182_vm9, %v6449_v18  ;;  %vm9187_vm3 = vmmov %vm9173_vm4  ;;  %vm9194_vm4 = vcmp.lt.s32.totalorder %v7026_v56, 7  ;;  %vm8110_vm9 = vcmp.eq.s32.totalorder %v4339_v34, 1  ;;  %v4165_v14 = vsel %vm8075_vm10, %v4157_v43, 0.0 }
 0x229   : > { %6453 = vmatprep.subr.msk.mxu1 %vm9187_vm3, %v3735_v8  ;;  %vm9188_vm6 = vmmov %vm9187_vm3  ;;  %4032 = vmatprep.mubr.f32.mxu0 %v8910_v60 }
 0x22a   : > { %6457 = vmatprep.subr.msk.mxu0 %vm9188_vm6, %v3948_v26  ;;  %vm9191_vm11 = vmmov %vm9175_vm2  ;;  %v9231_v26 = vld [vmem:[#allocation37_spill] sm:$0xff] }
 0x22b   : > { %v3941_v25 = vsel %vm9191_vm11, %v9174_v53, %v3935_v21  ;;  %vm8100_vm2 = vmand %vm7930_vm15, %vm9194_vm4  ;;  %vm9214_vm4 = vcmp.ge.s32.totalorder %v7026_v56, 1  ;;  %v4578_v53 = vpop.permute.xlu1 %4577 }
 0x22c   : > { %vm9197_vm13 = vmmov %vm9187_vm3  ;;  %v3949_v19 = vsel %vm8019_vm5, %v3941_v25, 0.0  ;;  %v8139_v11 = vsel %vm8100_vm2, 1, %v8855_v57  ;;  %vm9215_vm2 = vcmp.lt.s32.totalorder %v9112_v48, 7 }
 0x22d   : > { %6454 = vmatpush1.msk.msra.mxu1 %vm9197_vm13, %v3734_v12  ;;  %vm9199_vm14 = vmmov %vm9191_vm11  ;;  %vm8152_vm11 = vcmp.eq.s32.totalorder %v4553_v41, 1  ;;  %v4768_v8 = vrot.slane %v8139_v11, %v7058_v55  ;;  %v4772_v34 = vrot.slane %v8139_v11, %v7060_v51  ;;  %v9239_v41 = vld [vmem:[#allocation6_spill] sm:$0xff]  ;;  %v4776_v27 = vrot.slane %v8139_v11, %v7063_v2 }
 0x22e   : > { %v3942_v0 = vsel %vm9199_vm14, %v3935_v21, %v9198_v44  ;;  %vm9202_vm15 = vmmov %vm9187_vm3  ;;  %vm9205_vm3 = vcmask 31744  }
 0x22f   : > { %v3950_v61 = vsel %vm8049_vm12, %v3942_v0, 0.0  ;;  %6458 = vmatpush1.msk.msra.mxu0 %vm9202_vm15, %v3947_v54  ;;  %6455 = vmatmul.mubr.msk.f32.vlgmr.msra.gmra.mxu1 %vm9205_vm3, %v6449_v18  ;;  %vm9206_vm5 = vmmov %vm9205_vm3  ;;  %vm8170_vm15 = vcmp.eq.s32.totalorder %v4557_v10, 1  ;;  %vm8182_vm3 = vcmp.eq.s32.totalorder %v4347_v5, 1  ;;  %v4793_v0 = vpop.permute.xlu0 %4792  ;;  %v4780_v10 = vrot.slane %v8139_v11, %v7069_v47  ;;  %v9254_v5 = vld [vmem:[#allocation36_spill] sm:$0xff]  ;;  %v9274_v18 = vld [vmem:[#allocation38_spill] sm:$0xff] }
 0x230   : > { %6459 = vmatmul.mubr.msk.f32.vlgmr.msra.gmra.mxu0 %vm9206_vm5, %v6456_v24  ;;  %vm9207_vm12 = vmmov %vm9188_vm6  ;;  %4103 = vmatprep.mubr.f32.mxu1 %v8910_v60 }
 0x231   : > { %6460 = vmatprep.subr.msk.mxu1 %vm9207_vm12, %v3950_v61  ;;  %vm9208_vm7 = vmmov %vm9188_vm6  ;;  %vm9211_vm6 = vcmask 596992   ;;  %4248 = vmatprep.mubr.f32.mxu0 %v8910_v60  ;;  %v9252_v61 = vld [vmem:[#allocation9_spill] sm:$0xff] }
 0x232   : > { %6464 = vmatprep.subr.msk.mxu0 %vm9208_vm7, %v4164_v7  ;;  %v4371_v3 = vsel %vm9211_vm6, %v9210_v59, %v4364_v50  ;;  %vm8160_vm13 = vmand %vm9215_vm2, %vm9214_vm4  ;;  %vm8214_vm2 = vcmp.eq.s32.totalorder %v4561_v49, 1  ;;  %v4582_v7 = vpop.permute.xlu1 %4581  ;;  %v9258_v49 = vld [vmem:[#allocation39_spill] sm:$0xff] }
 0x233   : > { %vm9218_vm0 = vmmov %vm9208_vm7  ;;  %v4379_v6 = vsel %vm8110_vm9, %v4371_v3, 0.0  ;;  %v8201_v12 = vsel %vm8160_vm13, 1, %v8855_v57  ;;  %vm9232_vm7 = vcmask 588800  }
 0x234   : > { %6461 = vmatpush1.msk.msra.mxu1 %vm9218_vm0, %v3949_v19  ;;  %vm9220_vm14 = vmmov %vm9211_vm6  ;;  %v4585_v46 = vsel %vm9232_vm7, %v9231_v26, %v4578_v53  ;;  %v4987_v63 = vrot.slane %v8201_v12, %v7060_v51  ;;  %v4983_v13 = vrot.slane %v8201_v12, %v7058_v55  ;;  %v4991_v36 = vrot.slane %v8201_v12, %v7063_v2 }
 0x235   : > { %v4372_v1 = vsel %vm9220_vm14, %v4364_v50, %v9219_v62  ;;  %vm9223_vm8 = vmmov %vm9218_vm0  ;;  %6462 = vmatmul.mubr.msk.f32.vlgmr.msra.gmra.mxu1 %vm9206_vm5, %v6456_v24  ;;  %v4593_v35 = vsel %vm8152_vm11, %v4585_v46, 0.0 }
 0x236   : > { %v4380_v16 = vsel %vm8122_vm1, %v4372_v1, 0.0  ;;  %6465 = vmatpush1.msk.msra.mxu0 %vm9223_vm8, %v4163_v40  ;;  %vm9226_vm10 = vmmov %vm9206_vm5  ;;  %vm8192_vm1 = vcmp.eq.s32.totalorder %v4351_v20, 1  ;;  %4319 = vmatprep.mubr.f32.mxu1 %v8910_v60  ;;  %v5008_v31 = vpop.permute.xlu1 %5007 }
 0x237   : > { %6466 = vmatmul.mubr.msk.f32.vlgmr.msra.gmra.mxu0 %vm9226_vm10, %v6463_v23  ;;  %vm9229_vm12 = vmmov %vm9218_vm0  ;;  %vm8246_vm10 = vcmp.eq.s32.totalorder %v4772_v34, 1  ;;  %v9281_v34 = vld [vmem:[#allocation8_spill] sm:$0xff] }
 0x238   : > { %6467 = vmatprep.subr.msk.mxu1 %vm9229_vm12, %v4166_v38  ;;  %vm9230_vm9 = vmmov %vm9218_vm0  ;;  %4464 = vmatprep.mubr.f32.mxu0 %v8910_v60 }
 0x239   : > { %6471 = vmatprep.subr.msk.mxu0 %vm9230_vm9, %v4380_v16  ;;  %vm9234_vm6 = vmmov %vm9232_vm7  ;;  %vm9255_vm7 = vcmask 580608  }
 0x23a   : > { %v4586_v54 = vsel %vm9234_vm6, %v4578_v53, %v9233_v39  ;;  %vm9235_vm4 = vmmov %vm9220_vm14  ;;  %vm8224_vm14 = vcmp.eq.s32.totalorder %v4565_v22, 1  ;;  %v4800_v40 = vsel %vm9255_vm7, %v9254_v5, %v4793_v0  ;;  %v6484_v53 = vld [vmem:[%s8789_s6 + $0xa0] sm:$0xff]  ;;  %v5012_v21 = vpop.permute.xlu1 %5011 }
 0x23b   : > { %v4373_v28 = vsel %vm9235_vm4, %v9219_v62, %v4368_v29  ;;  %v4594_v45 = vsel %vm8170_vm15, %v4586_v54, 0.0  ;;  %vm9238_vm13 = vmmov %vm9218_vm0  ;;  %v4797_v62 = vpop.permute.xlu0 %4796 }
 0x23c   : > { %6468 = vmatpush1.msk.msra.mxu1 %vm9238_vm13, %v4165_v14  ;;  %vm9240_vm0 = vmmov %vm9235_vm4  ;;  %v4381_v30 = vsel %vm8182_vm3, %v4373_v28, 0.0  ;;  %v9272_v14 = vld [vmem:[#allocation41_spill] sm:$0xff] }
 0x23d   : > { %v4374_v33 = vsel %vm9240_vm0, %v4368_v29, %v9239_v41  ;;  %vm9243_vm15 = vmmov %vm9223_vm8  ;;  %vm8236_vm8 = vcmp.eq.s32.totalorder %v4768_v8, 1  ;;  %6469 = vmatmul.mubr.msk.f32.vlgmr.msra.gmra.mxu1 %vm9206_vm5, %v6463_v23  ;;  %vm8276_vm0 = vcmp.eq.s32.totalorder %v4776_v27, 1  ;;  %v4995_v23 = vrot.slane %v8201_v12, %v7069_v47 }
 0x23e   : > { %v4382_v25 = vsel %vm8192_vm1, %v4374_v33, 0.0  ;;  %6472 = vmatpush1.msk.msra.mxu0 %vm9243_vm15, %v4379_v6  ;;  %vm9246_vm3 = vmmov %vm9206_vm5  ;;  %4535 = vmatprep.mubr.f32.mxu1 %v8910_v60  ;;  %vm8288_vm15 = vcmp.eq.s32.totalorder %v4987_v63, 1  ;;  %v4808_v37 = vsel %vm8236_vm8, %v4800_v40, 0.0  ;;  %vm8308_vm8 = vcmp.eq.s32.totalorder %v4983_v13, 1  ;;  %v9297_v63 = vld [vmem:[#allocation40_spill] sm:$0xff]  ;;  %v5437_v5 = vpop.permute.xlu1 %5436 }
 0x23f   : > { %6473 = vmatmul.mubr.msk.f32.vlgmr.msra.gmra.mxu0 %vm9246_vm3, %v6470_v52  ;;  %vm9249_vm1 = vmmov %vm9230_vm9  ;;  %v5222_v41 = vpop.permute.xlu0 %5221 }
 0x240   : > { %6474 = vmatprep.subr.msk.mxu1 %vm9249_vm1, %v4382_v25  ;;  %vm9250_vm12 = vmmov %vm9249_vm1  ;;  %4678 = vmatprep.mubr.f32.mxu0 %v8910_v60 }
 0x241   : > { %6478 = vmatprep.subr.msk.mxu0 %vm9250_vm12, %v4594_v45  ;;  %vm9251_vm11 = vmmov %vm9234_vm6  ;;  %vm9273_vm12 = vcmask 531456  }
 0x242   : > { %v4587_v19 = vsel %vm9251_vm11, %v9233_v39, %v4582_v7  ;;  %vm9253_vm9 = vmmov %vm9234_vm6  ;;  %vm9256_vm6 = vcmp.lt.s32.totalorder %v9112_v48, 7  ;;  %v5015_v16 = vsel %vm9273_vm12, %v9272_v14, %v5008_v31 }
 0x243   : > { %v4588_v15 = vsel %vm9253_vm9, %v4582_v7, %v9252_v61  ;;  %v8268_v50 = vsel %vm9256_vm6, 1, %v8855_v57  ;;  %vm9257_vm4 = vmmov %vm9249_vm1  ;;  %v4595_v17 = vsel %vm8214_vm2, %v4587_v19, 0.0  ;;  %v6491_v7 = vld [vmem:[%s8789_s6 + $0xa8] sm:$0xff] }
 0x244   : > { %v4596_v20 = vsel %vm8224_vm14, %v4588_v15, 0.0  ;;  %6475 = vmatpush1.msk.msra.mxu1 %vm9257_vm4, %v4381_v30  ;;  %vm9259_vm13 = vmmov %vm9255_vm7  ;;  %v5197_v1 = vrot.slane %v8268_v50, %v7058_v55  ;;  %v5201_v4 = vrot.slane %v8268_v50, %v7060_v51  ;;  %v5209_v28 = vrot.slane %v8268_v50, %v7069_v47  ;;  %v9294_v30 = vld [vmem:[#allocation11_spill] sm:$0xff] }
 0x245   : > { %v4801_v11 = vsel %vm9259_vm13, %v4793_v0, %v9258_v49  ;;  %vm9262_vm14 = vmmov %vm9249_vm1  ;;  %v5205_v33 = vrot.slane %v8268_v50, %v7063_v2  ;;  %v9300_v0 = vld [vmem:[#allocation42_spill] sm:$0xff] }
 0x246   : > { %v4809_v59 = vsel %vm8246_vm10, %v4801_v11, 0.0  ;;  %6479 = vmatpush1.msk.msra.mxu0 %vm9262_vm14, %v4593_v35  ;;  %vm9265_vm5 = vmmov %vm9246_vm3  ;;  %v6498_v11 = vld [vmem:[%s8789_s6 + $0xb0] sm:$0xff] }
 0x247   : > { %6476 = vmatmul.mubr.msk.f32.vlgmr.msra.gmra.mxu1 %vm9265_vm5, %v6470_v52  ;;  %vm9266_vm2 = vmmov %vm9246_vm3  ;;  %vm8298_vm3 = vcmp.eq.s32.totalorder %v4780_v10, 1  ;;  %6485 = vmatprep.subr.msk.mxu0 %vm9249_vm1, %v4809_v59  ;;  %vm8335_vm5 = vcmp.eq.s32.totalorder %v4991_v36, 1  ;;  %v5023_v52 = vsel %vm8308_vm8, %v5015_v16, 0.0 }
 0x248   : > { %6480 = vmatmul.mubr.msk.f32.vlgmr.msra.gmra.mxu0 %vm9266_vm2, %v6477_v9  ;;  %vm9269_vm10 = vmmov %vm9249_vm1  ;;  %4749 = vmatprep.mubr.f32.mxu1 %v8910_v60 }
 0x249   : > { %6481 = vmatprep.subr.msk.mxu1 %vm9269_vm10, %v4596_v20  ;;  %vm9275_vm11 = vmmov %vm9273_vm12  ;;  %4893 = vmatprep.mubr.f32.mxu0 %v8910_v60  ;;  %vm9288_vm10 = vcmask 31744   ;;  %v9315_v20 = vld [vmem:[#allocation10_spill] sm:$0xff] }
 0x24a   : > { %v5016_v8 = vsel %vm9275_vm11, %v5008_v31, %v9274_v18  ;;  %vm9276_vm9 = vmmov %vm9255_vm7  ;;  %vm9277_vm7 = vcmp.lt.s32.totalorder %v7026_v56, 7  ;;  %v5018_v25 = vsel %vm9275_vm11, %v5012_v21, %v9294_v30 }
 0x24b   : > { %v4802_v6 = vsel %vm9276_vm9, %v9258_v49, %v4797_v62  ;;  %vm8325_vm4 = vmand %vm9256_vm6, %vm9277_vm7  ;;  %v5024_v29 = vsel %vm8288_vm15, %v5016_v8, 0.0  ;;  %vm8345_vm15 = vcmp.eq.s32.totalorder %v4995_v23, 1  ;;  %vm9298_vm7 = vcmask 523264   ;;  %v6526_v8 = vld [vmem:[%s8789_s6 + $0xd0] sm:$0xff] }
 0x24c   : > { %vm9280_vm13 = vmmov %vm9249_vm1  ;;  %v4810_v46 = vsel %vm8276_vm0, %v4802_v6, 0.0  ;;  %v5408_v42 = vsel %vm8325_vm4, 1, %v8855_v57  ;;  %v5229_v35 = vsel %vm9298_vm7, %v9297_v63, %v5222_v41  ;;  %v5026_v44 = vsel %vm8345_vm15, %v5018_v25, 0.0 }
 0x24d   : > { %6482 = vmatpush1.msk.msra.mxu1 %vm9280_vm13, %v4595_v17  ;;  %vm9282_vm14 = vmmov %vm9276_vm9  ;;  %vm8370_vm9 = vcmp.eq.s32.totalorder %v5197_v1, 1  ;;  %vm9302_vm13 = vcmp.lt.s32.totalorder %v7013_v58, 7  ;;  %v5416_v58 = vrot.slane %v5408_v42, %v7060_v51  ;;  %v5412_v3 = vrot.slane %v5408_v42, %v7058_v55 }
 0x24e   : > { %v4803_v12 = vsel %vm9282_vm14, %v4797_v62, %v9281_v34  ;;  %vm9285_vm2 = vmmov %vm9249_vm1  ;;  %6483 = vmatmul.mubr.msk.f32.vlgmr.msra.gmra.mxu1 %vm9288_vm10, %v6477_v9  ;;  %vm9303_vm14 = vcmp.lt.s32.totalorder %v9112_v48, 7  ;;  %v5237_v48 = vsel %vm8370_vm9, %v5229_v35, 0.0  ;;  %v5226_v9 = vpop.permute.xlu0 %5225  ;;  %vm9317_vm9 = vcmp.ge.s32.totalorder %v7026_v56, 1  ;;  %v454_v62 = vld [vmem:[%s8788_s5 + $0x8] sm:$0xff] }
 0x24f   : > { %v4811_v39 = vsel %vm8298_vm3, %v4803_v12, 0.0  ;;  %6486 = vmatpush1.msk.msra.mxu0 %vm9285_vm2, %v4808_v37  ;;  %vm9289_vm0 = vmmov %vm9288_vm10  ;;  %vm8355_vm3 = vcmp.eq.s32.totalorder %v5201_v4, 1  ;;  %4964 = vmatprep.mubr.f32.mxu1 %v8910_v60  ;;  %vm8399_vm10 = vcmp.eq.s32.totalorder %v5209_v28, 1  ;;  %v5424_v23 = vrot.slane %v5408_v42, %v7069_v47  ;;  %v5441_v37 = vpop.permute.xlu1 %5440  ;;  %v6505_v12 = vld [vmem:[%s8789_s6 + $0xb8] sm:$0xff] }
 0x250   : > { %6487 = vmatmul.mubr.msk.f32.vlgmr.msra.gmra.mxu0 %vm9289_vm0, %v6484_v53  ;;  %6488 = vmatprep.subr.msk.mxu1 %vm9249_vm1, %v4811_v39  ;;  %vm9292_vm8 = vmmov %vm9249_vm1  ;;  %v5420_v31 = vrot.slane %v5408_v42, %v7063_v2 }
 0x251   : > { %6492 = vmatprep.subr.msk.mxu0 %vm9292_vm8, %v5024_v29  ;;  %vm9293_vm12 = vmmov %vm9275_vm11  ;;  %5108 = vmatprep.mubr.f32.mxu0 %v8910_v60 }
 0x252   : > { %v5017_v27 = vsel %vm9293_vm12, %v9274_v18, %v5012_v21  ;;  %vm9299_vm6 = vmmov %vm9249_vm1  ;;  %v5439_v38 = vpop.permute.xlu0 %5438  ;;  %462 = vperm.xlu1 %6565, %v454_v62  }
 0x253   : > { %6489 = vmatpush1.msk.msra.mxu1 %vm9299_vm6, %v4810_v46  ;;  %vm9301_vm4 = vmmov %vm9298_vm7  ;;  %v5025_v19 = vsel %vm8335_vm5, %v5017_v27, 0.0  ;;  %vm8408_vm5 = vcmp.eq.s32.totalorder %v5205_v33, 1 }
 0x254   : > { %v5230_v13 = vsel %vm9301_vm4, %v5222_v41, %v9300_v0  ;;  %vm8389_vm2 = vmand %vm9303_vm14, %vm9302_vm13  ;;  %6490 = vmatmul.mubr.msk.f32.vlgmr.msra.gmra.mxu1 %vm9289_vm0, %v6484_v53  ;;  %vm8437_vm13 = vcmp.eq.s32.totalorder %v5416_v58, 1  ;;  %v5435_v53 = vpop.permute.xlu1 %5434 }
 0x255   : > { %v5238_v61 = vsel %vm8355_vm3, %v5230_v13, 0.0  ;;  %vm9306_vm15 = vmmov %vm9249_vm1  ;;  %5179 = vmatprep.mubr.f32.mxu1 %v8910_v60  ;;  %v5838_v25 = vsel %vm8389_vm2, 1, %v8855_v57 }
 0x256   : > { %6493 = vmatpush1.msk.msra.mxu0 %vm9306_vm15, %v5023_v52  ;;  %vm9309_vm1 = vmmov %vm9289_vm0  ;;  %v5443_v32 = vpop.permute.xlu0 %5442  ;;  %v5842_v58 = vrot.slane %v5838_v25, %v7058_v55  ;;  %v5850_v40 = vrot.slane %v5838_v25, %v7063_v2 }
 0x257   : > { %6494 = vmatmul.mubr.msk.f32.vlgmr.msra.gmra.mxu0 %vm9309_vm1, %v6491_v7  ;;  %vm9312_vm3 = vmmov %vm9299_vm6 }
 0x258   : > { %6495 = vmatprep.subr.msk.mxu1 %vm9312_vm3, %v5026_v44  ;;  %vm9313_vm8 = vmmov %vm9312_vm3  ;;  %5322 = vmatprep.mubr.f32.mxu0 %v8910_v60  ;;  %v5655_v52 = vpop.permute.xlu1 %5654  ;;  %v6512_v44 = vld [vmem:[%s8789_s6 + $0xc0] sm:$0xff] }
 0x259   : > { %6499 = vmatprep.subr.msk.mxu0 %vm9313_vm8, %v5238_v61  ;;  %vm9314_vm12 = vmmov %vm9301_vm4  ;;  %vm8464_vm8 = vcmp.eq.s32.totalorder %v5424_v23, 1 }
 0x25a   : > { %v5231_v50 = vsel %vm9314_vm12, %v9300_v0, %v5226_v9  ;;  %vm9316_vm11 = vmmov %vm9301_vm4  ;;  %vm8469_vm12 = vcmp.eq.s32.totalorder %v5420_v31, 1  ;;  %v5653_v21 = vpop.permute.xlu0 %5652  ;;  %v5846_v0 = vrot.slane %v5838_v25, %v7060_v51 }
 0x25b   : > { %v5232_v49 = vsel %vm9316_vm11, %v5226_v9, %v9315_v20  ;;  %vm8425_vm7 = vmand %vm8389_vm2, %vm9317_vm9  ;;  %v5239_v17 = vsel %vm8408_vm5, %v5231_v50, 0.0 }
 0x25c   : > { %vm9320_vm6 = vmmov %vm9312_vm3  ;;  %v5240_v36 = vsel %vm8399_vm10, %v5232_v49, 0.0  ;;  %v5624_v1 = vsel %vm8425_vm7, 1, %v8855_v57  ;;  %v5659_v27 = vpop.permute.xlu1 %5658 }
 0x25d   : > { %6496 = vmatpush1.msk.msra.mxu1 %vm9320_vm6, %v5025_v19  ;;  %vm9321_vm4 = vmmov %vm9312_vm3  ;;  %v5632_v18 = vrot.slane %v5624_v1, %v7060_v51  ;;  %v5636_v54 = vrot.slane %v5624_v1, %v7063_v2  ;;  %v5640_v28 = vrot.slane %v5624_v1, %v7069_v47  ;;  %v5628_v42 = vrot.slane %v5624_v1, %v7058_v55 }
 0x25e   : > { %6500 = vmatpush1.msk.msra.mxu0 %vm9321_vm4, %v5237_v48  ;;  %vm9324_vm14 = vmmov %vm9289_vm0  ;;  %v5657_v30 = vpop.permute.xlu0 %5656  ;;  %v5854_v48 = vrot.slane %v5838_v25, %v7069_v47 }
 0x25f   : > { %6497 = vmatmul.mubr.msk.f32.vlgmr.msra.gmra.mxu1 %vm9324_vm14, %v6491_v7  ;;  %vm9325_vm15 = vmmov %vm9289_vm0  ;;  %vm9327_vm0 = vcmask 515072  }
 0x260   : > { %6501 = vmatmul.mubr.msk.f32.vlgmr.msra.gmra.mxu0 %vm9325_vm15, %v6498_v11  ;;  %vm9326_vm10 = vmmov %vm9312_vm3  ;;  %5393 = vmatprep.mubr.f32.mxu1 %v8910_v60  ;;  %v5445_v4 = vsel %vm9327_vm0, %v5437_v5, %v5439_v38  ;;  %v5867_v13 = vpop.permute.xlu1 %5866 }
 0x261   : > { %6502 = vmatprep.subr.msk.mxu1 %vm9326_vm10, %v5240_v36  ;;  %vm9328_vm1 = vmmov %vm9312_vm3  ;;  %v5453_v22 = vsel %vm8437_vm13, %v5445_v4, 0.0  ;;  %5537 = vmatprep.mubr.f32.mxu0 %v8910_v60  ;;  %vm8460_vm3 = vcmp.eq.s32.totalorder %v5412_v3, 1 }
 0x262   : > { %6503 = vmatpush1.msk.msra.mxu1 %vm9328_vm1, %v5239_v17  ;;  %vm9329_vm5 = vmmov %vm9328_vm1  ;;  %v5651_v19 = vpop.permute.xlu0 %5650  ;;  %v6519_v17 = vld [vmem:[%s8789_s6 + $0xc8] sm:$0xff] }
 0x263   : > { %6506 = vmatprep.subr.msk.mxu0 %vm9329_vm5, %v5453_v22  ;;  %vm9336_vm11 = vmmov %vm9327_vm0 }
 0x264   : > { %v5446_v6 = vsel %vm9336_vm11, %v5439_v38, %v5441_v37  ;;  %vm9337_vm9 = vmmov %vm9324_vm14  ;;  %vm5642_vm14 = vcmp.eq.s32.totalorder %v5632_v18, 1 }
 0x265   : > { %6504 = vmatmul.mubr.msk.f32.vlgmr.msra.gmra.mxu1 %vm9337_vm9, %v6498_v11  ;;  %vm9338_vm7 = vmmov %vm9327_vm0  ;;  %v5454_v39 = vsel %vm8469_vm12, %v5446_v6, 0.0 }
 0x266   : > { %v5444_v29 = vsel %vm9338_vm7, %v5435_v53, %v5437_v5  ;;  %vm9339_vm6 = vmmov %vm9327_vm0  ;;  %5608 = vmatprep.mubr.f32.mxu1 %v8910_v60  ;;  %vm9344_vm0 = vcmask 465920   ;;  %vm5641_vm7 = vcmp.eq.s32.totalorder %v5628_v42, 1  ;;  %v5871_v5 = vpop.permute.xlu1 %5870  ;;  %v5869_v9 = vpop.permute.xlu0 %5868 }
 0x267   : > { %v5447_v34 = vsel %vm9339_vm6, %v5441_v37, %v5443_v32  ;;  %v5452_v26 = vsel %vm8460_vm3, %v5444_v29, 0.0  ;;  %vm9340_vm4 = vmmov %vm9328_vm1  ;;  %v5661_v45 = vsel %vm9344_vm0, %v5653_v21, %v5655_v52  ;;  %vm8498_vm3 = vcmp.eq.s32.totalorder %v5636_v54, 1  ;;  %v549_v53 = vpop.f32.mrf.mxu0  ;;  %v626_v32 = vpop.f32.mrf.mxu1 }
 0x268   : > { %v5455_v46 = vsel %vm8464_vm8, %v5447_v34, 0.0  ;;  %6507 = vmatpush1.msk.msra.mxu0 %vm9340_vm4, %v5452_v26  ;;  %vm9341_vm13 = vmmov %vm9328_vm1  ;;  %v5669_v41 = vsel %vm5642_vm14, %v5661_v45, 0.0  ;;  %vm5644_vm8 = vcmp.eq.s32.totalorder %v5640_v28, 1  ;;  %vm9355_vm14 = vcmp.lt.s32.totalorder %v7026_v56, 7 }
 0x269   : > { %6509 = vmatprep.subr.msk.mxu1 %vm9341_vm13, %v5455_v46  ;;  %vm9342_vm15 = vmmov %vm9328_vm1  ;;  %v628_v29 = vpop.f32.mrf.mxu1  ;;  %v551_v34 = vpop.f32.mrf.mxu0 }
 0x26a   : > { %6510 = vmatpush1.msk.msra.mxu1 %vm9342_vm15, %v5454_v39  ;;  %vm9343_vm10 = vmmov %vm9337_vm9  ;;  %v5865_v11 = vpop.permute.xlu1 %5864  ;;  %v5873_v43 = vpop.permute.xlu0 %5872 }
 0x26b   : > { %6508 = vmatmul.mubr.msk.f32.vlgmr.msra.gmra.mxu0 %vm9343_vm10, %v6505_v12  ;;  %vm9345_vm1 = vmmov %vm9337_vm9  ;;  %v632_v42 = vpop.f32.mrf.mxu1 }
 0x26c   : > { %6511 = vmatmul.mubr.msk.f32.vlgmr.msra.gmra.mxu1 %vm9345_vm1, %v6505_v12  ;;  %5753 = vmatprep.mubr.f32.mxu0 %v8910_v60  ;;  %vm9346_vm5 = vmmov %vm9340_vm4 }
 0x26d   : > { %5824 = vmatprep.mubr.f32.mxu1 %v8910_v60  ;;  %6513 = vmatprep.subr.msk.mxu0 %vm9346_vm5, %v5669_v41  ;;  %vm9349_vm12 = vmmov %vm9344_vm0  ;;  %v555_v41 = vpop.f32.mrf.mxu0 }
 0x26e   : > { %v5662_v24 = vsel %vm9349_vm12, %v5655_v52, %v5657_v30  ;;  %vm9350_vm11 = vmmov %vm9344_vm0  ;;  %vm5857_vm12 = vcmp.eq.s32.totalorder %v5850_v40, 1  ;;  %v6082_v37 = vpop.permute.xlu0 %6081 }
 0x26f   : > { %v5663_v63 = vsel %vm9350_vm11, %v5657_v30, %v5659_v27  ;;  %v5670_v35 = vsel %vm8498_vm3, %v5662_v24, 0.0  ;;  %vm9351_vm9 = vmmov %vm9340_vm4  ;;  %vm5855_vm3 = vcmp.eq.s32.totalorder %v5842_v58, 1  ;;  %v557_v33 = vpop.f32.mrf.mxu0  ;;  %v634_v30 = vpop.f32.mrf.mxu1 }
 0x270   : > { %v5671_v7 = vsel %vm5644_vm8, %v5663_v63, 0.0  ;;  %vm9352_vm6 = vmmov %vm9340_vm4  ;;  %vm5858_vm8 = vcmp.eq.s32.totalorder %v5854_v48, 1 }
 0x271   : > { %6516 = vmatprep.subr.msk.mxu1 %vm9351_vm9, %v5671_v7  ;;  %vm9353_vm4 = vmmov %vm9344_vm0  ;;  %vm5856_vm0 = vcmp.eq.s32.totalorder %v5846_v0, 1 }
 0x272   : > { %6517 = vmatpush1.msk.msra.mxu1 %vm9352_vm6, %v5670_v35  ;;  %v5660_v61 = vsel %vm9353_vm4, %v5651_v19, %v5653_v21  ;;  %vm9354_vm13 = vmmov %vm9345_vm1  ;;  %v6086_v22 = vpop.permute.xlu0 %6085 }
 0x273   : > { %6518 = vmatmul.mubr.msk.f32.vlgmr.msra.gmra.mxu1 %vm9354_vm13, %v6512_v44  ;;  %vm6052_vm15 = vmand %vm8389_vm2, %vm9355_vm14  ;;  %v5668_v15 = vsel %vm5641_vm7, %v5660_v61, 0.0 }
 0x274   : > { %6038 = vmatprep.mubr.f32.mxu1 %v8910_v60  ;;  %vm9356_vm10 = vmmov %vm9346_vm5  ;;  %v6053_v56 = vsel %vm6052_vm15, 1, %v8855_v57  ;;  %vm9357_vm5 = vcmask 457728  }
 0x275   : > { %6514 = vmatpush1.msk.msra.mxu0 %vm9356_vm10, %v5668_v15  ;;  %v5875_v10 = vsel %vm9357_vm5, %v5867_v13, %v5869_v9  ;;  %vm9358_vm2 = vmmov %vm9352_vm6  ;;  %v6061_v20 = vrot.slane %v6053_v56, %v7060_v51  ;;  %v6084_v51 = vpop.permute.xlu1 %6083  ;;  %v6065_v31 = vrot.slane %v6053_v56, %v7063_v2  ;;  %v6069_v38 = vrot.slane %v6053_v56, %v7069_v47 }
 0x276   : > { %6515 = vmatmul.mubr.msk.f32.vlgmr.msra.gmra.mxu0 %vm9345_vm1, %v6512_v44  ;;  %v5883_v50 = vsel %vm5856_vm0, %v5875_v10, 0.0  ;;  %vm9359_vm11 = vmmov %vm9357_vm5  ;;  %vm9366_vm10 = vcmask 449536   ;;  %v6057_v14 = vrot.slane %v6053_v56, %v7058_v55 }
 0x277   : > { %5967 = vmatprep.mubr.f32.mxu0 %v8910_v60  ;;  %6520 = vmatprep.subr.msk.mxu0 %vm9358_vm2, %v5883_v50  ;;  %v5876_v49 = vsel %vm9359_vm11, %v5869_v9, %v5871_v5  ;;  %vm9360_vm9 = vmmov %vm9357_vm5  ;;  %vm6071_vm13 = vcmp.eq.s32.totalorder %v6061_v20, 1  ;;  %v6090_v62 = vsel %vm9366_vm10, %v6082_v37, %v6084_v51 }
 0x278   : > { %v5874_v36 = vsel %vm9360_vm9, %v5865_v11, %v5867_v13  ;;  %vm9361_vm7 = vmmov %vm9357_vm5  ;;  %v5884_v23 = vsel %vm5857_vm12, %v5876_v49, 0.0  ;;  %v6098_v1 = vsel %vm6071_vm13, %v6090_v62, 0.0  ;;  %vm6072_vm5 = vcmp.eq.s32.totalorder %v6065_v31, 1 }
 0x279   : > { %v5877_v57 = vsel %vm9361_vm7, %v5871_v5, %v5873_v43  ;;  %v5882_v59 = vsel %vm5855_vm3, %v5874_v36, 0.0  ;;  %vm9362_vm6 = vmmov %vm9358_vm2  ;;  %v6088_v4 = vpop.permute.xlu1 %6087  ;;  %vm6070_vm9 = vcmp.eq.s32.totalorder %v6057_v14, 1 }
 0x27a   : > { %v5885_v3 = vsel %vm5858_vm8, %v5877_v57, 0.0  ;;  %6521 = vmatpush1.msk.msra.mxu0 %vm9362_vm6, %v5882_v59  ;;  %vm9363_vm4 = vmmov %vm9358_vm2 }
 0x27b   : > { %6523 = vmatprep.subr.msk.mxu1 %vm9363_vm4, %v5885_v3  ;;  %vm9364_vm14 = vmmov %vm9358_vm2 }
 0x27c   : > { %6524 = vmatpush1.msk.msra.mxu1 %vm9364_vm14, %v5884_v23  ;;  %vm9365_vm15 = vmmov %vm9345_vm1 }
 0x27d   : > { %6522 = vmatmul.mubr.msk.f32.vlgmr.msra.gmra.mxu0 %vm9365_vm15, %v6519_v17  ;;  %vm9367_vm0 = vmmov %vm9345_vm1 }
 0x27e   : > { %6525 = vmatmul.mubr.msk.f32.vlgmr.msra.gmra.mxu1 %vm9367_vm0, %v6519_v17  ;;  %6182 = vmatprep.mubr.f32.mxu0 %v8910_v60  ;;  %vm9368_vm1 = vmmov %vm9358_vm2  ;;  %vm6073_vm2 = vcmp.eq.s32.totalorder %v6069_v38, 1 }
 0x27f   : > { %6253 = vmatprep.mubr.f32.mxu1 %v8910_v60  ;;  %6527 = vmatprep.subr.msk.mxu0 %vm9368_vm1, %v6098_v1  ;;  %vm9369_vm3 = vmmov %vm9366_vm10  ;;  %v6080_v60 = vpop.permute.xlu0 %6079 }
 0x280   : > { %v6091_v2 = vsel %vm9369_vm3, %v6084_v51, %v6086_v22  ;;  %vm9370_vm8 = vmmov %vm9369_vm3 }
 0x281   : > { %v6092_v47 = vsel %vm9370_vm8, %v6086_v22, %v6088_v4  ;;  %v6099_v16 = vsel %vm6072_vm5, %v6091_v2, 0.0  ;;  %vm9371_vm12 = vmmov %vm9368_vm1 }
 0x282   : > { %v6100_v18 = vsel %vm6073_vm2, %v6092_v47, 0.0  ;;  %vm9372_vm11 = vmmov %vm9368_vm1 }
 0x283   : > { %6530 = vmatprep.subr.msk.mxu1 %vm9371_vm12, %v6100_v18  ;;  %vm9373_vm7 = vmmov %vm9367_vm0  ;;  %v458_v12 = vpop.permute.xlu0 %457 }
 0x284   : > { %6531 = vmatpush1.msk.msra.mxu1 %vm9372_vm11, %v6099_v16  ;;  %vm9374_vm6 = vmmov %vm9369_vm3  ;;  %v550_v26 = vadd.f32 %v549_v53, %v458_v12  ;;  %v627_v46 = vadd.f32 %v626_v32, %v458_v12  ;;  %v629_v39 = vadd.f32 %v628_v29, %v458_v12  ;;  %v552_v54 = vadd.f32 %v551_v34, %v458_v12 }
 0x285   : > { %6532 = vmatmul.mubr.msk.f32.vlgmr.msra.gmra.mxu1 %vm9373_vm7, %v6526_v8  ;;  %v6089_v55 = vsel %vm9374_vm6, %v6080_v60, %v6082_v37  ;;  %vm9375_vm4 = vmmov %vm9368_vm1 }
 0x286   : > { %v6097_v6 = vsel %vm6070_vm9, %v6089_v55, 0.0  ;;  %vm9376_vm13 = vmmov %vm9367_vm0  ;;  %v637_v28 = vmax.f32 %v550_v26, 0.0  ;;  %v639_v52 = vmax.f32 %v627_v46, 0.0  ;;  %v640_v21 = vmax.f32 %v629_v39, 0.0 }
 0x287   : > { %6528 = vmatpush1.msk.msra.mxu0 %vm9375_vm4, %v6097_v6  ;;  %v638_v45 = vmax.f32 %v552_v54, 0.0 }
 0x288   : > { %6529 = vmatmul.mubr.msk.f32.vlgmr.msra.gmra.mxu0 %vm9376_vm13, %v6526_v8  ;;  %641 = vst [vmem:[%s8566_s13] sm:$0xff] %v637_v28  ;;  %643 = vst [vmem:[%s8566_s13 + $0x10] sm:$0xff] %v639_v52 }
 0x289   : > { %644 = vst [vmem:[%s8566_s13 + $0x18] sm:$0xff] %v640_v21  ;;  %642 = vst [vmem:[%s8566_s13 + $0x8] sm:$0xff] %v638_v45 }
 0x28d   : > { %v800_v27 = vpop.f32.mrf.mxu0 }
 0x28f   : > { %v802_v25 = vpop.f32.mrf.mxu0 }
 0x293   : > { %v871_v24 = vpop.f32.mrf.mxu1 }
 0x295   : > { %v873_v35 = vpop.f32.mrf.mxu1 }
 0x296   : > { %v1015_v63 = vpop.f32.mrf.mxu0 }
 0x298   : > { %v8572_v7 = vpop.f32.mrf.mxu0 }
 0x29c   : > { %v1086_v44 = vpop.f32.mrf.mxu1 }
 0x29d   : > { %v8574_v0 = vpop.f32.mrf.mxu0 }
 0x29e   : > { %v1088_v13 = vpop.f32.mrf.mxu1 }
 0x29f   : > { %v8576_v19 = vpop.f32.mrf.mxu0 }
 0x2a2   : > { %v1302_v61 = vpop.f32.mrf.mxu1 }
 0x2a3   : > { %v8578_v15 = vpop.f32.mrf.mxu0 }
 0x2a4   : > { %v8580_v58 = vpop.f32.mrf.mxu1 }
 0x2a5   : > { %v8582_v48 = vpop.f32.mrf.mxu0 }
 0x2a8   : > { %v8584_v5 = vpop.f32.mrf.mxu1 }
 0x2a9   : > { %v8586_v40 = vpop.f32.mrf.mxu0 }
 0x2aa   : > { %v8588_v9 = vpop.f32.mrf.mxu1 }
 0x2ab   : > { %v8590_v56 = vpop.f32.mrf.mxu0 }
 0x2ad   : > { %v8592_v10 = vpop.f32.mrf.mxu1 }
 0x2af   : > { %v8594_v50 = vpop.f32.mrf.mxu0  ;;  %v8596_v20 = vpop.f32.mrf.mxu1 }
 0x2b1   : > { %v8598_v49 = vpop.f32.mrf.mxu0 }
 0x2b5   : > { %v8600_v11 = vpop.f32.mrf.mxu1 }
 0x2b6   : > { %v8602_v43 = vpop.f32.mrf.mxu0 }
 0x2b7   : > { %v8604_v36 = vpop.f32.mrf.mxu1 }
 0x2b8   : > { %v8606_v57 = vpop.f32.mrf.mxu0 }
 0x2b9   : > { %v8608_v17 = vpop.f32.mrf.mxu1 }
 0x2bb   : > { %v8610_v59 = vpop.f32.mrf.mxu0  ;;  %v8612_v3 = vpop.f32.mrf.mxu1 }
 0x2bd   : > { %v8614_v23 = vpop.f32.mrf.mxu0 }
 0x2c0   : > { %v8616_v51 = vpop.f32.mrf.mxu1 }
 0x2c1   : > { %v8618_v37 = vpop.f32.mrf.mxu0 }
 0x2c2   : > { %v8620_v31 = vpop.f32.mrf.mxu1 }
 0x2c3   : > { %v8622_v38 = vpop.f32.mrf.mxu0 }
 0x2c5   : > { %v8624_v62 = vpop.f32.mrf.mxu1 }
 0x2c7   : > { %v8626_v1 = vpop.f32.mrf.mxu0  ;;  %v8628_v4 = vpop.f32.mrf.mxu1 }
 0x2c9   : > { %v8630_v22 = vpop.f32.mrf.mxu0 }
 0x2ca   : > { %v8632_v14 = vpop.f32.mrf.mxu1 }
 0x2cc   : > { %v8634_v2 = vpop.f32.mrf.mxu0  ;;  %v8636_v47 = vpop.f32.mrf.mxu1 }
 0x2cd   : > { %v463_v18 = vpop.permute.xlu1 %462 }
 0x2ce   : > { %v8638_v16 = vpop.f32.mrf.mxu0  ;;  %v556_v53 = vadd.f32 %v555_v41, %v463_v18  ;;  %v633_v32 = vadd.f32 %v632_v42, %v463_v18  ;;  %v558_v46 = vadd.f32 %v557_v33, %v463_v18  ;;  %v635_v39 = vadd.f32 %v634_v30, %v463_v18 }
 0x2d0   : > { %v8640_v8 = vpop.f32.mrf.mxu1  ;;  %v876_v54 = vadd.f32 %v800_v27, %v556_v53  ;;  %v878_v28 = vadd.f32 %v871_v24, %v633_v32  ;;  %v877_v42 = vadd.f32 %v802_v25, %v558_v46 }
 0x2d2   : > { %v8642_v60 = vpop.f32.mrf.mxu0  ;;  %v8644_v55 = vpop.f32.mrf.mxu1  ;;  %v1092_v30 = vadd.f32 %v8572_v7, %v877_v42 }
 0x2d3   : > { %9377 = vst [vmem:[#allocation12_spill] sm:$0xff] %v8644_v55 }
 0x2d4   : > { %v8646_v6 = vpop.f32.mrf.mxu0  ;;  %v1308_v46 = vadd.f32 %v8576_v19, %v1092_v30 }
 0x2d5   : > { %9378 = vst [vmem:[#allocation14_spill] sm:$0xff] %v8646_v6  ;;  %v879_v6 = vadd.f32 %v873_v35, %v635_v39 }
 0x2d7   : > { %v1094_v24 = vadd.f32 %v1088_v13, %v879_v6 }
 0x2d8   : > { %v8648_v29 = vpop.f32.mrf.mxu1 }
 0x2d9   : > { %9379 = vst [vmem:[#allocation18_spill] sm:$0xff] %v8648_v29  ;;  %v8650_v34 = vpop.f32.mrf.mxu0  ;;  %v1091_v29 = vadd.f32 %v1015_v63, %v876_v54 }
 0x2da   : > { %9380 = vst [vmem:[#allocation13_spill] sm:$0xff] %v8650_v34  ;;  %v8652_v12 = vpop.f32.mrf.mxu1  ;;  %v1093_v34 = vadd.f32 %v1086_v44, %v878_v28  ;;  %v1310_v44 = vadd.f32 %v8580_v58, %v1094_v24 }
 0x2db   : > { %9381 = vst [vmem:[#allocation16_spill] sm:$0xff] %v8652_v12  ;;  %v8654_v26 = vpop.f32.mrf.mxu0  ;;  %v1307_v18 = vadd.f32 %v8574_v0, %v1091_v29 }
 0x2dc   : > { %v1309_v53 = vadd.f32 %v1302_v61, %v1093_v34  ;;  %v1526_v29 = vadd.f32 %v8588_v9, %v1310_v44  ;;  %v1524_v34 = vadd.f32 %v8582_v48, %v1308_v46 }
 0x2dd   : > { %v1523_v7 = vadd.f32 %v8578_v15, %v1307_v18 }
 0x2de   : > { %v8656_v52 = vpop.f32.mrf.mxu1  ;;  %v1525_v39 = vadd.f32 %v8584_v5, %v1309_v53  ;;  %v1741_v28 = vadd.f32 %v8596_v20, %v1526_v29  ;;  %v1739_v42 = vadd.f32 %v8590_v56, %v1524_v34 }
 0x2df   : > { %v1738_v19 = vadd.f32 %v8586_v40, %v1523_v7 }
 0x2e0   : > { %v8658_v21 = vpop.f32.mrf.mxu0  ;;  %v8660_v45 = vpop.f32.mrf.mxu1  ;;  %v1740_v58 = vadd.f32 %v8592_v10, %v1525_v39  ;;  %v1957_v40 = vadd.f32 %v8604_v36, %v1741_v28  ;;  %v1955_v18 = vadd.f32 %v8598_v49, %v1739_v42 }
 0x2e1   : > { %v1954_v9 = vadd.f32 %v8594_v50, %v1738_v19 }
 0x2e2   : > { %v8662_v41 = vpop.f32.mrf.mxu0  ;;  %v1956_v30 = vadd.f32 %v8600_v11, %v1740_v58  ;;  %v2172_v50 = vadd.f32 %v8606_v57, %v1955_v18  ;;  %v2174_v39 = vadd.f32 %v8612_v3, %v1957_v40  ;;  %v9382_v40 = vld [vmem:[#allocation12_spill] sm:$0xff]  ;;  %v9383_v18 = vld [vmem:[#allocation18_spill] sm:$0xff] }
 0x2e3   : > { %v2171_v20 = vadd.f32 %v8602_v43, %v1954_v9 }
 0x2e4   : > { %v2173_v53 = vadd.f32 %v8608_v17, %v1956_v30  ;;  %v2387_v17 = vadd.f32 %v8614_v23, %v2172_v50  ;;  %v2389_v29 = vadd.f32 %v8620_v31, %v2174_v39  ;;  %v9386_v39 = vld [vmem:[#allocation13_spill] sm:$0xff] }
 0x2e5   : > { %v2386_v46 = vadd.f32 %v8610_v59, %v2171_v20 }
 0x2e6   : > { %v8664_v55 = vpop.f32.mrf.mxu1  ;;  %v2388_v7 = vadd.f32 %v8616_v51, %v2173_v53  ;;  %v2603_v59 = vadd.f32 %v8622_v38, %v2387_v17  ;;  %v2605_v51 = vadd.f32 %v8628_v4, %v2389_v29  ;;  %v9384_v53 = vld [vmem:[#allocation16_spill] sm:$0xff] }
 0x2e7   : > { %v2602_v43 = vadd.f32 %v8618_v37, %v2386_v46  ;;  %v9385_v46 = vld [vmem:[#allocation14_spill] sm:$0xff] }
 0x2e8   : > { %v8666_v12 = vpop.f32.mrf.mxu0  ;;  %v8668_v33 = vpop.f32.mrf.mxu1  ;;  %v2604_v34 = vadd.f32 %v8624_v62, %v2388_v7  ;;  %v2819_v23 = vadd.f32 %v8630_v22, %v2603_v59  ;;  %v2821_v31 = vadd.f32 %v8636_v47, %v2605_v51 }
 0x2e9   : > { %v2818_v3 = vadd.f32 %v8626_v1, %v2602_v43 }
 0x2ea   : > { %v8670_v27 = vpop.f32.mrf.mxu0  ;;  %v2820_v19 = vadd.f32 %v8632_v14, %v2604_v34  ;;  %v3034_v38 = vadd.f32 %v8638_v16, %v2819_v23  ;;  %v3036_v4 = vadd.f32 %v9382_v40, %v2821_v31 }
 0x2eb   : > { %v3033_v37 = vadd.f32 %v8634_v2, %v2818_v3 }
 0x2ec   : > { %v3035_v62 = vadd.f32 %v8640_v8, %v2820_v19  ;;  %v3252_v20 = vadd.f32 %v9384_v53, %v3036_v4  ;;  %v3250_v47 = vadd.f32 %v9385_v46, %v3034_v38 }
 0x2ed   : > { %v3249_v1 = vadd.f32 %v8642_v60, %v3033_v37 }
 0x2ee   : > { %v3251_v14 = vadd.f32 %v9383_v18, %v3035_v62  ;;  %v3467_v7 = vadd.f32 %v8660_v45, %v3252_v20  ;;  %v3465_v34 = vadd.f32 %v8654_v26, %v3250_v47 }
 0x2ef   : > { %v8674_v32 = vpop.f32.mrf.mxu1  ;;  %v3464_v8 = vadd.f32 %v9386_v39, %v3249_v1 }
 0x2f0   : > { %v8676_v25 = vpop.f32.mrf.mxu0  ;;  %v3466_v22 = vadd.f32 %v8656_v52, %v3251_v14  ;;  %v3682_v60 = vadd.f32 %v8668_v33, %v3467_v7  ;;  %v3680_v19 = vadd.f32 %v8662_v41, %v3465_v34 }
 0x2f1   : > { %v8678_v63 = vpop.f32.mrf.mxu1  ;;  %v3679_v52 = vadd.f32 %v8658_v21, %v3464_v8 }
 0x2f2   : > { %v8680_v35 = vpop.f32.mrf.mxu0  ;;  %v3681_v16 = vadd.f32 %v8664_v55, %v3466_v22  ;;  %v3898_v59 = vadd.f32 %v8678_v63, %v3682_v60  ;;  %v3896_v23 = vadd.f32 %v8670_v27, %v3680_v19 }
 0x2f3   : > { %v3895_v45 = vadd.f32 %v8666_v12, %v3679_v52 }
 0x2f4   : > { %v3897_v17 = vadd.f32 %v8674_v32, %v3681_v16  ;;  %v4111_v31 = vadd.f32 %v8680_v35, %v3896_v23 }
 0x2f5   : > { %v8686_v13 = vpop.f32.mrf.mxu1  ;;  %v4110_v26 = vadd.f32 %v8676_v25, %v3895_v45 }
 0x2f6   : > { %v4112_v3 = vadd.f32 %v8686_v13, %v3897_v17 }
 0x2f7   : > { %v8688_v0 = vpop.f32.mrf.mxu0  ;;  %v8690_v61 = vpop.f32.mrf.mxu1 }
 0x2f8   : > { %v4113_v55 = vadd.f32 %v8690_v61, %v3898_v59  ;;  %v4326_v41 = vadd.f32 %v8688_v0, %v4110_v26 }
 0x2f9   : > { %v8692_v6 = vpop.f32.mrf.mxu0 }
 0x2fd   : > { %v8698_v54 = vpop.f32.mrf.mxu1 }
 0x2fe   : > { %v4328_v33 = vadd.f32 %v8698_v54, %v4112_v3  ;;  %v4327_v54 = vadd.f32 %v8692_v6, %v4111_v31 }
 0x2ff   : > { %v8700_v5 = vpop.f32.mrf.mxu0  ;;  %v8702_v15 = vpop.f32.mrf.mxu1 }
 0x300   : > { %v4329_v21 = vadd.f32 %v8702_v15, %v4113_v55  ;;  %v4542_v27 = vadd.f32 %v8700_v5, %v4326_v41 }
 0x301   : > { %v8710_v48 = vpop.f32.mrf.mxu0 }
 0x307   : > { %v8708_v24 = vpop.f32.mrf.mxu1 }
 0x308   : > { %v8718_v56 = vpop.f32.mrf.mxu0  ;;  %v4544_v63 = vadd.f32 %v8708_v24, %v4328_v33  ;;  %v4543_v24 = vadd.f32 %v8710_v48, %v4327_v54 }
 0x309   : > { %v8712_v10 = vpop.f32.mrf.mxu1  ;;  %v4756_v1 = vadd.f32 %v8718_v56, %v4542_v27 }
 0x30a   : > { %v8726_v36 = vpop.f32.mrf.mxu0  ;;  %v4545_v12 = vadd.f32 %v8712_v10, %v4329_v21 }
 0x30b   : > { %v4757_v10 = vadd.f32 %v8726_v36, %v4543_v24 }
 0x30e   : > { %v4751_v44 = vpop.f32.mrf.mxu1 }
 0x30f   : > { %v4758_v61 = vadd.f32 %v4751_v44, %v4544_v63 }
 0x310   : > { %v8720_v11 = vpop.f32.mrf.mxu1  ;;  %v8732_v58 = vpop.f32.mrf.mxu0 }
 0x311   : > { %v4759_v25 = vadd.f32 %v8720_v11, %v4545_v12  ;;  %v4971_v44 = vadd.f32 %v8732_v58, %v4756_v1 }
 0x312   : > { %v4897_v28 = vpop.f32.mrf.mxu0 }
 0x313   : > { %v4972_v5 = vadd.f32 %v4897_v28, %v4757_v10 }
 0x314   : > { %v4966_v49 = vpop.f32.mrf.mxu1 }
 0x315   : > { %v4973_v38 = vadd.f32 %v4966_v49, %v4758_v61 }
 0x316   : > { %v4968_v57 = vpop.f32.mrf.mxu1 }
 0x317   : > { %v5110_v30 = vpop.f32.mrf.mxu0  ;;  %v4974_v40 = vadd.f32 %v4968_v57, %v4759_v25 }
 0x318   : > { %v5186_v53 = vadd.f32 %v5110_v30, %v4971_v44 }
 0x319   : > { %v5112_v50 = vpop.f32.mrf.mxu0 }
 0x31a   : > { %v5187_v22 = vadd.f32 %v5112_v50, %v4972_v5 }
 0x31f   : > { %v5181_v42 = vpop.f32.mrf.mxu1 }
 0x320   : > { %v5324_v43 = vpop.f32.mrf.mxu0  ;;  %v5188_v35 = vadd.f32 %v5181_v42, %v4973_v38 }
 0x321   : > { %v5183_v9 = vpop.f32.mrf.mxu1  ;;  %v5400_v48 = vadd.f32 %v5324_v43, %v5186_v53 }
 0x322   : > { %v5326_v32 = vpop.f32.mrf.mxu0  ;;  %v5189_v18 = vadd.f32 %v5183_v9, %v4974_v40 }
 0x323   : > { %v5401_v47 = vadd.f32 %v5326_v32, %v5187_v22 }
 0x325   : > { %v5395_v2 = vpop.f32.mrf.mxu1 }
 0x326   : > { %v5402_v6 = vadd.f32 %v5395_v2, %v5188_v35 }
 0x327   : > { %v5397_v29 = vpop.f32.mrf.mxu1 }
 0x328   : > { %v5403_v11 = vadd.f32 %v5397_v29, %v5189_v18 }
 0x32b   : > { %v5539_v37 = vpop.f32.mrf.mxu0 }
 0x32c   : > { %v5610_v51 = vpop.f32.mrf.mxu1  ;;  %v5615_v39 = vadd.f32 %v5539_v37, %v5400_v48 }
 0x32d   : > { %v5541_v15 = vpop.f32.mrf.mxu0  ;;  %v5617_v49 = vadd.f32 %v5610_v51, %v5402_v6 }
 0x32e   : > { %v5612_v13 = vpop.f32.mrf.mxu1  ;;  %v5616_v9 = vadd.f32 %v5541_v15, %v5401_v47 }
 0x32f   : > { %v5618_v46 = vadd.f32 %v5612_v13, %v5403_v11 }
 0x333   : > { %v5826_v62 = vpop.f32.mrf.mxu1 }
 0x334   : > { %v5833_v56 = vadd.f32 %v5826_v62, %v5617_v49 }
 0x335   : > { %v5828_v4 = vpop.f32.mrf.mxu1 }
 0x336   : > { %v5755_v0 = vpop.f32.mrf.mxu0  ;;  %v5834_v36 = vadd.f32 %v5828_v4, %v5618_v46 }
 0x337   : > { %v5831_v2 = vadd.f32 %v5755_v0, %v5615_v39 }
 0x338   : > { %v5757_v20 = vpop.f32.mrf.mxu0 }
 0x339   : > { %v5832_v50 = vadd.f32 %v5757_v20, %v5616_v9 }
 0x33d   : > { %v5969_v57 = vpop.f32.mrf.mxu0 }
 0x33e   : > { %v6040_v14 = vpop.f32.mrf.mxu1  ;;  %v6045_v60 = vadd.f32 %v5969_v57, %v5831_v2 }
 0x33f   : > { %v6047_v8 = vadd.f32 %v6040_v14, %v5833_v56  ;;  %v5971_v7 = vpop.f32.mrf.mxu0 }
 0x340   : > { %v6042_v42 = vpop.f32.mrf.mxu1  ;;  %v6046_v34 = vadd.f32 %v5971_v7, %v5832_v50 }
 0x341   : > { %v6048_v28 = vadd.f32 %v6042_v42, %v5834_v36 }
 0x345   : > { %v6255_v58 = vpop.f32.mrf.mxu1 }
 0x346   : > { %v6262_v30 = vadd.f32 %v6255_v58, %v6047_v8 }
 0x347   : > { %v6257_v16 = vpop.f32.mrf.mxu1 }
 0x348   : > { %v6266_v17 = vmax.f32 %v6262_v30, 0.0  ;;  %v6263_v43 = vadd.f32 %v6257_v16, %v6048_v28  ;;  %v6184_v29 = vpop.f32.mrf.mxu0 }
 0x349   : > { %v6260_v59 = vadd.f32 %v6184_v29, %v6045_v60 }
 0x34a   : > { %6270 = vst [vmem:[%s8566_s13 + $0x30] sm:$0xff] %v6266_v17  ;;  %v6267_v52 = vmax.f32 %v6263_v43, 0.0  ;;  %v6186_v3 = vpop.f32.mrf.mxu0 }
 0x34b   : > { %v6264_v51 = vmax.f32 %v6260_v59, 0.0  ;;  %v6261_v19 = vadd.f32 %v6186_v3, %v6046_v34 }
 0x34c   : > { %6271 = vst [vmem:[%s8566_s13 + $0x38] sm:$0xff] %v6267_v52 }
 0x34d   : > { %6268 = vst [vmem:[%s8566_s13 + $0x20] sm:$0xff] %v6264_v51  ;;  %v6265_v45 = vmax.f32 %v6261_v19, 0.0 }
 0x34f   : > { %6269 = vst [vmem:[%s8566_s13 + $0x28] sm:$0xff] %v6265_v45 }
 0x350 PF: > { %s17_s24 = sadd.s32 1, %s6578_s24  }
 0x351   : > { %p14_p4 = scmp.ge.s32.totalorder %s17_s24, 4  }
 0x353   :  { %16 = sbr.rel (!%p14_p4) target bundleno = 1 (0x1), region = 105 }

</bundles_post_ra>
